<compile_context>
chip_gen: v7x
topology: tpu7x:2x2x1
jax: 0.10.0
libtpu: 0.0.40
codegen_flags: <defaults>
</compile_context>

<pallas_src>
import functools

import jax
import jax.numpy as jnp
from jax import lax
from jax.experimental import pallas as pl
from jax.experimental.pallas import tpu as pltpu

# TODO(synk): reference module defaults to float64; TPU Pallas kernels run float32.
DTYPE = jnp.float32

_LANE = 128
_SUB = 8
_VMEM_LIMIT = 48 * 1024 * 1024   # raised scoped VMEM, still under v7x's 64 MiB


# ----------------------------------------------------------------------------
# tiling helpers
# ----------------------------------------------------------------------------
def _round_up(v, m):
    return ((v + m - 1) // m) * m


def _plan_cols(n, max_tile):
    """Pad `n` / pick a train-column (lane-axis) tile.

    Single full-extent tile when n fits, otherwise a multiple of 128."""
    if n <= max_tile:
        p = _round_up(max(n, 1), _SUB)
        return p, p
    return _round_up(n, max_tile), max_tile


def _plan_rows(n, max_tile):
    """Eval-row (sublane-axis) tiling.  Prefer >= 2 row tiles so the 'parallel'
    grid axis can split across v7x's two TensorCores."""
    n = max(n, 1)
    if n <= _SUB:
        return _SUB, _SUB
    half = _round_up((n + 1) // 2, _SUB)
    te = max(_SUB, min(max_tile, half))
    return _round_up(n, te), te


def _blocks_tiles(Nx, NX, D, budget_bytes=12 * 1024 * 1024):
    """Row/column tiles for the blocks kernel, sized so the double-buffered f32
    hessian output tile (D, te, D(padded), tn) stays within `budget_bytes`."""
    # TODO(synk): assumes D = 3*Natom is modest; very large molecules would
    # additionally need tiling over the coordinate axes.
    Dp = _round_up(D, _SUB)                       # sublane padding of kdd's d axis
    te_cap = max(_SUB, (budget_bytes // (8 * D * Dp * _LANE)) // _SUB * _SUB)
    Nx_pad, te = _plan_rows(Nx, min(64, te_cap))
    tn_cap = max(_LANE, (budget_bytes // max(8 * D * Dp * te, 1)) // _LANE * _LANE)
    NX_pad, tn = _plan_cols(NX, tn_cap)
    return Nx_pad, te, NX_pad, tn


def _pad2(a, rows, cols):
    return jnp.pad(a, ((0, rows - a.shape[0]), (0, cols - a.shape[1])))


# ----------------------------------------------------------------------------
# Pallas kernel 1: SE kernel with derivatives (training-matrix blocks)
#   kee[i, j]        = w^2 exp(-|x_i - X_j|^2 / (2 l^2))
#   kd [i, d, j]     = kee * (x_i - X_j)_d / l^2            (= dk/dX_d)
#   kdd[c, i, d, j]  = kee * (delta_cd - (x-X)_c (x-X)_d / l^2) / l^2
# kdd is emitted directly in the coordinate-major K_XX sub-block layout, kd in
# the energy-row layout, so train_model only reshapes (no transposes).
# ----------------------------------------------------------------------------
def _fp_blocks_kernel(params_ref, xe_ref, Xe_ref, xq_ref, Xq_ref,
                      kee_ref, kd_ref, kdd_ref):
    scale = params_ref[0]
    weight = params_ref[1]
    inv_l2 = 1.0 / (scale * scale)
    w2 = weight * weight
    D = kd_ref.shape[1]

    xe = xe_ref[...]                       # (te, D, 1)
    Xe = Xe_ref[...]                       # (1, D, tn)
    diff = xe - Xe                         # (te, D, tn)   [i, d, j]

    diff_q = xq_ref[...] - Xq_ref[...]     # (D, te, 1, tn)  [c, i, :, j]
    # r^2 summed from coordinate diffs (leading-axis reduce; avoids the
    # |x|^2 + |X|^2 - 2 x.X cancellation of the previous version).
    r2 = jnp.sum(diff_q * diff_q, axis=0)                  # (te, 1, tn)
    kee = w2 * jnp.exp(-0.5 * inv_l2 * r2)                 # (te, 1, tn)
    kl2 = kee * inv_l2                                     # (te, 1, tn)

    kee_ref[...] = kee
    kd = kl2 * diff                                        # (te, D, tn)
    kd_ref[...] = kd

    # Hessian: kdd[c,i,d,j] = sdiff_c * kd_d + delta_cd * kl2
    sdiff = (-inv_l2) * diff_q                             # (D, te, 1, tn)
    c_idx = lax.broadcasted_iota(jnp.int32, (D, 1, D, 1), 0)
    d_idx = lax.broadcasted_iota(jnp.int32, (D, 1, D, 1), 2)
    diag = jnp.where(c_idx == d_idx, kl2[None, :, :, :], 0.0)   # (D, te, D, tn)
    kdd_ref[...] = sdiff * kd[None, :, :, :] + diag


def fp_kernel_blocks(x, X, scale, weight):
    """Tiled SE-kernel-with-derivative blocks between x (Nx,D) and X (NX,D).

    Returns padded blocks:
      kee : (Nx_pad, NX_pad)
      kd  : (Nx_pad, D, NX_pad)         dk/dX_d   (dk/dx_c = -kd)
      kdd : (D, Nx_pad, D, NX_pad)      d2k/dx_c dX_d   (K_XX sub-block layout)
    """
    Nx, D = x.shape
    NX = X.shape[0]
    Nx_pad, te, NX_pad, tn = _blocks_tiles(Nx, NX, D)

    xp = _pad2(x.astype(DTYPE), Nx_pad, D)
    Xp = _pad2(X.astype(DTYPE), NX_pad, D)
    xe = xp[:, :, None]                        # (Nx_pad, D, 1)
    Xe = Xp.T[None, :, :]                      # (1, D, NX_pad)
    xq = xp.T[:, :, None, None]                # (D, Nx_pad, 1, 1)
    Xq = Xp.T[:, None, None, :]                # (D, 1, 1, NX_pad)
    params = jnp.array([scale, weight], dtype=DTYPE)

    grid = (Nx_pad // te, NX_pad // tn)
    smem = pl.BlockSpec(memory_space=pltpu.MemorySpace.SMEM)
    kee, kd, kdd = pl.pallas_call(
        _fp_blocks_kernel,
        grid=grid,
        in_specs=[
            smem,                                                   # scale/weight
            pl.BlockSpec((te, D, 1), lambda i, j: (i, 0, 0)),
            pl.BlockSpec((1, D, tn), lambda i, j: (0, 0, j)),
            pl.BlockSpec((D, te, 1, 1), lambda i, j: (0, i, 0, 0)),
            pl.BlockSpec((D, 1, 1, tn), lambda i, j: (0, 0, 0, j)),
        ],
        out_specs=(pl.BlockSpec((te, 1, tn), lambda i, j: (i, 0, j)),
                   pl.BlockSpec((te, D, tn), lambda i, j: (i, 0, j)),
                   pl.BlockSpec((D, te, D, tn), lambda i, j: (0, i, 0, j))),
        out_shape=(jax.ShapeDtypeStruct((Nx_pad, 1, NX_pad), DTYPE),
                   jax.ShapeDtypeStruct((Nx_pad, D, NX_pad), DTYPE),
                   jax.ShapeDtypeStruct((D, Nx_pad, D, NX_pad), DTYPE)),
        compiler_params=pltpu.CompilerParams(
            dimension_semantics=("parallel", "parallel"),
            vmem_limit_bytes=_VMEM_LIMIT),
    )(params, xe, Xe, xq, Xq)
    return kee[:, 0, :], kd, kdd


# ----------------------------------------------------------------------------
# Pallas kernel 2: fused prediction  pred = K(eval, train) @ model_vector
# (energy + derivative rows), accumulated directly into the resident output
# blocks over train-column tiles.  K is never materialised; when
# emit_k_rows=True the energy rows of K (kee + kd) are also written out for
# the variance path (diagonal-only covariance).
# ----------------------------------------------------------------------------
def _gp_pred_kernel(params_ref, x_ref, X_ref, Xsq_ref, Xmv_ref, mve_ref, mvd_ref,
                    *rest, emit_k_rows):
    if emit_k_rows:
        xcm_ref, Xcm_ref, pe_ref, pd_ref, kee_out_ref, kd_out_ref = rest
    else:
        pe_ref, pd_ref = rest

    j = pl.program_id(1)

    scale = params_ref[0]
    weight = params_ref[1]
    inv_l2 = 1.0 / (scale * scale)
    w2 = weight * weight

    x = x_ref[...]                 # (te, D)
    X = X_ref[...]                 # (tn, D)
    Xsq = Xsq_ref[...]             # (1, tn)  |X_j|^2
    Xmv = Xmv_ref[...]             # (1, tn)  sum_d X[j,d] * mvd[d,j]
    mve = mve_ref[...]             # (1, tn)  energy model vector
    mvd = mvd_ref[...]             # (D, tn)  derivative model vector (coord-major)

    @pl.when(j == 0)
    def _init():
        pe_ref[...] = jnp.zeros_like(pe_ref)
        pd_ref[...] = jnp.zeros_like(pd_ref)

    # TODO(synk): r2 via |x|^2+|X|^2-2x.X keeps the matvec on the MXU but loses
    # precision for near-duplicate points (reference sums (x-X)^2 directly).
    xsq = jnp.sum(x * x, axis=1, keepdims=True)                        # (te, 1)
    cross = lax.dot_general(x, X, (((1,), (1,)), ((), ())),
                            preferred_element_type=jnp.float32)        # (te, tn)
    r2 = jnp.maximum(xsq + Xsq - 2.0 * cross, 0.0)
    kee = w2 * jnp.exp(-0.5 * inv_l2 * r2)                             # (te, tn)

    # w[i,j] = sum_d (x[i,d]-X[j,d]) mvd[d,j]  ;  g = kee*(mve + w/l^2)
    xmv = jnp.dot(x, mvd, preferred_element_type=jnp.float32)          # (te, tn)
    g = kee * (mve + inv_l2 * (xmv - Xmv))                             # (te, tn)
    G = jnp.sum(g, axis=1, keepdims=True)                              # (te, 1)

    # energy rows:  pred_E = sum_j g
    pe_ref[...] += G

    # derivative rows (per eval coordinate c):
    # pred_D[i,c] = 1/l^2 * ( (kee @ mvd^T)[i,c] - x[i,c]*G[i] + (g @ X)[i,c] )
    kmv = lax.dot_general(kee, mvd, (((1,), (1,)), ((), ())),
                          preferred_element_type=jnp.float32)          # (te, D)
    gX = jnp.dot(g, X, preferred_element_type=jnp.float32)             # (te, D)
    pd_ref[...] += inv_l2 * (kmv - x * G + gX)

    if emit_k_rows:
        kee_out_ref[...] = kee
        diff = xcm_ref[...] - Xcm_ref[...]                             # (D, te, tn)
        kd_out_ref[...] = (kee * inv_l2)[None, :, :] * diff


def gp_predict(eval_x, train_x, mv_e, mv_d_cm, scale, weight, *,
               emit_k_rows=False, row_tile=256, col_tile=1024):
    """Fused  pred = K(eval,train) @ model_vector  (and optionally K's energy rows)."""
    Nx, D = eval_x.shape
    NX = train_x.shape[0]
    Nx_pad, te = _plan_rows(Nx, row_tile)
    if emit_k_rows:
        # D-aware train-column tile so the double-buffered (kee, kd) output
        # tiles fit a modest VMEM budget (v5e 16 MiB default / v7x 64 MiB phys).
        budget = 12 * 1024 * 1024
        cap = max(_LANE, (budget // max(8 * te * (D + 1), 1)) // _LANE * _LANE)
        col_tile = min(col_tile, cap)
    NX_pad, tn = _plan_cols(NX, col_tile)

    xp = _pad2(eval_x.astype(DTYPE), Nx_pad, D)
    Xp = _pad2(train_x.astype(DTYPE), NX_pad, D)
    mvd = jnp.pad(mv_d_cm.astype(DTYPE), ((0, 0), (0, NX_pad - NX)))    # (D, NX_pad)
    mve = jnp.pad(mv_e.astype(DTYPE), (0, NX_pad - NX))[None, :]        # (1, NX_pad)
    Xsq = jnp.sum(Xp * Xp, axis=1)[None, :]
    Xmv = jnp.sum(Xp * mvd.T, axis=1)[None, :]
    params = jnp.array([scale, weight], dtype=DTYPE)

    grid = (Nx_pad // te, NX_pad // tn)
    smem = pl.BlockSpec(memory_space=pltpu.MemorySpace.SMEM)
    in_specs = [
        smem,
        pl.BlockSpec((te, D), lambda i, j: (i, 0)),
        pl.BlockSpec((tn, D), lambda i, j: (j, 0)),
        pl.BlockSpec((1, tn), lambda i, j: (0, j)),
        pl.BlockSpec((1, tn), lambda i, j: (0, j)),
        pl.BlockSpec((1, tn), lambda i, j: (0, j)),
        pl.BlockSpec((D, tn), lambda i, j: (0, j)),
    ]
    args = [params, xp, Xp, Xsq, Xmv, mve, mvd]
    out_shape = [jax.ShapeDtypeStruct((Nx_pad, 1), DTYPE),
                 jax.ShapeDtypeStruct((Nx_pad, D), DTYPE)]
    out_specs = [pl.BlockSpec((te, 1), lambda i, j: (i, 0)),
                 pl.BlockSpec((te, D), lambda i, j: (i, 0))]
    if emit_k_rows:
        xcm = xp.T[:, :, None]                                          # (D, Nx_pad, 1)
        Xcm = Xp.T[:, None, :]                                          # (D, 1, NX_pad)
        in_specs += [pl.BlockSpec((D, te, 1), lambda i, j: (0, i, 0)),
                     pl.BlockSpec((D, 1, tn), lambda i, j: (0, 0, j))]
        args += [xcm, Xcm]
        out_shape += [jax.ShapeDtypeStruct((Nx_pad, NX_pad), DTYPE),
                      jax.ShapeDtypeStruct((D, Nx_pad, NX_pad), DTYPE)]
        out_specs += [pl.BlockSpec((te, tn), lambda i, j: (i, j)),
                      pl.BlockSpec((D, te, tn), lambda i, j: (0, i, j))]

    return pl.pallas_call(
        functools.partial(_gp_pred_kernel, emit_k_rows=emit_k_rows),
        grid=grid,
        in_specs=in_specs,
        out_specs=tuple(out_specs),
        out_shape=tuple(out_shape),
        compiler_params=pltpu.CompilerParams(
            dimension_semantics=("parallel", "arbitrary"),
            vmem_limit_bytes=_VMEM_LIMIT),
    )(*args)


# ----------------------------------------------------------------------------
# train_model glue (mirrors GaussianProcess.train_model, non-sparse, use_forces)
# ----------------------------------------------------------------------------
def train_model(train_x, Y, dY, scale, weight, noise, noisefactor):
    N, D = train_x.shape
    kee, kd, kdd = fp_kernel_blocks(train_x, train_x, scale, weight)
    # blocks are already in K_XX layout -> contiguous reshapes only
    Kee = kee[:N, :N]
    Ked = kd[:N, :, :N].reshape(N, D * N)        # energy rows / deriv cols
    Kde = Ked.T                                  # symmetric train-train case
    Kdd = kdd[:, :N, :, :N].reshape(D * N, D * N)
    K_XX = jnp.concatenate(
        [jnp.concatenate([Kee, Ked], axis=1),
         jnp.concatenate([Kde, Kdd], axis=1)], axis=0)
    reg = jnp.concatenate([
        jnp.full((N,), noise * noisefactor, dtype=DTYPE),
        jnp.full((N * D,), noise, dtype=DTYPE)]) ** 2
    idx = jnp.arange(N * (1 + D))
    K_XX = K_XX.at[idx, idx].add(reg)            # diagonal-only update (no jnp.diag pass)
    # TODO(synk): torch.linalg.cholesky / torch.cholesky_solve (and the f64 /
    # LinAlgError jitter-retry fallback of the reference) have no Pallas
    # primitive; plain JAX f32 here.
    K_XX_L = jnp.linalg.cholesky(K_XX)
    ydy = jnp.concatenate([Y.reshape(-1).astype(DTYPE),
                           dY.reshape(N, D).T.reshape(-1).astype(DTYPE)])
    model_vector = jax.scipy.linalg.cho_solve((K_XX_L, True), ydy[:, None])[:, 0]
    return K_XX_L, model_vector


# ----------------------------------------------------------------------------
# GaussianProcess.forward (use_forces=True, sparse=False)
# ----------------------------------------------------------------------------
def gp_forward(eval_x, train_x, K_XX_L, model_vector, scale, weight, Natom,
               get_variance=False):
    Ntest, D = eval_x.shape
    Ntrain = train_x.shape[0]
    mv_e = model_vector[:Ntrain]
    mv_d = model_vector[Ntrain:].reshape(D, Ntrain)            # coordinate-major

    outs = gp_predict(eval_x, train_x, mv_e, mv_d, scale, weight,
                      emit_k_rows=get_variance,
                      row_tile=(64 if get_variance else 256))
    pred_e, pred_d = outs[0], outs[1]
    E_hat = pred_e[:Ntest, 0]
    F_hat = pred_d[:Ntest].reshape(Ntest, Natom, 3)
    if not get_variance:
        return E_hat, F_hat, None

    kee, kd = outs[2], outs[3]
    Ke = jnp.concatenate(
        [kee[:Ntest, :Ntrain],
         jnp.transpose(kd[:, :Ntest, :Ntrain], (1, 0, 2)).reshape(Ntest, D * Ntrain)],
        axis=1)
    # Only the first Ntest diagonal entries of K_ss - k (K+reg)^-1 k^T are
    # needed; diag(K_ss)[:Ntest] is analytically weight**2.
    # TODO(synk): cholesky_solve has no Pallas equivalent; plain JAX.
    V = jax.scipy.linalg.cho_solve((K_XX_L, True), Ke.T)
    diag_cov = jnp.sum(Ke * V.T, axis=1)
    uncertainty = jnp.sqrt(jnp.maximum(weight * weight - diag_cov, 0.0))
    return E_hat, F_hat, uncertainty


# ----------------------------------------------------------------------------
# plain-JAX reference (image-major layout, literal transcription) for checking
# ----------------------------------------------------------------------------
def _reference_forward(eval_x, train_x, Y, dY, scale, weight, noise, noisefactor):
    N, D = train_x.shape
    M = eval_x.shape[0]
    l2 = scale * scale
    w2 = weight * weight
    eyeD = jnp.eye(D, dtype=DTYPE)

    def full_matrix(A, B):
        a, b = A.shape[0], B.shape[0]
        diff = A[:, None, :] - B[None, :, :]
        r2 = jnp.sum(diff * diff, axis=-1)
        k = w2 * jnp.exp(-r2 / (2.0 * l2))
        kd = k[:, :, None] * diff / l2
        kdd = (k[:, :, None, None]
               * (eyeD - diff[:, :, :, None] * diff[:, :, None, :] / l2) / l2)
        Kee = k
        Ked = kd.reshape(a, b * D)
        Kde = -jnp.transpose(kd, (0, 2, 1)).reshape(a * D, b)
        Kdd = jnp.transpose(kdd, (0, 2, 1, 3)).reshape(a * D, b * D)
        return jnp.concatenate(
            [jnp.concatenate([Kee, Ked], axis=1),
             jnp.concatenate([Kde, Kdd], axis=1)], axis=0)

    K_XX = full_matrix(train_x, train_x)
    reg = jnp.concatenate([jnp.full((N,), noise * noisefactor, DTYPE),
                           jnp.full((N * D,), noise, DTYPE)]) ** 2
    L = jnp.linalg.cholesky(K_XX + jnp.diag(reg))
    ydy = jnp.concatenate([Y.reshape(-1), dY.reshape(-1)]).astype(DTYPE)
    mv = jax.scipy.linalg.cho_solve((L, True), ydy[:, None])[:, 0]

    K = full_matrix(eval_x, train_x)
    pred = K @ mv
    E = pred[:M]
    F = pred[M:].reshape(M, D)
    cov = K @ jax.scipy.linalg.cho_solve((L, True), K.T)
    Kss = full_matrix(eval_x, eval_x)
    unc = jnp.sqrt(jnp.maximum(jnp.diagonal(Kss - cov)[:M], 0.0))
    return E, F, unc


# ----------------------------------------------------------------------------
if __name__ == "__main__":
    key = jax.random.PRNGKey(0)
    Ntrain, Ntest, Natom = 12, 10, 3
    D = 3 * Natom

    # module-default hyperparameters
    scale, weight, noise, noisefactor = 0.4, 1.0, 1e-6, 0.5

    k1, k2, k3, k4 = jax.random.split(key, 4)
    train_x = 0.25 * jax.random.normal(k1, (Ntrain, D), dtype=DTYPE)
    Y = jax.random.normal(k2, (Ntrain,), dtype=DTYPE)
    dY = jax.random.normal(k3, (Ntrain, Natom, 3), dtype=DTYPE)
    eval_x = 0.25 * jax.random.normal(k4, (Ntest, D), dtype=DTYPE)

    K_XX_L, model_vector = train_model(train_x, Y, dY, scale, weight,
                                       noise, noisefactor)

    # variance path
    E_hat, F_hat, unc = gp_forward(eval_x, train_x, K_XX_L, model_vector,
                                   scale, weight, Natom, get_variance=True)
    # fast path (K never materialised)
    E2, F2, _ = gp_forward(eval_x, train_x, K_XX_L, model_vector,
                           scale, weight, Natom, get_variance=False)
    jax.block_until_ready((E_hat, F_hat, unc, E2, F2))

    assert E_hat.shape == (Ntest,)
    assert F_hat.shape == (Ntest, Natom, 3)
    assert unc.shape == (Ntest,)
    assert bool(jnp.all(jnp.isfinite(E_hat)))
    assert bool(jnp.all(jnp.isfinite(F_hat)))
    assert bool(jnp.all(jnp.isfinite(unc)))

    # self-check against a plain-JAX transcription of the reference module
    E_ref, F_ref, unc_ref = _reference_forward(eval_x, train_x, Y, dY,
                                               scale, weight, noise, noisefactor)

    def _close(a, b, tol=5e-3):
        return bool(jnp.max(jnp.abs(a - b)) <= tol * (1.0 + float(jnp.max(jnp.abs(b)))))

    assert _close(E_hat, E_ref)
    assert _close(F_hat.reshape(Ntest, D), F_ref)
    assert _close(unc, unc_ref)
    assert _close(E2, E_ref)
    assert _close(F2.reshape(Ntest, D), F_ref)

    print("KERNEL_OK")
</pallas_src>

<mosaic_0001>
module attributes {stable_mosaic.version = 11 : i64} {
  func.func @_fp_blocks_kernel(%arg0: i32, %arg1: i32, %arg2: memref<2xf32, #tpu.memory_space<smem>>, %arg3: memref<8x9x1xf32, #tpu.memory_space<vmem>>, %arg4: memref<1x9x16xf32, #tpu.memory_space<vmem>>, %arg5: memref<9x8x1x1xf32, #tpu.memory_space<vmem>>, %arg6: memref<9x1x1x16xf32, #tpu.memory_space<vmem>>, %arg7: memref<8x1x16xf32, #tpu.memory_space<vmem>>, %arg8: memref<8x9x16xf32, #tpu.memory_space<vmem>>, %arg9: memref<9x8x9x16xf32, #tpu.memory_space<vmem>>) attributes {dimension_semantics = [#tpu.dimension_semantics<parallel>, #tpu.dimension_semantics<parallel>], iteration_bounds = array<i64: 2, 1>, scalar_prefetch = 0 : i64, scratch_operands = 0 : i64, tpu.core_type = #tpu.core_type<tc>, window_params = [{transform_indices = @transform_0, window_bounds = array<i64: 2>}, {transform_indices = @transform_1, window_bounds = array<i64: 8, 9, 1>}, {transform_indices = @transform_2, window_bounds = array<i64: 1, 9, 16>}, {transform_indices = @transform_3, window_bounds = array<i64: 9, 8, 1, 1>}, {transform_indices = @transform_4, window_bounds = array<i64: 9, 1, 1, 16>}, {transform_indices = @transform_5, window_bounds = array<i64: 8, 1, 16>}, {transform_indices = @transform_6, window_bounds = array<i64: 8, 9, 16>}, {transform_indices = @transform_7, window_bounds = array<i64: 9, 8, 9, 16>}]} {
    %c0 = arith.constant 0 : index
    %0 = memref.load %arg2[%c0] : memref<2xf32, #tpu.memory_space<smem>>
    %c1 = arith.constant 1 : index
    %1 = memref.load %arg2[%c1] : memref<2xf32, #tpu.memory_space<smem>>
    %2 = arith.mulf %0, %0 : f32
    %cst = arith.constant 1.000000e+00 : f32
    %3 = arith.divf %cst, %2 : f32
    %4 = arith.mulf %1, %1 : f32
    %c0_0 = arith.constant 0 : index
    %c0_1 = arith.constant 0 : index
    %c0_2 = arith.constant 0 : index
    %5 = vector.load %arg3[%c0_0, %c0_1, %c0_2] : memref<8x9x1xf32, #tpu.memory_space<vmem>>, vector<8x9x1xf32>
    %c0_3 = arith.constant 0 : index
    %c0_4 = arith.constant 0 : index
    %c0_5 = arith.constant 0 : index
    %6 = vector.load %arg4[%c0_3, %c0_4, %c0_5] : memref<1x9x16xf32, #tpu.memory_space<vmem>>, vector<1x9x16xf32>
    %7 = vector.broadcast %5 : vector<8x9x1xf32> to vector<8x9x16xf32>
    %8 = vector.broadcast %6 : vector<1x9x16xf32> to vector<8x9x16xf32>
    %9 = arith.subf %7, %8 : vector<8x9x16xf32>
    %c0_6 = arith.constant 0 : index
    %c0_7 = arith.constant 0 : index
    %c0_8 = arith.constant 0 : index
    %c0_9 = arith.constant 0 : index
    %10 = vector.load %arg5[%c0_6, %c0_7, %c0_8, %c0_9] : memref<9x8x1x1xf32, #tpu.memory_space<vmem>>, vector<9x8x1x1xf32>
    %c0_10 = arith.constant 0 : index
    %c0_11 = arith.constant 0 : index
    %c0_12 = arith.constant 0 : index
    %c0_13 = arith.constant 0 : index
    %11 = vector.load %arg6[%c0_10, %c0_11, %c0_12, %c0_13] : memref<9x1x1x16xf32, #tpu.memory_space<vmem>>, vector<9x1x1x16xf32>
    %12 = vector.broadcast %10 : vector<9x8x1x1xf32> to vector<9x8x1x16xf32>
    %13 = vector.broadcast %11 : vector<9x1x1x16xf32> to vector<9x8x1x16xf32>
    %14 = arith.subf %12, %13 : vector<9x8x1x16xf32>
    %15 = arith.mulf %14, %14 : vector<9x8x1x16xf32>
    %cst_14 = arith.constant dense<0.000000e+00> : vector<8x1x16xf32>
    %16 = vector.multi_reduction <add>, %15, %cst_14 [0] : vector<9x8x1x16xf32> to vector<8x1x16xf32>
    %cst_15 = arith.constant -5.000000e-01 : f32
    %17 = arith.mulf %cst_15, %3 : f32
    %18 = vector.broadcast %17 : f32 to vector<8x1x16xf32>
    %19 = arith.mulf %18, %16 : vector<8x1x16xf32>
    %20 = math.exp %19 : vector<8x1x16xf32>
    %21 = vector.broadcast %4 : f32 to vector<8x1x16xf32>
    %22 = arith.mulf %21, %20 : vector<8x1x16xf32>
    %23 = vector.broadcast %3 : f32 to vector<8x1x16xf32>
    %24 = arith.mulf %22, %23 : vector<8x1x16xf32>
    %c0_16 = arith.constant 0 : index
    %c0_17 = arith.constant 0 : index
    %c0_18 = arith.constant 0 : index
    %25 = vector.load %arg7[%c0_16, %c0_17, %c0_18] : memref<8x1x16xf32, #tpu.memory_space<vmem>>, vector<8x1x16xf32>
    tpu.vector_store %arg7[%c0_16, %c0_17, %c0_18], %22 {strides = array<i32>} : memref<8x1x16xf32, #tpu.memory_space<vmem>>, vector<8x1x16xf32>,
    %26 = vector.broadcast %24 : vector<8x1x16xf32> to vector<8x9x16xf32>
    %27 = arith.mulf %26, %9 : vector<8x9x16xf32>
    %c0_19 = arith.constant 0 : index
    %c0_20 = arith.constant 0 : index
    %c0_21 = arith.constant 0 : index
    %28 = vector.load %arg8[%c0_19, %c0_20, %c0_21] : memref<8x9x16xf32, #tpu.memory_space<vmem>>, vector<8x9x16xf32>
    tpu.vector_store %arg8[%c0_19, %c0_20, %c0_21], %27 {strides = array<i32>} : memref<8x9x16xf32, #tpu.memory_space<vmem>>, vector<8x9x16xf32>,
    %cst_22 = arith.constant 0.000000e+00 : f32
    %29 = arith.subf %cst_22, %3 : f32
    %30 = vector.broadcast %29 : f32 to vector<9x8x1x16xf32>
    %31 = arith.mulf %30, %14 : vector<9x8x1x16xf32>
    %32 = tpu.iota {dimensions = array<i32: 0>} : vector<9x1x9x1xi32>
    %33 = tpu.iota {dimensions = array<i32: 2>} : vector<9x1x9x1xi32>
    %34 = arith.cmpi eq, %32, %33 : vector<9x1x9x1xi32>
    %35 = vector.shape_cast %24 : vector<8x1x16xf32> to vector<1x8x1x16xf32>
    %cst_23 = arith.constant 0.000000e+00 : f32
    %36 = vector.shape_cast %34 : vector<9x1x9x1xi1> to vector<9x1x9x1xi1>
    %37 = vector.broadcast %36 : vector<9x1x9x1xi1> to vector<9x8x9x16xi1>
    %38 = vector.shape_cast %35 : vector<1x8x1x16xf32> to vector<1x8x1x16xf32>
    %39 = vector.broadcast %38 : vector<1x8x1x16xf32> to vector<9x8x9x16xf32>
    %40 = vector.broadcast %cst_23 : f32 to vector<9x8x9x16xf32>
    %41 = arith.select %37, %39, %40 : vector<9x8x9x16xi1>, vector<9x8x9x16xf32>
    %42 = vector.shape_cast %27 : vector<8x9x16xf32> to vector<1x8x9x16xf32>
    %43 = vector.broadcast %31 : vector<9x8x1x16xf32> to vector<9x8x9x16xf32>
    %44 = vector.broadcast %42 : vector<1x8x9x16xf32> to vector<9x8x9x16xf32>
    %45 = arith.mulf %43, %44 : vector<9x8x9x16xf32>
    %46 = arith.addf %45, %41 : vector<9x8x9x16xf32>
    %c0_24 = arith.constant 0 : index
    %c0_25 = arith.constant 0 : index
    %c0_26 = arith.constant 0 : index
    %c0_27 = arith.constant 0 : index
    %47 = vector.load %arg9[%c0_24, %c0_25, %c0_26, %c0_27] : memref<9x8x9x16xf32, #tpu.memory_space<vmem>>, vector<9x8x9x16xf32>
    tpu.vector_store %arg9[%c0_24, %c0_25, %c0_26, %c0_27], %46 {strides = array<i32>} : memref<9x8x9x16xf32, #tpu.memory_space<vmem>>, vector<9x8x9x16xf32>,
    return
  }
  func.func @transform_0(%arg0: i32, %arg1: i32) -> i32 {
    %c0_i32 = arith.constant 0 : i32
    %c0_i32_0 = arith.constant 0 : i32
    return %c0_i32 : i32
  }
  func.func @transform_1(%arg0: i32, %arg1: i32) -> (i32, i32, i32) {
    %c0_i32 = arith.constant 0 : i32
    %c0_i32_0 = arith.constant 0 : i32
    %c0_i32_1 = arith.constant 0 : i32
    return %arg0, %c0_i32, %c0_i32_0 : i32, i32, i32
  }
  func.func @transform_2(%arg0: i32, %arg1: i32) -> (i32, i32, i32) {
    %c0_i32 = arith.constant 0 : i32
    %c0_i32_0 = arith.constant 0 : i32
    %c0_i32_1 = arith.constant 0 : i32
    return %c0_i32, %c0_i32_0, %arg1 : i32, i32, i32
  }
  func.func @transform_3(%arg0: i32, %arg1: i32) -> (i32, i32, i32, i32) {
    %c0_i32 = arith.constant 0 : i32
    %c0_i32_0 = arith.constant 0 : i32
    %c0_i32_1 = arith.constant 0 : i32
    %c0_i32_2 = arith.constant 0 : i32
    return %c0_i32, %arg0, %c0_i32_0, %c0_i32_1 : i32, i32, i32, i32
  }
  func.func @transform_4(%arg0: i32, %arg1: i32) -> (i32, i32, i32, i32) {
    %c0_i32 = arith.constant 0 : i32
    %c0_i32_0 = arith.constant 0 : i32
    %c0_i32_1 = arith.constant 0 : i32
    %c0_i32_2 = arith.constant 0 : i32
    return %c0_i32, %c0_i32_0, %c0_i32_1, %arg1 : i32, i32, i32, i32
  }
  func.func @transform_5(%arg0: i32, %arg1: i32) -> (i32, i32, i32) {
    %c0_i32 = arith.constant 0 : i32
    %c0_i32_0 = arith.constant 0 : i32
    return %arg0, %c0_i32, %arg1 : i32, i32, i32
  }
  func.func @transform_6(%arg0: i32, %arg1: i32) -> (i32, i32, i32) {
    %c0_i32 = arith.constant 0 : i32
    %c0_i32_0 = arith.constant 0 : i32
    return %arg0, %c0_i32, %arg1 : i32, i32, i32
  }
  func.func @transform_7(%arg0: i32, %arg1: i32) -> (i32, i32, i32, i32) {
    %c0_i32 = arith.constant 0 : i32
    %c0_i32_0 = arith.constant 0 : i32
    %c0_i32_1 = arith.constant 0 : i32
    return %c0_i32, %arg0, %c0_i32_0, %arg1 : i32, i32, i32, i32
  }
}

</mosaic_0001>

<bundles_post_ra>
// kernel: tpu_custom_call.1
= control target key start
LH: loop header
LB: loop body
LE: loop exit
PB: predicated region body
PF: predicated region fallthrough
CT: control target
= control target key end

     0   :  { %13 = vsyncpa [#allocation5], 0  ;;  %s6368_s0 = inlined_call_operand.hbm [shape: f32[2], index: 0, kind: input, shape index: {}]   ;;  %s6369_s1 = inlined_call_operand.vmem [shape: f32[16,9,1], index: 1, kind: input, shape index: {}]   ;;  %s6370_s2 = inlined_call_operand.vmem [shape: f32[1,9,16], index: 2, kind: input, shape index: {}]   ;;  %s6371_s3 = inlined_call_operand.vmem [shape: f32[9,16,1,1], index: 3, kind: input, shape index: {}]   ;;  %s6372_s4 = inlined_call_operand.hbm [shape: f32[9,1,1,16], index: 4, kind: input, shape index: {}]   ;;  %s6373_s5 = inlined_call_operand.hbm [shape: f32[16,1,16], index: 5, kind: output, shape index: {0}]   ;;  %s6374_s6 = inlined_call_operand.vmem [shape: f32[16,9,16], index: 6, kind: output, shape index: {1}]   ;;  %s6375_s7 = inlined_call_operand.vmem [shape: f32[9,16,9,16], index: 7, kind: output, shape index: {2}]  }
   0x1   :  { %14 = vsyncpa [#allocation3], 0 }
   0x2   :  { %15 = vsyncpa [#allocation4], 0 }
   0x3   :  { %17 = vsyncpa [#allocation4 + $0x1], 0  ;;  %s4012_s24 = smov 0   ;;  %s4014_s25 = smov 0  }
   0x4   :  { %s4016_s26 = smov 0   ;;  %s4018_s27 = smov 0  }
   0x5   :  { %s4020_s28 = smov 0   ;;  %s4022_s29 = smov 0  }
   0x6 LB: > { %s3697_s30 = sadd.s32 4294967295, %s3962_s29   ;;  %s3698_s8 = sadd.s32 4294967294, %s3962_s29   ;;  %s3962_s29 = sphi %s4022_s29, %s23_s29   ;;  %s3958_s28 = sphi %s4020_s28, %s6608_s28   ;;  %s3954_s27 = sphi %s4018_s27, %s6607_s27   ;;  %s3950_s26 = sphi %s4016_s26, %s6606_s26   ;;  %s3946_s25 = sphi %s4014_s25, %s6605_s25   ;;  %s3942_s24 = sphi %s4012_s24, %s6604_s24  }
   0x7   : > { %s35_s9 = sadd.s32 1, %s3958_s28  ;;  %s115_s10 = sadd.s32 1, %s3950_s26 }
   0x8   : > { %p37_p0 = scmp.ge.s32.totalorder %s35_s9, 2  ;;  %p122_p1 = scmp.ne.s32.totalorder %s3950_s26, %s3946_s25 }
   0x9   : > { %p123_p2 = scmp.eq.s32.totalorder %s3962_s29, 0  ;;  %p180_p3 = scmp.eq.s32.totalorder %s3697_s30, 1 }
   0xa   : > { %s6610_s9 = smov (%p37_p0, %s35_s9), 0  ;;  %p185_p6 = scmp.ne.s32.totalorder %s3946_s25, %s3942_s24 }
   0xb   : > { %6445 = sst [smem:[#allocation13_spill]] %s6610_s9  ;;  %p4051_p4 = por %p123_p2, %p122_p1 }
   0xc   : > { %p4055_p5 = por %p180_p3, %p122_p1  ;;  %s112_s13 = ssub.s32 %s3958_s28, %s6610_s9 }
   0xd   : > { %p113_p7 = scmp.eq.s32.totalorder %s112_s13, 0  ;;  %p186_p8 = scmp.eq.s32.totalorder %s3698_s8, 1 }
   0xe   : > { %s6447_s12 = scalar_select %p4055_p5, 1, 0 }
   0xf   : > { %p3699_p9 = scmp.ge.s32.totalorder %s3962_s29, 1  ;;  %p249_p10 = scmp.lt.s32.totalorder %s3962_s29, 3 }
  0x10   : > { %s4066_s14 = scalar_select %p113_p7, %s3950_s26, %s115_s10  }
  0x11   : > { %p4068_p11 = por %p186_p8, %p185_p6  ;;  %p4072_p12 = pnand %p3699_p9, %p249_p10 }
  0x12   : > { %6448 = sst [smem:[#allocation14_spill]] %s4066_s14  ;;  %p4076_p13 = scmp.eq.s32.totalorder %s3697_s30, 0 }
  0x13   : > { %s6449_s15 = scalar_select %p4068_p11, 1, 0 }
  0x14   : > { %s6452_s17 = scalar_select %p4076_p13, 1, 0 }
  0x15   : > { %6450 = sst [smem:[#allocation15_spill]] %s6449_s15  ;;  %p3744_p0 = pneg %p4072_p12 }
  0x16   : > { %s3964_s19 = smov [#allocation7]   ;;  %s3835_s23 = scalar_lea.hbm %s6368_s0, 16 }
  0x17   : > { %p4084_p1 = pnand %p4076_p13, %p3744_p0  ;;  %s279_s20 = sshll.u32 %s3964_s19, 4  ;;  %s4088_s20 = int_to_ptr.vmem [resolvable:$true] %s279_s20 }
  0x18   : > { %p3836_p2 = scmp.ne.s32.totalorder %s6368_s0, %s3835_s23  ;;  %p3842_p8 = scmp.lt.u32.totalorder %s3835_s23, %s6368_s0 }
  0x19   : > { %p3837_p3 = pneg %p4084_p1 }
  0x1b   : > { %p3838_p6 = pnand %p3837_p3, %p3836_p2 }
  0x1d   : > { %p3839_p7 = pneg %p3838_p6 }
  0x1f   : > { %p3844_p9 = pnand %p3842_p8, %p3839_p7 }
  0x21   : > { %3847 = shalt.err (!%p3844_p9)
}
  0x22   : > { %s3965_s19 = smov [#allocation2]   ;;  %s3848_s9 = scalar_lea.hbm %s6372_s4, 144 }
  0x23   : > { %3747 = dma.hbm_to_smem (!%p4084_p1), %s6368_s0, 16, %s3965_s19, [#allocation5]  }
  0x24   : > { %p3849_p10 = scmp.ne.s32.totalorder %s6372_s4, %s3848_s9  ;;  %p3855_p6 = scmp.lt.u32.totalorder %s3848_s9, %s6372_s4 }
  0x26   : > { %p3851_p0 = pnand %p3849_p10, %p3837_p3 }
  0x28   : > { %p3852_p2 = pneg %p3851_p0 }
  0x2a   : > { %p3857_p7 = pnand %p3855_p6, %p3852_p2 }
  0x2c   : > { %3860 = shalt.err (!%p3857_p7)
}
  0x2d   : > { %s3861_s13 = scalar_lea.vmem %s4088_s20, 144  ;;  %s3868_s14 = scalar_lea.vmem %s4088_s20, 160 }
  0x2e   : > { %p3862_p8 = scmp.ne.s32.totalorder %s4088_s20, %s3861_s13  ;;  %p3869_p10 = scmp.lt.s32.totalorder %s4088_s20, %s4088_s20 }
  0x2f   : > { %p3870_p0 = scmp.lt.s32.totalorder %s3868_s14, %s3861_s13 }
  0x30   : > { %p3864_p9 = pnand %p3862_p8, %p3837_p3 }
  0x31   : > { %p3871_p5 = por %p3870_p0, %p3869_p10 }
  0x32   : > { %p3865_p11 = pneg %p3864_p9 }
  0x34   : > { %p3872_p13 = pnand %p3871_p5, %p3865_p11 }
  0x36   : > { %3875 = shalt.err (!%p3872_p13)
}
  0x37   : > { %s3966_s9 = smov 16   ;;  %s3967_s15 = smov 1  }
  0x38   : > { %3750 = dma.hbm_to_vmem [thread:$0]  (!%p4084_p1), %s6372_s4, 144, %s4088_s20, [#allocation3], %s3966_s9, %s3966_s9, %s3967_s15  }
  0x39   : > { %p3703_p3 = scmp.ge.s32.totalorder %s3962_s29, 2 }
  0x3b   : > { %289 = sbr.rel (%p3703_p3) target bundleno = 75 (0x4b), region = 28 }
  0x42   : > { %302 = sbr.rel (!%p4051_p4) target bundleno = 75 (0x4b), region = 36  ;;  %s304_s22 = sand.u32 (%p4051_p4), 1, %s3950_s26  }
  0x43   : > { %s3704_s30 = sshll.u32 (%p4051_p4), %s3958_s28, 3  ;;  %s3729_s8 = smul.u32 (%p4051_p4), 72, %s304_s22 }
  0x44   : > { %s308_s18 = scalar_lea.vmem (%p4051_p4), %s6371_s3, %s3704_s30 }
  0x45   : > { %v352_v0 = vld [vmem:[%s308_s18] sm:$0xff] (%p4051_p4)  ;;  %v354_v1 = vld [vmem:[%s308_s18 + $0x10] sm:$0xff] (%p4051_p4)  ;;  %s306_s20 = scalar_lea.vmem (%p4051_p4), [#allocation6], %s3729_s8 }
  0x46   : > { %v356_v2 = vld [vmem:[%s308_s18 + $0x20] sm:$0xff] (%p4051_p4)  ;;  %v358_v3 = vld [vmem:[%s308_s18 + $0x30] sm:$0xff] (%p4051_p4)  ;;  %353 = vst [vmem:[%s306_s20] sm:$0xff] (%p4051_p4), %v352_v0  ;;  %355 = vst [vmem:[%s306_s20 + $0x8] sm:$0xff] (%p4051_p4), %v354_v1 }
  0x47   : > { %v360_v4 = vld [vmem:[%s308_s18 + $0x40] sm:$0xff] (%p4051_p4)  ;;  %v362_v5 = vld [vmem:[%s308_s18 + $0x50] sm:$0xff] (%p4051_p4)  ;;  %357 = vst [vmem:[%s306_s20 + $0x10] sm:$0xff] (%p4051_p4), %v356_v2  ;;  %359 = vst [vmem:[%s306_s20 + $0x18] sm:$0xff] (%p4051_p4), %v358_v3 }
  0x48   : > { %361 = vst [vmem:[%s306_s20 + $0x20] sm:$0xff] (%p4051_p4), %v360_v4  ;;  %363 = vst [vmem:[%s306_s20 + $0x28] sm:$0xff] (%p4051_p4), %v362_v5  ;;  %v364_v6 = vld [vmem:[%s308_s18 + $0x60] sm:$0xff] (%p4051_p4)  ;;  %v366_v7 = vld [vmem:[%s308_s18 + $0x70] sm:$0xff] (%p4051_p4) }
  0x49   : > { %v368_v8 = vld [vmem:[%s308_s18 + $0x80] sm:$0xff]  ;;  %365 = vst [vmem:[%s306_s20 + $0x30] sm:$0xff] %v364_v6  ;;  %367 = vst [vmem:[%s306_s20 + $0x38] sm:$0xff] %v366_v7 }
  0x4a   : > { %369 = vst [vmem:[%s306_s20 + $0x40] sm:$0xff] %v368_v8 }
  0x4b PF: > { %378 = sbr.rel (%p4072_p12) target bundleno = 609 (0x261), region = 74 }
  0x52   : > { %p6454_p4 = scmp.ne.s32.totalorder %s6452_s17, 0 }
  0x54   : > { %3929 = dma.done.wait (%p6454_p4), [#allocation5], 16  }
  0x55   : > { %3931 = vsyncadd (%p6454_p4), [#allocation5], 4294967280  ;;  %s4152_s11 = sand.u32 1, %s3946_s25  }
  0x56   : > { %s3730_s13 = smul.u32 72, %s4152_s11 }
  0x58   : > { %s4155_s14 = scalar_lea.vmem [#allocation6], %s3730_s13 }
  0x59   : > { %3933 = dma.done.wait (%p6454_p4), [#allocation3], 144  }
  0x5a   : > { %3935 = vsyncadd (%p6454_p4), [#allocation3], 4294967152 }
  0x5b   : > { %395 = sfence }
  0x5c   : > { %s3709_s16 = sshll.u32 %s3954_s27, 3  ;;  %v3968_v9 = vmov 0   ;;  %s468_s17 = sld [smem:[#allocation2]]  ;;  %v590_v28 = vld [vmem:[%s4155_s14 + $0x1] sm:$0x1]  ;;  %vm1462_vm0 = vcmask 122880  }
  0x5d   : > { %3816 = vset.pattern.permute.xlu1 %v3968_v9  ;;  %3815 = vset.pattern.permute.xlu0 %v3968_v9  ;;  %p445_p5 = scmp.lt.s32.totalorder %s3709_s16, 15  ;;  %v589_v29 = vld [vmem:[%s4155_s14] sm:$0x1]  ;;  %v592_v30 = vld [vmem:[%s4155_s14 + $0x3] sm:$0x1]  ;;  %s3708_s19 = sshll.u32 %s4152_s11, 3 }
  0x5e   : > { %v591_v31 = vld [vmem:[%s4155_s14 + $0x2] sm:$0x1]  ;;  %v594_v32 = vld [vmem:[%s4155_s14 + $0x5] sm:$0x1]  ;;  %v593_v33 = vld [vmem:[%s4155_s14 + $0x4] sm:$0x1] }
  0x5f   : > { %s6612_s16 = smov (!%p445_p5, %s3709_s16), 15  ;;  %v596_v34 = vld [vmem:[%s4155_s14 + $0x7] sm:$0x1]  ;;  %v595_v35 = vld [vmem:[%s4155_s14 + $0x6] sm:$0x1]  ;;  %vm1699_vm7 = vcmask 130048  }
  0x60   : > { %s3724_s9 = sshll.u32 %s6612_s16, 4  ;;  %v598_v36 = vld [vmem:[%s4155_s14 + $0x9] sm:$0x1]  ;;  %v597_v37 = vld [vmem:[%s4155_s14 + $0x8] sm:$0x1]  ;;  %p6533_p12 = scmp.ne.s32.totalorder %s6447_s12, 0 }
  0x61   : > { %s4170_s21 = scalar_lea.vmem %s6369_s1, %s3724_s9  ;;  %v600_v38 = vld [vmem:[%s4155_s14 + $0xb] sm:$0x1]  ;;  %v599_v39 = vld [vmem:[%s4155_s14 + $0xa] sm:$0x1]  ;;  %v602_v40 = vld [vmem:[%s4155_s14 + $0xd] sm:$0x1]  ;;  %s5196_s8 = scalar_lea.vmem %s6374_s6, %s3724_s9 }
  0x62   : > { %v477_v10 = vld [vmem:[%s4170_s21 + $0x10] sm:$0xff]  ;;  %v475_v11 = vld [vmem:[%s4170_s21] sm:$0xff]  ;;  %v478_v12 = vld [vmem:[%s4170_s21 + $0x18] sm:$0x1]  ;;  %s470_s22 = smul.f32 %s468_s17, %s468_s17  ;;  %s3726_s9 = sshll.u32 %s3954_s27, 7 }
  0x63   : > { %505 = vperm.xlu1 %3816, %v477_v10   ;;  %495 = vperm.xlu0 %3815, %v475_v11   ;;  %v476_v13 = vld [vmem:[%s4170_s21 + $0x8] sm:$0x1]  ;;  %v479_v15 = vld [vmem:[%s4170_s21 + $0x20] sm:$0xff]  ;;  %v482_v17 = vld [vmem:[%s4170_s21 + $0x38] sm:$0x1]  ;;  %s3731_s17 = smul.u32 1152, %s4152_s11 }
  0x64   : > { %v480_v14 = vld [vmem:[%s4170_s21 + $0x28] sm:$0x1]  ;;  %v471_v16 = vstv %s470_s22  ;;  %v481_v18 = vld [vmem:[%s4170_s21 + $0x30] sm:$0xff]  ;;  %v483_v20 = vld [vmem:[%s4170_s21 + $0x40] sm:$0xff] }
  0x65   : > { %3817 = vrcp.f32 %v471_v16  ;;  %v484_v19 = vld [vmem:[%s4170_s21 + $0x48] sm:$0x1]  ;;  %v486_v21 = vld [vmem:[%s4170_s21 + $0x58] sm:$0x1]  ;;  %v485_v22 = vld [vmem:[%s4170_s21 + $0x50] sm:$0xff]  ;;  %s5257_s16 = scalar_lea.vmem [#allocation9], %s3731_s17 }
  0x66   : > { %v488_v24 = vld [vmem:[%s4170_s21 + $0x68] sm:$0x1]  ;;  %v487_v25 = vld [vmem:[%s4170_s21 + $0x60] sm:$0xff]  ;;  %v490_v26 = vld [vmem:[%s4170_s21 + $0x78] sm:$0x1] }
  0x67   : > { %510 = vperm.xlu1 %3816, %v478_v12   ;;  %500 = vperm.xlu0 %3815, %v476_v13   ;;  %v489_v27 = vld [vmem:[%s4170_s21 + $0x70] sm:$0xff]  ;;  %v614_v52 = vld [vmem:[%s4155_s14 + $0x19] sm:$0x1]  ;;  %v613_v53 = vld [vmem:[%s4155_s14 + $0x18] sm:$0x1]  ;;  %s5166_s21 = scalar_lea.vmem [#allocation8], %s3708_s19 }
  0x68   : > { %v601_v41 = vld [vmem:[%s4155_s14 + $0xc] sm:$0x1]  ;;  %v604_v42 = vld [vmem:[%s4155_s14 + $0xf] sm:$0x1]  ;;  %v603_v43 = vld [vmem:[%s4155_s14 + $0xe] sm:$0x1] }
  0x69   : > { %v606_v44 = vld [vmem:[%s4155_s14 + $0x11] sm:$0x1]  ;;  %v605_v45 = vld [vmem:[%s4155_s14 + $0x10] sm:$0x1]  ;;  %v608_v46 = vld [vmem:[%s4155_s14 + $0x13] sm:$0x1] }
  0x6a   : > { %v607_v47 = vld [vmem:[%s4155_s14 + $0x12] sm:$0x1]  ;;  %v610_v48 = vld [vmem:[%s4155_s14 + $0x15] sm:$0x1]  ;;  %v609_v49 = vld [vmem:[%s4155_s14 + $0x14] sm:$0x1] }
  0x6b   : > { %520 = vperm.xlu1 %3816, %v480_v14   ;;  %515 = vperm.xlu0 %3815, %v479_v15   ;;  %v612_v50 = vld [vmem:[%s4155_s14 + $0x17] sm:$0x1]  ;;  %v611_v51 = vld [vmem:[%s4155_s14 + $0x16] sm:$0x1]  ;;  %v616_v54 = vld [vmem:[%s4155_s14 + $0x1b] sm:$0x1] }
  0x6c   : > { %v615_v55 = vld [vmem:[%s4155_s14 + $0x1a] sm:$0x1]  ;;  %v618_v56 = vld [vmem:[%s4155_s14 + $0x1d] sm:$0x1]  ;;  %v617_v57 = vld [vmem:[%s4155_s14 + $0x1c] sm:$0x1] }
  0x6d   : > { %v620_v58 = vld [vmem:[%s4155_s14 + $0x1f] sm:$0x1]  ;;  %v619_v59 = vld [vmem:[%s4155_s14 + $0x1e] sm:$0x1]  ;;  %v622_v60 = vld [vmem:[%s4155_s14 + $0x21] sm:$0x1] }
  0x6e   : > { %v621_v61 = vld [vmem:[%s4155_s14 + $0x20] sm:$0x1]  ;;  %v624_v62 = vld [vmem:[%s4155_s14 + $0x23] sm:$0x1]  ;;  %v623_v63 = vld [vmem:[%s4155_s14 + $0x22] sm:$0x1] }
  0x6f   : > { %530 = vperm.xlu1 %3816, %v482_v17   ;;  %525 = vperm.xlu0 %3815, %v481_v18   ;;  %v3818_v23 = vpop.eup %3817  ;;  %v626_v0 = vld [vmem:[%s4155_s14 + $0x25] sm:$0x1]  ;;  %v625_v1 = vld [vmem:[%s4155_s14 + $0x24] sm:$0x1]  ;;  %v628_v2 = vld [vmem:[%s4155_s14 + $0x27] sm:$0x1] }
  0x70   : > { %3732 = vpush %v3818_v23  ;;  %v627_v3 = vld [vmem:[%s4155_s14 + $0x26] sm:$0x1]  ;;  %v630_v4 = vld [vmem:[%s4155_s14 + $0x29] sm:$0x1]  ;;  %v629_v5 = vld [vmem:[%s4155_s14 + $0x28] sm:$0x1] }
  0x71   : > { %v632_v6 = vld [vmem:[%s4155_s14 + $0x2b] sm:$0x1]  ;;  %v631_v7 = vld [vmem:[%s4155_s14 + $0x2a] sm:$0x1]  ;;  %v634_v8 = vld [vmem:[%s4155_s14 + $0x2d] sm:$0x1] }
  0x72   : > { %v633_v9 = vld [vmem:[%s4155_s14 + $0x2c] sm:$0x1]  ;;  %v636_v10 = vld [vmem:[%s4155_s14 + $0x2f] sm:$0x1]  ;;  %v635_v11 = vld [vmem:[%s4155_s14 + $0x2e] sm:$0x1] }
  0x73   : > { %540 = vperm.xlu1 %3816, %v484_v19   ;;  %535 = vperm.xlu0 %3815, %v483_v20   ;;  %v638_v12 = vld [vmem:[%s4155_s14 + $0x31] sm:$0x1]  ;;  %v637_v13 = vld [vmem:[%s4155_s14 + $0x30] sm:$0x1]  ;;  %v640_v16 = vld [vmem:[%s4155_s14 + $0x33] sm:$0x1] }
  0x74   : > { %v639_v17 = vld [vmem:[%s4155_s14 + $0x32] sm:$0x1]  ;;  %v642_v20 = vld [vmem:[%s4155_s14 + $0x35] sm:$0x1]  ;;  %s2883_s23 = sshll.u32 %s5166_s21, 4  ;;  %s5410_s23 = int_to_ptr.vmem [resolvable:$true] %s2883_s23 }
  0x77   : > { %550 = vperm.xlu1 %3816, %v486_v21   ;;  %545 = vperm.xlu0 %3815, %v485_v22   ;;  %v641_v21 = vld [vmem:[%s4155_s14 + $0x34] sm:$0x1] }
  0x7b   : > { %560 = vperm.xlu1 %3816, %v488_v24   ;;  %555 = vperm.xlu0 %3815, %v487_v25   ;;  %v644_v24 = vld [vmem:[%s4155_s14 + $0x37] sm:$0x1]  ;;  %v643_v25 = vld [vmem:[%s4155_s14 + $0x36] sm:$0x1] }
  0x7f   : > { %570 = vperm.xlu1 %3816, %v490_v26   ;;  %565 = vperm.xlu0 %3815, %v489_v27  }
  0x83   : > { %681 = vperm.xlu1 %3816, %v590_v28   ;;  %672 = vperm.xlu0 %3815, %v589_v29   ;;  %v646_v28 = vld [vmem:[%s4155_s14 + $0x39] sm:$0x1]  ;;  %v645_v29 = vld [vmem:[%s4155_s14 + $0x38] sm:$0x1] }
  0x87   : > { %699 = vperm.xlu1 %3816, %v592_v30   ;;  %690 = vperm.xlu0 %3815, %v591_v31  }
  0x8b   : > { %717 = vperm.xlu1 %3816, %v594_v32   ;;  %708 = vperm.xlu0 %3815, %v593_v33   ;;  %v648_v32 = vld [vmem:[%s4155_s14 + $0x3b] sm:$0x1]  ;;  %v647_v33 = vld [vmem:[%s4155_s14 + $0x3a] sm:$0x1] }
  0x8f   : > { %735 = vperm.xlu1 %3816, %v596_v34   ;;  %726 = vperm.xlu0 %3815, %v595_v35  }
  0x93   : > { %753 = vperm.xlu1 %3816, %v598_v36   ;;  %744 = vperm.xlu0 %3815, %v597_v37   ;;  %v650_v36 = vld [vmem:[%s4155_s14 + $0x3d] sm:$0x1]  ;;  %v649_v37 = vld [vmem:[%s4155_s14 + $0x3c] sm:$0x1] }
  0x97   : > { %771 = vperm.xlu1 %3816, %v600_v38   ;;  %762 = vperm.xlu0 %3815, %v599_v39   ;;  %v4277_v38 = vld [vmem:[%s6370_s2] sm:$0xff]  ;;  %v4282_v39 = vld [vmem:[%s6370_s2 + $0x8] sm:$0x1] }
  0x9b   : > { %789 = vperm.xlu1 %3816, %v602_v40   ;;  %780 = vperm.xlu0 %3815, %v601_v41  }
  0x9f   : > { %807 = vperm.xlu1 %3816, %v604_v42   ;;  %798 = vperm.xlu0 %3815, %v603_v43  }
  0xa1   : > { %s3733_s18 = spop %3732 }
  0xa2   : > { %s1599_s20 = smul.f32 -0.5, %s3733_s18  ;;  %s1716_s13 = ssub.f32 0.0, %s3733_s18 }
  0xa3   : > { %825 = vperm.xlu1 %3816, %v606_v44   ;;  %816 = vperm.xlu0 %3815, %v605_v45   ;;  %v652_v44 = vld [vmem:[%s4155_s14 + $0x3f] sm:$0x1]  ;;  %v651_v45 = vld [vmem:[%s4155_s14 + $0x3e] sm:$0x1] }
  0xa7   : > { %843 = vperm.xlu1 %3816, %v608_v46   ;;  %834 = vperm.xlu0 %3815, %v607_v47  }
  0xab   : > { %861 = vperm.xlu1 %3816, %v610_v48   ;;  %852 = vperm.xlu0 %3815, %v609_v49   ;;  %v675_v48 = vlaneseq  ;;  %v654_v49 = vld [vmem:[%s4155_s14 + $0x41] sm:$0x1] }
  0xaf   : > { %879 = vperm.xlu1 %3816, %v612_v50   ;;  %870 = vperm.xlu0 %3815, %v611_v51   ;;  %v653_v50 = vld [vmem:[%s4155_s14 + $0x40] sm:$0x1] }
  0xb3   : > { %897 = vperm.xlu1 %3816, %v614_v52   ;;  %888 = vperm.xlu0 %3815, %v613_v53   ;;  %v4300_v53 = vshrl.u32 %v675_v48, 7 }
  0xb5   : > { %vm1793_vm1 = vcmp.eq.s32.totalorder %v4300_v53, 0  ;;  %vm1795_vm2 = vcmp.eq.s32.totalorder %v4300_v53, 1  ;;  %vm1797_vm3 = vcmp.eq.s32.totalorder %v4300_v53, 2  ;;  %vm1799_vm4 = vcmp.eq.s32.totalorder %v4300_v53, 3 }
  0xb6   : > { %vm1801_vm5 = vcmp.eq.s32.totalorder %v4300_v53, 4  ;;  %vm1803_vm6 = vcmp.eq.s32.totalorder %v4300_v53, 5  ;;  %vm1805_vm8 = vcmp.eq.s32.totalorder %v4300_v53, 6  ;;  %vm1807_vm9 = vcmp.eq.s32.totalorder %v4300_v53, 7 }
  0xb7   : > { %915 = vperm.xlu1 %3816, %v616_v54   ;;  %906 = vperm.xlu0 %3815, %v615_v55   ;;  %v656_v54 = vld [vmem:[%s4155_s14 + $0x43] sm:$0x1]  ;;  %v655_v55 = vld [vmem:[%s4155_s14 + $0x42] sm:$0x1] }
  0xbb   : > { %933 = vperm.xlu1 %3816, %v618_v56   ;;  %924 = vperm.xlu0 %3815, %v617_v57  }
  0xbf   : > { %951 = vperm.xlu1 %3816, %v620_v58   ;;  %942 = vperm.xlu0 %3815, %v619_v59   ;;  %v4305_v58 = vsub.s32 0, %v4300_v53  ;;  %v658_v59 = vld [vmem:[%s4155_s14 + $0x45] sm:$0x1] }
  0xc3   : > { %969 = vperm.xlu1 %3816, %v622_v60   ;;  %960 = vperm.xlu0 %3815, %v621_v61   ;;  %v657_v60 = vld [vmem:[%s4155_s14 + $0x44] sm:$0x1] }
  0xc7   : > { %987 = vperm.xlu1 %3816, %v624_v62   ;;  %978 = vperm.xlu0 %3815, %v623_v63  }
  0xcb   : > { %1005 = vperm.xlu1 %3816, %v626_v0   ;;  %996 = vperm.xlu0 %3815, %v625_v1   ;;  %v661_v0 = vld [vmem:[#allocation7] sm:$0x1]  ;;  %v660_v1 = vld [vmem:[%s4155_s14 + $0x47] sm:$0x1] }
  0xcf   : > { %1023 = vperm.xlu1 %3816, %v628_v2   ;;  %1014 = vperm.xlu0 %3815, %v627_v3   ;;  %v659_v2 = vld [vmem:[%s4155_s14 + $0x46] sm:$0x1]  ;;  %s4499_s14 = sld [smem:[#allocation2 + $0x1]] }
  0xd3   : > { %1041 = vperm.xlu1 %3816, %v630_v4   ;;  %1032 = vperm.xlu0 %3815, %v629_v5  }
  0xd5   : > { %s474_s15 = smul.f32 %s4499_s14, %s4499_s14  ;;  %s3876_s14 = scalar_lea.vmem %s5410_s23, 128 }
  0xd6   : > { %p3877_p11 = scmp.ne.s32.totalorder %s5410_s23, %s3876_s14 }
  0xd7   : > { %1059 = vperm.xlu1 %3816, %v632_v6   ;;  %1050 = vperm.xlu0 %3815, %v631_v7  }
  0xd8   : > { %p3878_p13 = pnand %p3877_p11, %p6533_p12 }
  0xda   : > { %p3879_p1 = pneg %p3878_p13 }
  0xdb   : > { %1077 = vperm.xlu1 %3816, %v634_v8   ;;  %1068 = vperm.xlu0 %3815, %v633_v9  }
  0xdf   : > { %1095 = vperm.xlu1 %3816, %v636_v10   ;;  %1086 = vperm.xlu0 %3815, %v635_v11  }
  0xe2   : > { %v4238_v14 = vpop.permute.xlu1 %505  ;;  %v4240_v15 = vpop.permute.xlu0 %495 }
  0xe3   : > { %1113 = vperm.xlu1 %3816, %v638_v12   ;;  %1104 = vperm.xlu0 %3815, %v637_v13  }
  0xe6   : > { %v4244_v18 = vpop.permute.xlu1 %510  ;;  %v4246_v19 = vpop.permute.xlu0 %500 }
  0xe7   : > { %1131 = vperm.xlu1 %3816, %v640_v16   ;;  %1122 = vperm.xlu0 %3815, %v639_v17   ;;  %v662_v16 = vld [vmem:[#allocation7 + $0x1] sm:$0x1] }
  0xea   : > { %v4250_v22 = vpop.permute.xlu1 %520  ;;  %v4252_v23 = vpop.permute.xlu0 %515 }
  0xeb   : > { %6455 = vst [vmem:[#allocation16_spill] sm:$0xff] %v4250_v22  ;;  %6456 = vst [vmem:[#allocation17_spill] sm:$0xff] %v4252_v23  ;;  %1149 = vperm.xlu1 %3816, %v642_v20   ;;  %1140 = vperm.xlu0 %3815, %v641_v21  }
  0xee   : > { %v4256_v26 = vpop.permute.xlu1 %530  ;;  %v4258_v27 = vpop.permute.xlu0 %525 }
  0xef   : > { %6457 = vst [vmem:[#allocation18_spill] sm:$0xff] %v4256_v26  ;;  %6458 = vst [vmem:[#allocation19_spill] sm:$0xff] %v4258_v27  ;;  %1167 = vperm.xlu1 %3816, %v644_v24   ;;  %1158 = vperm.xlu0 %3815, %v643_v25  }
  0xf2   : > { %v4262_v30 = vpop.permute.xlu1 %540  ;;  %v4264_v31 = vpop.permute.xlu0 %535 }
  0xf3   : > { %6459 = vst [vmem:[#allocation20_spill] sm:$0xff] %v4262_v30  ;;  %6460 = vst [vmem:[#allocation21_spill] sm:$0xff] %v4264_v31  ;;  %1185 = vperm.xlu1 %3816, %v646_v28   ;;  %1176 = vperm.xlu0 %3815, %v645_v29  }
  0xf6   : > { %v4268_v34 = vpop.permute.xlu1 %550  ;;  %v4270_v35 = vpop.permute.xlu0 %545 }
  0xf7   : > { %6461 = vst [vmem:[#allocation22_spill] sm:$0xff] %v4268_v34  ;;  %6462 = vst [vmem:[#allocation23_spill] sm:$0xff] %v4270_v35  ;;  %1203 = vperm.xlu1 %3816, %v648_v32   ;;  %1194 = vperm.xlu0 %3815, %v647_v33  }
  0xfa   : > { %v4284_v40 = vpop.permute.xlu1 %560  ;;  %v4286_v41 = vpop.permute.xlu0 %555 }
  0xfb   : > { %6463 = vst [vmem:[#allocation24_spill] sm:$0xff] %v4284_v40  ;;  %6464 = vst [vmem:[#allocation25_spill] sm:$0xff] %v4286_v41  ;;  %1221 = vperm.xlu1 %3816, %v650_v36   ;;  %1212 = vperm.xlu0 %3815, %v649_v37  }
  0xfe   : > { %v4294_v46 = vpop.permute.xlu1 %570  ;;  %v4296_v47 = vpop.permute.xlu0 %565 }
  0xff   : > { %6465 = vst [vmem:[#allocation26_spill] sm:$0xff] %v4294_v46  ;;  %6466 = vst [vmem:[#allocation27_spill] sm:$0xff] %v4296_v47  ;;  %1239 = vperm.xlu1 %3816, %v652_v44   ;;  %1230 = vperm.xlu0 %3815, %v651_v45   ;;  %v4606_v47 = vstv %s474_s15  ;;  %s3969_s15 = smov [#allocation8]  }
 0x100   : > { %s3880_s19 = sshll.u32 %s3969_s15, 4  ;;  %s3881_s19 = int_to_ptr.vmem [resolvable:$false] %s3880_s19 }
 0x101   : > { %p3883_p2 = scmp.lt.s32.totalorder %s5410_s23, %s3881_s19 }
 0x102   : > { %v682_v51 = vpop.permute.xlu1 %681  ;;  %v673_v52 = vpop.permute.xlu0 %672 }
 0x103   : > { %1257 = vperm.xlu1 %3816, %v654_v49   ;;  %1248 = vperm.xlu0 %3815, %v653_v50   ;;  %v687_v63 = vrot.slane %v682_v51, %v4305_v58  ;;  %v678_v3 = vrot.slane %v673_v52, %v4305_v58 }
 0x105   : > { %v4313_v6 = vsub.f32 %v687_v63, %v661_v0  ;;  %v4317_v9 = vsub.f32 %v678_v3, %v661_v0 }
 0x106   : > { %v700_v56 = vpop.permute.xlu1 %699  ;;  %v691_v57 = vpop.permute.xlu0 %690 }
 0x107   : > { %1275 = vperm.xlu1 %3816, %v656_v54   ;;  %1266 = vperm.xlu0 %3815, %v655_v55   ;;  %v705_v7 = vrot.slane %v700_v56, %v4305_v58  ;;  %v696_v8 = vrot.slane %v691_v57, %v4305_v58  ;;  %v1391_v12 = vmul.f32 %v4313_v6, %v4313_v6 }
 0x108   : > { %v1390_v28 = vmul.f32 %v4317_v9, %v4317_v9 }
 0x109   : > { %v4321_v13 = vsub.f32 %v705_v7, %v661_v0  ;;  %v4323_v17 = vsub.f32 %v696_v8, %v661_v0  ;;  %v1480_v37 = vsel %vm1462_vm0, %v1391_v12, 0.0 }
 0x10a   : > { %v718_v61 = vpop.permute.xlu1 %717  ;;  %v709_v62 = vpop.permute.xlu0 %708 }
 0x10b   : > { %1293 = vperm.xlu1 %3816, %v658_v59   ;;  %1284 = vperm.xlu0 %3815, %v657_v60   ;;  %v723_v20 = vrot.slane %v718_v61, %v4305_v58  ;;  %v714_v25 = vrot.slane %v709_v62, %v4305_v58  ;;  %v1393_v44 = vmul.f32 %v4321_v13, %v4321_v13  ;;  %v1463_v59 = vsel %vm1462_vm0, %v1390_v28, 0.0 }
 0x10c   : > { %v1392_v49 = vmul.f32 %v4323_v17, %v4323_v17 }
 0x10d   : > { %v4342_v50 = vsub.f32 %v723_v20, %v661_v0  ;;  %v4348_v54 = vsub.f32 %v714_v25, %v661_v0 }
 0x10e   : > { %v736_v4 = vpop.permute.xlu1 %735  ;;  %v727_v5 = vpop.permute.xlu0 %726  ;;  %v1497_v8 = vsel %vm1462_vm0, %v1392_v49, 0.0 }
 0x10f   : > { %1311 = vperm.xlu1 %3816, %v660_v1   ;;  %1302 = vperm.xlu0 %3815, %v659_v2   ;;  %v741_v55 = vrot.slane %v736_v4, %v4305_v58  ;;  %v732_v60 = vrot.slane %v727_v5, %v4305_v58  ;;  %v1514_v2 = vsel %vm1462_vm0, %v1393_v44, 0.0  ;;  %v1395_v12 = vmul.f32 %v4342_v50, %v4342_v50 }
 0x110   : > { %v1394_v20 = vmul.f32 %v4348_v54, %v4348_v54 }
 0x111   : > { %v4374_v25 = vsub.f32 %v732_v60, %v661_v0 }
 0x112   : > { %v754_v10 = vpop.permute.xlu1 %753  ;;  %v745_v11 = vpop.permute.xlu0 %744 }
 0x113   : > { %v759_v21 = vrot.slane %v754_v10, %v4305_v58  ;;  %v750_v24 = vrot.slane %v745_v11, %v4305_v58 }
 0x115   : > { %v4331_v29 = vsub.f32 %v759_v21, %v662_v16  ;;  %v4333_v32 = vsub.f32 %v750_v24, %v662_v16  ;;  %v4371_v21 = vsub.f32 %v741_v55, %v661_v0 }
 0x116   : > { %v772_v33 = vpop.permute.xlu1 %771  ;;  %v763_v36 = vpop.permute.xlu0 %762 }
 0x117   : > { %v777_v45 = vrot.slane %v772_v33, %v4305_v58  ;;  %v768_v48 = vrot.slane %v763_v36, %v4305_v58  ;;  %v1399_v51 = vmul.f32 %v4331_v29, %v4331_v29  ;;  %v1398_v52 = vmul.f32 %v4333_v32, %v4333_v32 }
 0x118   : > { %v1397_v0 = vmul.f32 %v4371_v21, %v4371_v21 }
 0x119   : > { %v4351_v56 = vsub.f32 %v777_v45, %v662_v16  ;;  %v4353_v57 = vsub.f32 %v768_v48, %v662_v16  ;;  %v1481_v61 = vsel %vm1462_vm0, %v1399_v51, 0.0  ;;  %v1464_v62 = vsel %vm1462_vm0, %v1398_v52, 0.0 }
 0x11a   : > { %v790_v63 = vpop.permute.xlu1 %789  ;;  %v781_v1 = vpop.permute.xlu0 %780  ;;  %v1482_v3 = vadd.f32 %v1481_v61, %v1480_v37  ;;  %v1465_v7 = vadd.f32 %v1464_v62, %v1463_v59  ;;  %v1548_v61 = vsel %vm1462_vm0, %v1395_v12, 0.0  ;;  %v1396_v62 = vmul.f32 %v4374_v25, %v4374_v25  ;;  %v663_v12 = vld [vmem:[#allocation7 + $0x2] sm:$0x1] }
 0x11b   : > { %v1401_v4 = vmul.f32 %v4351_v56, %v4351_v56  ;;  %v1400_v10 = vmul.f32 %v4353_v57, %v4353_v57  ;;  %v795_v5 = vrot.slane %v790_v63, %v4305_v58  ;;  %v786_v11 = vrot.slane %v781_v1, %v4305_v58 }
 0x11d   : > { %v1515_v24 = vsel %vm1462_vm0, %v1401_v4, 0.0  ;;  %v1498_v33 = vsel %vm1462_vm0, %v1400_v10, 0.0  ;;  %v4377_v36 = vsub.f32 %v795_v5, %v662_v16  ;;  %v4379_v48 = vsub.f32 %v786_v11, %v662_v16 }
 0x11e   : > { %v1516_v28 = vadd.f32 %v1515_v24, %v1514_v2  ;;  %v808_v37 = vpop.permute.xlu1 %807  ;;  %v799_v44 = vpop.permute.xlu0 %798  ;;  %v1499_v45 = vadd.f32 %v1498_v33, %v1497_v8  ;;  %v1531_v4 = vsel %vm1462_vm0, %v1394_v20, 0.0  ;;  %v1582_v24 = vsel %vm1462_vm0, %v1397_v0, 0.0 }
 0x11f   : > { %v813_v49 = vrot.slane %v808_v37, %v4305_v58  ;;  %v804_v51 = vrot.slane %v799_v44, %v4305_v58  ;;  %v1403_v52 = vmul.f32 %v4377_v36, %v4377_v36  ;;  %v1402_v55 = vmul.f32 %v4379_v48, %v4379_v48 }
 0x120   : > { %v1565_v20 = vsel %vm1462_vm0, %v1396_v62, 0.0 }
 0x121   : > { %v4389_v59 = vsub.f32 %v813_v49, %v662_v16  ;;  %v4391_v60 = vsub.f32 %v804_v51, %v662_v16  ;;  %v1549_v63 = vsel %vm1462_vm0, %v1403_v52, 0.0  ;;  %v1532_v10 = vsel %vm1462_vm0, %v1402_v55, 0.0 }
 0x122   : > { %v826_v1 = vpop.permute.xlu1 %825  ;;  %v817_v2 = vpop.permute.xlu0 %816  ;;  %v1550_v8 = vadd.f32 %v1549_v63, %v1548_v61  ;;  %v1533_v11 = vadd.f32 %v1532_v10, %v1531_v4 }
 0x123   : > { %v1405_v5 = vmul.f32 %v4389_v59, %v4389_v59  ;;  %v1404_v16 = vmul.f32 %v4391_v60, %v4391_v60  ;;  %v831_v37 = vrot.slane %v826_v1, %v4305_v58  ;;  %v822_v44 = vrot.slane %v817_v2, %v4305_v58 }
 0x125   : > { %v1583_v33 = vsel %vm1462_vm0, %v1405_v5, 0.0  ;;  %v1566_v51 = vsel %vm1462_vm0, %v1404_v16, 0.0  ;;  %v4409_v63 = vsub.f32 %v831_v37, %v663_v12  ;;  %v4411_v4 = vsub.f32 %v822_v44, %v663_v12 }
 0x126   : > { %v1584_v49 = vadd.f32 %v1583_v33, %v1582_v24  ;;  %v844_v52 = vpop.permute.xlu1 %843  ;;  %v835_v55 = vpop.permute.xlu0 %834  ;;  %v1567_v61 = vadd.f32 %v1566_v51, %v1565_v20 }
 0x127   : > { %v849_v0 = vrot.slane %v844_v52, %v4305_v58  ;;  %v840_v10 = vrot.slane %v835_v55, %v4305_v58  ;;  %v1407_v1 = vmul.f32 %v4409_v63, %v4409_v63  ;;  %v1406_v62 = vmul.f32 %v4411_v4, %v4411_v4 }
 0x129   : > { %v4419_v2 = vsub.f32 %v849_v0, %v663_v12  ;;  %v4421_v5 = vsub.f32 %v840_v10, %v663_v12  ;;  %v1483_v33 = vsel %vm1462_vm0, %v1407_v1, 0.0  ;;  %v1466_v37 = vsel %vm1462_vm0, %v1406_v62, 0.0 }
 0x12a   : > { %v862_v16 = vpop.permute.xlu1 %861  ;;  %v853_v24 = vpop.permute.xlu0 %852  ;;  %v1484_v44 = vadd.f32 %v1483_v33, %v1482_v3  ;;  %v1467_v20 = vadd.f32 %v1466_v37, %v1465_v7 }
 0x12b   : > { %v1409_v51 = vmul.f32 %v4419_v2, %v4419_v2  ;;  %v1408_v52 = vmul.f32 %v4421_v5, %v4421_v5  ;;  %v867_v55 = vrot.slane %v862_v16, %v4305_v58  ;;  %v858_v0 = vrot.slane %v853_v24, %v4305_v58 }
 0x12d   : > { %v1517_v10 = vsel %vm1462_vm0, %v1409_v51, 0.0  ;;  %v1500_v1 = vsel %vm1462_vm0, %v1408_v52, 0.0  ;;  %v4435_v3 = vsub.f32 %v867_v55, %v663_v12  ;;  %v4439_v62 = vsub.f32 %v858_v0, %v663_v12  ;;  %v4452_v0 = vld [vmem:[#allocation7 + $0x3] sm:$0x1] }
 0x12e   : > { %v880_v42 = vpop.permute.xlu1 %879  ;;  %v871_v43 = vpop.permute.xlu0 %870  ;;  %v4432_v40 = vadd.f32 %v1517_v10, %v1516_v28  ;;  %v4437_v7 = vadd.f32 %v1500_v1, %v1499_v45 }
 0x12f   : > { %v885_v33 = vrot.slane %v880_v42, %v4305_v58  ;;  %v876_v16 = vrot.slane %v871_v43, %v4305_v58  ;;  %v1411_v24 = vmul.f32 %v4435_v3, %v4435_v3  ;;  %v1410_v28 = vmul.f32 %v4439_v62, %v4439_v62 }
 0x131   : > { %v4447_v37 = vsub.f32 %v885_v33, %v663_v12  ;;  %v4449_v51 = vsub.f32 %v876_v16, %v663_v12  ;;  %v1551_v55 = vsel %vm1462_vm0, %v1411_v24, 0.0  ;;  %v1534_v1 = vsel %vm1462_vm0, %v1410_v28, 0.0 }
 0x132   : > { %v898_v52 = vpop.permute.xlu1 %897  ;;  %v889_v45 = vpop.permute.xlu0 %888  ;;  %v4456_v10 = vadd.f32 %v1551_v55, %v1550_v8  ;;  %v4461_v33 = vadd.f32 %v1534_v1, %v1533_v11  ;;  %v4472_v55 = vstv %s1599_s20  ;;  %v4474_v28 = vstv %s3733_s18  ;;  %s5408_s20 = scalar_lea.hbm %s6373_s5, %s3726_s9 }
 0x133   : > { %6467 = vst [vmem:[#allocation28_spill] sm:$0xff] %v4447_v37  ;;  %6468 = vst [vmem:[#allocation29_spill] sm:$0xff] %v4449_v51  ;;  %v903_v42 = vrot.slane %v898_v52, %v4305_v58  ;;  %v894_v43 = vrot.slane %v889_v45, %v4305_v58  ;;  %v1413_v12 = vmul.f32 %v4447_v37, %v4447_v37  ;;  %v4479_v1 = vstv %s1716_s13  ;;  %s2856_s13 = scalar_lea.sflag [#allocation4], %s4152_s11 }
 0x134   : > { %v1412_v16 = vmul.f32 %v4449_v51, %v4449_v51  ;;  %6471 = vst [vmem:[#allocation32_spill] sm:$0xff] %v4472_v55  ;;  %6472 = vst [vmem:[#allocation33_spill] sm:$0xff] %v4474_v28  ;;  %v1725_v34 = vmul.f32 %v4479_v1, %v4371_v21  ;;  %v1726_v35 = vmul.f32 %v4479_v1, %v4333_v32 }
 0x135   : > { %v1585_v24 = vsel %vm1462_vm0, %v1413_v12, 0.0  ;;  %v4467_v41 = vsub.f32 %v903_v42, %v4452_v0  ;;  %v4470_v52 = vsub.f32 %v894_v43, %v4452_v0  ;;  %v1729_v21 = vmul.f32 %v4479_v1, %v4351_v56 }
 0x136   : > { %v916_v8 = vpop.permute.xlu1 %915  ;;  %v907_v45 = vpop.permute.xlu0 %906  ;;  %v4476_v37 = vadd.f32 %v1585_v24, %v1584_v49  ;;  %v1568_v11 = vsel %vm1462_vm0, %v1412_v16, 0.0 }
 0x137   : > { %6469 = vst [vmem:[#allocation30_spill] sm:$0xff] %v4467_v41  ;;  %6470 = vst [vmem:[#allocation31_spill] sm:$0xff] %v4470_v52  ;;  %v4481_v51 = vadd.f32 %v1568_v11, %v1567_v61  ;;  %v1415_v42 = vmul.f32 %v4467_v41, %v4467_v41  ;;  %v1414_v43 = vmul.f32 %v4470_v52, %v4470_v52 }
 0x138   : > { %v921_v49 = vrot.slane %v916_v8, %v4305_v58  ;;  %v912_v16 = vrot.slane %v907_v45, %v4305_v58 }
 0x139   : > { %v1485_v11 = vsel %vm1462_vm0, %v1415_v42, 0.0  ;;  %v1468_v55 = vsel %vm1462_vm0, %v1414_v43, 0.0 }
 0x13a   : > { %v934_v52 = vpop.permute.xlu1 %933  ;;  %v925_v41 = vpop.permute.xlu0 %924  ;;  %v4503_v8 = vadd.f32 %v1485_v11, %v1484_v44  ;;  %v4505_v45 = vadd.f32 %v1468_v55, %v1467_v20  ;;  %v4508_v61 = vsub.f32 %v921_v49, %v4452_v0  ;;  %v4513_v42 = vsub.f32 %v912_v16, %v4452_v0 }
 0x13b   : > { %v939_v43 = vrot.slane %v934_v52, %v4305_v58  ;;  %v930_v12 = vrot.slane %v925_v41, %v4305_v58 }
 0x13c   : > { %v1417_v55 = vmul.f32 %v4508_v61, %v4508_v61  ;;  %v1416_v52 = vmul.f32 %v4513_v42, %v4513_v42 }
 0x13d   : > { %v4530_v41 = vsub.f32 %v939_v43, %v4452_v0  ;;  %v4533_v16 = vsub.f32 %v930_v12, %v4452_v0 }
 0x13e   : > { %v952_v11 = vpop.permute.xlu1 %951  ;;  %v943_v24 = vpop.permute.xlu0 %942  ;;  %v1519_v28 = vsel %vm1462_vm0, %v1417_v55, 0.0  ;;  %v1502_v12 = vsel %vm1462_vm0, %v1416_v52, 0.0  ;;  %v1721_v55 = vmul.f32 %v4479_v1, %v4321_v13 }
 0x13f   : > { %v957_v44 = vrot.slane %v952_v11, %v4305_v58  ;;  %v948_v49 = vrot.slane %v943_v24, %v4305_v58  ;;  %v4543_v43 = vadd.f32 %v1519_v28, %v4432_v40  ;;  %v1419_v31 = vmul.f32 %v4530_v41, %v4530_v41 }
 0x140   : > { %v4553_v11 = vadd.f32 %v1502_v12, %v4437_v7  ;;  %v1418_v24 = vmul.f32 %v4533_v16, %v4533_v16  ;;  %v1720_v40 = vmul.f32 %v4479_v1, %v4323_v17  ;;  %v1723_v17 = vmul.f32 %v4479_v1, %v4342_v50 }
 0x141   : > { %v1553_v28 = vsel %vm1462_vm0, %v1419_v31, 0.0  ;;  %v4561_v52 = vsub.f32 %v957_v44, %v4452_v0  ;;  %v4564_v30 = vsub.f32 %v948_v49, %v4452_v0  ;;  %v1719_v7 = vmul.f32 %v4479_v1, %v4313_v6 }
 0x142   : > { %v4566_v20 = vpop.permute.xlu1 %969  ;;  %v4568_v13 = vpop.permute.xlu0 %960  ;;  %v4577_v31 = vadd.f32 %v1553_v28, %v4456_v10  ;;  %v1536_v44 = vsel %vm1462_vm0, %v1418_v24, 0.0  ;;  %v4590_v46 = vrot.slane %v1721_v55, %v4305_v58  ;;  %v1722_v50 = vmul.f32 %v4479_v1, %v4348_v54 }
 0x143   : > { %v4581_v0 = vadd.f32 %v1536_v44, %v4461_v33  ;;  %v1421_v49 = vmul.f32 %v4561_v52, %v4561_v52  ;;  %v1420_v12 = vmul.f32 %v4564_v30, %v4564_v30  ;;  %v4595_v10 = vadd.s32 8, %v4300_v53 }
 0x144   : > { %6473 = vst [vmem:[#allocation34_spill] sm:$0xff] %v4590_v46  ;;  %v1718_v33 = vmul.f32 %v4479_v1, %v4317_v9  ;;  %v4600_v24 = vrot.slane %v1720_v40, %v4305_v58  ;;  %v4609_v54 = vrot.slane %v1723_v17, %v4305_v58 }
 0x145   : > { %v1587_v28 = vsel %vm1462_vm0, %v1421_v49, 0.0  ;;  %v1570_v44 = vsel %vm1462_vm0, %v1420_v12, 0.0  ;;  %v1724_v49 = vmul.f32 %v4479_v1, %v4374_v25  ;;  %v1727_v12 = vmul.f32 %v4479_v1, %v4331_v29 }
 0x146   : > { %6474 = vst [vmem:[#allocation35_spill] sm:$0xff] %v4600_v24  ;;  %v4604_v6 = vpop.permute.xlu1 %987  ;;  %v979_v55 = vpop.permute.xlu0 %978  ;;  %6475 = vst [vmem:[#allocation36_spill] sm:$0xff] %v4609_v54  ;;  %v4614_v9 = vadd.f32 %v1587_v28, %v4476_v37  ;;  %v4617_v40 = vadd.f32 %v1570_v44, %v4481_v51  ;;  %v4627_v54 = vrot.slane %v1722_v50, %v4305_v58  ;;  %v4635_v51 = vld [vmem:[#allocation7 + $0x4] sm:$0x1]  ;;  %v6492_v24 = vld [vmem:[#allocation31_spill] sm:$0xff]  ;;  %vm1810_vm10 = vcmp.eq.s32.totalorder %v4595_v10, 8 }
 0x147   : > { %v984_v17 = vrot.slane %v979_v55, %v4305_v58  ;;  %v1728_v37 = vmul.f32 %v4479_v1, %v4353_v57  ;;  %v1731_v25 = vmul.f32 %v4479_v1, %v4377_v36  ;;  %v1730_v29 = vmul.f32 %v4479_v1, %v4379_v48 }
 0x148   : > { %6476 = vst [vmem:[#allocation37_spill] sm:$0xff] %v4627_v54  ;;  %v4643_v44 = vrot.slane %v1719_v7, %v4305_v58  ;;  %v4646_v56 = vrot.slane %v1718_v33, %v4305_v58  ;;  %v1733_v57 = vmul.f32 %v4479_v1, %v4389_v59  ;;  %v1732_v36 = vmul.f32 %v4479_v1, %v4391_v60 }
 0x149   : > { %v4640_v32 = vsub.f32 %v984_v17, %v4635_v51  ;;  %v4655_v17 = vrot.slane %v1725_v34, %v4305_v58  ;;  %v4658_v54 = vrot.slane %v1724_v49, %v4305_v58  ;;  %v4661_v7 = vrot.slane %v1727_v12, %v4305_v58 }
 0x14a   : > { %v1006_v28 = vpop.permute.xlu1 %1005  ;;  %v997_v50 = vpop.permute.xlu0 %996  ;;  %v4664_v33 = vrot.slane %v1726_v35, %v4305_v58  ;;  %v4667_v59 = vrot.slane %v1729_v21, %v4305_v58  ;;  %v4670_v60 = vrot.slane %v1728_v37, %v4305_v58  ;;  %v4678_v49 = vrot.slane %v1730_v29, %v4305_v58 }
 0x14b   : > { %v1011_v55 = vrot.slane %v1006_v28, %v4305_v58  ;;  %v1002_v48 = vrot.slane %v997_v50, %v4305_v58  ;;  %6477 = vst [vmem:[#allocation38_spill] sm:$0xff] %v4655_v17  ;;  %6478 = vst [vmem:[#allocation39_spill] sm:$0xff] %v4658_v54  ;;  %v4673_v28 = vrot.slane %v1731_v25, %v4305_v58 }
 0x14c   : > { %6479 = vst [vmem:[#allocation40_spill] sm:$0xff] %v4667_v59  ;;  %6480 = vst [vmem:[#allocation41_spill] sm:$0xff] %v4670_v60  ;;  %v1424_v34 = vmul.f32 %v4640_v32, %v4640_v32  ;;  %v1735_v12 = vmul.f32 %v4479_v1, %v4409_v63  ;;  %v4689_v25 = vrot.slane %v1733_v57, %v4305_v58 }
 0x14d   : > { %6481 = vst [vmem:[#allocation42_spill] sm:$0xff] %v4673_v28  ;;  %6482 = vst [vmem:[#allocation43_spill] sm:$0xff] %v4678_v49  ;;  %v4683_v35 = vsub.f32 %v1011_v55, %v4635_v51  ;;  %v4686_v21 = vsub.f32 %v1002_v48, %v4635_v51  ;;  %v4692_v54 = vrot.slane %v1732_v36, %v4305_v58 }
 0x14e   : > { %v1024_v37 = vpop.permute.xlu1 %1023  ;;  %v1015_v50 = vpop.permute.xlu0 %1014  ;;  %6483 = vst [vmem:[#allocation44_spill] sm:$0xff] %v4689_v25  ;;  %v1734_v29 = vmul.f32 %v4479_v1, %v4411_v4  ;;  %v1504_v17 = vsel %vm1462_vm0, %v1424_v34, 0.0  ;;  %v1737_v63 = vmul.f32 %v4479_v1, %v4419_v2  ;;  %v1736_v36 = vmul.f32 %v4479_v1, %v4421_v5 }
 0x14f   : > { %6484 = vst [vmem:[#allocation45_spill] sm:$0xff] %v4692_v54  ;;  %v4700_v55 = vadd.f32 %v1504_v17, %v4553_v11  ;;  %v1427_v48 = vmul.f32 %v4683_v35, %v4683_v35  ;;  %v1426_v57 = vmul.f32 %v4686_v21, %v4686_v21  ;;  %v975_v4 = vrot.slane %v4566_v20, %v4305_v58 }
 0x150   : > { %v1029_v34 = vrot.slane %v1024_v37, %v4305_v58  ;;  %v1020_v54 = vrot.slane %v1015_v50, %v4305_v58  ;;  %v4713_v2 = vrot.slane %v1735_v12, %v4305_v58  ;;  %v1739_v11 = vmul.f32 %v4479_v1, %v4435_v3 }
 0x151   : > { %v1555_v17 = vsel %vm1462_vm0, %v1427_v48, 0.0  ;;  %v1538_v25 = vsel %vm1462_vm0, %v1426_v57, 0.0  ;;  %v1738_v5 = vmul.f32 %v4479_v1, %v4439_v62  ;;  %v4733_v3 = vrot.slane %v1734_v29, %v4305_v58  ;;  %v6488_v57 = vld [vmem:[#allocation28_spill] sm:$0xff] }
 0x152   : > { %v1042_v49 = vpop.permute.xlu1 %1041  ;;  %v4719_v28 = vpop.permute.xlu0 %1032  ;;  %v4724_v20 = vadd.f32 %v1555_v17, %v4577_v31  ;;  %v4727_v37 = vadd.f32 %v1538_v25, %v4581_v0  ;;  %v4730_v12 = vsub.f32 %v1029_v34, %v4635_v51  ;;  %v4736_v50 = vrot.slane %v1737_v63, %v4305_v58  ;;  %v6489_v34 = vld [vmem:[#allocation29_spill] sm:$0xff] }
 0x153   : > { %v966_v48 = vrot.slane %v4568_v13, %v4305_v58  ;;  %v4741_v62 = vsub.f32 %v1020_v54, %v4635_v51  ;;  %v4744_v31 = vrot.slane %v1736_v36, %v4305_v58  ;;  %v1351_v0 = vsub.f32 %v975_v4, %v4635_v51 }
 0x154   : > { %6485 = vst [vmem:[#allocation46_spill] sm:$0xff] %v4736_v50  ;;  %v993_v25 = vrot.slane %v4604_v6, %v4305_v58  ;;  %v1429_v29 = vmul.f32 %v4730_v12, %v4730_v12  ;;  %v4752_v63 = vrot.slane %v1739_v11, %v4305_v58  ;;  %v1741_v13 = vmul.f32 %v4479_v1, %v6488_v57  ;;  %v6491_v6 = vld [vmem:[#allocation30_spill] sm:$0xff] }
 0x155   : > { %6486 = vst [vmem:[#allocation47_spill] sm:$0xff] %v4744_v31  ;;  %v1740_v54 = vmul.f32 %v4479_v1, %v6489_v34  ;;  %v1428_v36 = vmul.f32 %v4741_v62, %v4741_v62  ;;  %v4761_v31 = vrot.slane %v1738_v5, %v4305_v58  ;;  %v1743_v60 = vmul.f32 %v4479_v1, %v6491_v6 }
 0x156   : > { %6487 = vst [vmem:[#allocation48_spill] sm:$0xff] %v4752_v63  ;;  %v1060_v17 = vpop.permute.xlu1 %1059  ;;  %v1051_v4 = vpop.permute.xlu0 %1050  ;;  %v1742_v11 = vmul.f32 %v4479_v1, %v6492_v24  ;;  %v1589_v63 = vsel %vm1462_vm0, %v1429_v29, 0.0  ;;  %v1745_v57 = vmul.f32 %v4479_v1, %v4508_v61  ;;  %v1350_v34 = vsub.f32 %v966_v48, %v4635_v51 }
 0x157   : > { %6490 = vst [vmem:[#allocation28_spill] sm:$0xff] %v4761_v31  ;;  %v4772_v22 = vadd.f32 %v1589_v63, %v4614_v9  ;;  %v1572_v23 = vsel %vm1462_vm0, %v1428_v36, 0.0  ;;  %v1744_v5 = vmul.f32 %v4479_v1, %v4513_v42  ;;  %v1423_v31 = vmul.f32 %v1351_v0, %v1351_v0  ;;  %v4808_v36 = vld [vmem:[#allocation7 + $0x5] sm:$0x1] }
 0x158   : > { %v1353_v6 = vsub.f32 %v993_v25, %v4635_v51  ;;  %v4779_v24 = vadd.f32 %v1572_v23, %v4617_v40  ;;  %v4782_v29 = vrot.slane %v1741_v13, %v4305_v58  ;;  %v4785_v61 = vrot.slane %v1740_v54, %v4305_v58 }
 0x159   : > { %v1747_v9 = vmul.f32 %v4479_v1, %v4530_v41  ;;  %v1746_v48 = vmul.f32 %v4479_v1, %v4533_v16  ;;  %v4794_v51 = vrot.slane %v1743_v60, %v4305_v58  ;;  %v1749_v23 = vmul.f32 %v4479_v1, %v4561_v52 }
 0x15a   : > { %6493 = vst [vmem:[#allocation29_spill] sm:$0xff] %v4782_v29  ;;  %6494 = vst [vmem:[#allocation30_spill] sm:$0xff] %v4785_v61  ;;  %v1078_v63 = vpop.permute.xlu1 %1077  ;;  %v4791_v42 = vpop.permute.xlu0 %1068  ;;  %v1748_v40 = vmul.f32 %v4479_v1, %v4564_v30  ;;  %v1047_v25 = vrot.slane %v1042_v49, %v4305_v58  ;;  %v4802_v13 = vrot.slane %v1742_v11, %v4305_v58  ;;  %v1487_v52 = vsel %vm1462_vm0, %v1423_v31, 0.0 }
 0x15b   : > { %v4805_v41 = vrot.slane %v1745_v57, %v4305_v58  ;;  %v1751_v16 = vmul.f32 %v4479_v1, %v1351_v0  ;;  %v1422_v54 = vmul.f32 %v1350_v34, %v1350_v34  ;;  %v4811_v60 = vrot.slane %v1744_v5, %v4305_v58 }
 0x15c   : > { %v1425_v61 = vmul.f32 %v1353_v6, %v1353_v6  ;;  %v1038_v30 = vrot.slane %v4719_v28, %v4305_v58  ;;  %v4817_v49 = vrot.slane %v1747_v9, %v4305_v58  ;;  %v4820_v11 = vrot.slane %v1746_v48, %v4305_v58 }
 0x15d   : > { %6495 = vst [vmem:[#allocation31_spill] sm:$0xff] %v4805_v41  ;;  %6496 = vst [vmem:[#allocation49_spill] sm:$0xff] %v4811_v60  ;;  %v1750_v0 = vmul.f32 %v4479_v1, %v1350_v34  ;;  %v1065_v57 = vrot.slane %v1060_v17, %v4305_v58  ;;  %v4825_v5 = vrot.slane %v1749_v23, %v4305_v58  ;;  %v1470_v34 = vsel %vm1462_vm0, %v1422_v54, 0.0 }
 0x15e   : > { %6497 = vst [vmem:[#allocation50_spill] sm:$0xff] %v4817_v49  ;;  %6498 = vst [vmem:[#allocation51_spill] sm:$0xff] %v4820_v11  ;;  %v1096_v29 = vpop.permute.xlu1 %1095  ;;  %v1087_v41 = vpop.permute.xlu0 %1086  ;;  %v4828_v31 = vrot.slane %v1748_v40, %v4305_v58  ;;  %v1359_v28 = vsub.f32 %v1047_v25, %v4808_v36  ;;  %v1056_v9 = vrot.slane %v1051_v4, %v4305_v58  ;;  %v1521_v11 = vsel %vm1462_vm0, %v1425_v61, 0.0 }
 0x15f   : > { %6499 = vst [vmem:[#allocation52_spill] sm:$0xff] %v4825_v5  ;;  %v1488_v49 = vadd.f32 %v1487_v52, %v4503_v8  ;;  %v4834_v48 = vrot.slane %v1751_v16, %v4305_v58  ;;  %v1753_v17 = vmul.f32 %v4479_v1, %v1353_v6  ;;  %v1752_v23 = vmul.f32 %v4479_v1, %v4640_v32 }
 0x160   : > { %6500 = vst [vmem:[#allocation53_spill] sm:$0xff] %v4828_v31  ;;  %v1755_v40 = vmul.f32 %v4479_v1, %v4683_v35  ;;  %v1358_v25 = vsub.f32 %v1038_v30, %v4808_v36  ;;  %v4845_v4 = vrot.slane %v1750_v0, %v4305_v58  ;;  %v1754_v8 = vmul.f32 %v4479_v1, %v4686_v21 }
 0x161   : > { %v1757_v16 = vmul.f32 %v4479_v1, %v4730_v12  ;;  %v1361_v6 = vsub.f32 %v1065_v57, %v4808_v36  ;;  %v1471_v32 = vadd.f32 %v1470_v34, %v4505_v45  ;;  %v1431_v52 = vmul.f32 %v1359_v28, %v1359_v28 }
 0x162   : > { %v1114_v61 = vpop.permute.xlu1 %1113  ;;  %v1105_v54 = vpop.permute.xlu0 %1104  ;;  %v1360_v35 = vsub.f32 %v1056_v9, %v4808_v36  ;;  %v1083_v30 = vrot.slane %v1078_v63, %v4305_v58  ;;  %v1522_v0 = vadd.f32 %v1521_v11, %v4543_v43  ;;  %v1756_v31 = vmul.f32 %v4479_v1, %v4741_v62 }
 0x163   : > { %v1074_v21 = vrot.slane %v4791_v42, %v4305_v58  ;;  %v1101_v12 = vrot.slane %v1096_v29, %v4305_v58  ;;  %v4862_v57 = vrot.slane %v1753_v17, %v4305_v58  ;;  %v4865_v45 = vrot.slane %v1752_v23, %v4305_v58 }
 0x164   : > { %v4868_v9 = vrot.slane %v1755_v40, %v4305_v58  ;;  %v1430_v63 = vmul.f32 %v1358_v25, %v1358_v25  ;;  %v4871_v43 = vrot.slane %v1754_v8, %v4305_v58  ;;  %v4874_v62 = vrot.slane %v1757_v16, %v4305_v58 }
 0x165   : > { %6501 = vst [vmem:[#allocation54_spill] sm:$0xff] %v4862_v57  ;;  %6502 = vst [vmem:[#allocation55_spill] sm:$0xff] %v4865_v45  ;;  %v1759_v42 = vmul.f32 %v4479_v1, %v1359_v28  ;;  %v1433_v11 = vmul.f32 %v1361_v6, %v1361_v6  ;;  %v1489_v17 = vsel %vm1462_vm0, %v1431_v52, 0.0  ;;  %v1432_v5 = vmul.f32 %v1360_v35, %v1360_v35 }
 0x166   : > { %6503 = vst [vmem:[#allocation56_spill] sm:$0xff] %v4868_v9  ;;  %6504 = vst [vmem:[#allocation57_spill] sm:$0xff] %v4871_v43  ;;  %v1132_v29 = vpop.permute.xlu1 %1131  ;;  %v1123_v34 = vpop.permute.xlu0 %1122  ;;  %v1363_v23 = vsub.f32 %v1083_v30, %v4808_v36  ;;  %v1092_v40 = vrot.slane %v1087_v41, %v4305_v58  ;;  %v4881_v9 = vrot.slane %v1756_v31, %v4305_v58  ;;  %v1472_v28 = vsel %vm1462_vm0, %v1430_v63, 0.0 }
 0x167   : > { %6505 = vst [vmem:[#allocation58_spill] sm:$0xff] %v4874_v62  ;;  %v1758_v8 = vmul.f32 %v4479_v1, %v1358_v25  ;;  %v1362_v16 = vsub.f32 %v1074_v21, %v4808_v36  ;;  %v1365_v62 = vsub.f32 %v1101_v12, %v4808_v36  ;;  %v1761_v43 = vmul.f32 %v4479_v1, %v1361_v6  ;;  %v667_v21 = vld [vmem:[#allocation7 + $0x6] sm:$0x1] }
 0x168   : > { %6506 = vst [vmem:[#allocation59_spill] sm:$0xff] %v4881_v9  ;;  %v1119_v52 = vrot.slane %v1114_v61, %v4305_v58  ;;  %v1110_v45 = vrot.slane %v1105_v54, %v4305_v58  ;;  %v4890_v30 = vadd.f32 %v1489_v17, %v1488_v49  ;;  %v4893_v41 = vrot.slane %v1759_v42, %v4305_v58 }
 0x169   : > { %v1523_v31 = vsel %vm1462_vm0, %v1433_v11, 0.0  ;;  %v1760_v25 = vmul.f32 %v4479_v1, %v1360_v35  ;;  %v1506_v63 = vsel %vm1462_vm0, %v1432_v5, 0.0  ;;  %v1435_v60 = vmul.f32 %v1363_v23, %v1363_v23 }
 0x16a   : > { %v1150_v9 = vpop.permute.xlu1 %1149  ;;  %v1141_v12 = vpop.permute.xlu0 %1140  ;;  %v1763_v6 = vmul.f32 %v4479_v1, %v1363_v23  ;;  %v1364_v61 = vsub.f32 %v1092_v40, %v4808_v36  ;;  %v1473_v54 = vadd.f32 %v1472_v28, %v1471_v32  ;;  %v4901_v49 = vrot.slane %v1758_v8, %v4305_v58 }
 0x16b   : > { %v1434_v42 = vmul.f32 %v1362_v16, %v1362_v16  ;;  %v1437_v17 = vmul.f32 %v1365_v62, %v1365_v62  ;;  %v4904_v11 = vrot.slane %v1761_v43, %v4305_v58  ;;  %v1367_v35 = vsub.f32 %v1119_v52, %v667_v21 }
 0x16c   : > { %v1366_v57 = vsub.f32 %v1110_v45, %v667_v21  ;;  %v1137_v50 = vrot.slane %v1132_v29, %v4305_v58  ;;  %v4907_v59 = vadd.f32 %v1523_v31, %v1522_v0  ;;  %v4910_v5 = vadd.f32 %v1506_v63, %v4700_v55 }
 0x16d   : > { %6507 = vst [vmem:[#allocation60_spill] sm:$0xff] %v4904_v11  ;;  %v1762_v36 = vmul.f32 %v4479_v1, %v1362_v16  ;;  %v1128_v32 = vrot.slane %v1123_v34, %v4305_v58  ;;  %v4915_v8 = vrot.slane %v1760_v25, %v4305_v58  ;;  %v1557_v43 = vsel %vm1462_vm0, %v1435_v60, 0.0 }
 0x16e   : > { %v1168_v23 = vpop.permute.xlu1 %1167  ;;  %v1159_v40 = vpop.permute.xlu0 %1158  ;;  %v4919_v45 = vrot.slane %v1763_v6, %v4305_v58  ;;  %v1436_v29 = vmul.f32 %v1364_v61, %v1364_v61  ;;  %v1540_v0 = vsel %vm1462_vm0, %v1434_v42, 0.0  ;;  %v1591_v55 = vsel %vm1462_vm0, %v1437_v17, 0.0 }
 0x16f   : > { %6508 = vst [vmem:[#allocation61_spill] sm:$0xff] %v4915_v8  ;;  %v1765_v28 = vmul.f32 %v4479_v1, %v1365_v62  ;;  %v1764_v16 = vmul.f32 %v4479_v1, %v1364_v61  ;;  %v1439_v34 = vmul.f32 %v1367_v35, %v1367_v35  ;;  %v1438_v52 = vmul.f32 %v1366_v57, %v1366_v57 }
 0x170   : > { %6509 = vst [vmem:[#allocation62_spill] sm:$0xff] %v4919_v45  ;;  %v1369_v31 = vsub.f32 %v1137_v50, %v667_v21  ;;  %v1155_v25 = vrot.slane %v1150_v9, %v4305_v58  ;;  %v4927_v63 = vadd.f32 %v1557_v43, %v4724_v20  ;;  %v4930_v60 = vrot.slane %v1762_v36, %v4305_v58 }
 0x171   : > { %v1368_v6 = vsub.f32 %v1128_v32, %v667_v21  ;;  %v1146_v42 = vrot.slane %v1141_v12, %v4305_v58  ;;  %v4934_v62 = vadd.f32 %v1540_v0, %v4727_v37  ;;  %v1574_v61 = vsel %vm1462_vm0, %v1436_v29, 0.0 }
 0x172   : > { %6510 = vst [vmem:[#allocation63_spill] sm:$0xff] %v4930_v60  ;;  %v1186_v45 = vpop.permute.xlu1 %1185  ;;  %v1177_v17 = vpop.permute.xlu0 %1176  ;;  %v1173_v50 = vrot.slane %v1168_v23, %v4305_v58  ;;  %v1164_v9 = vrot.slane %v1159_v40, %v4305_v58  ;;  %v4940_v20 = vadd.f32 %v1591_v55, %v4772_v22  ;;  %v4943_v36 = vrot.slane %v1765_v28, %v4305_v58 }
 0x173   : > { %v4946_v32 = vrot.slane %v1764_v16, %v4305_v58  ;;  %v1767_v12 = vmul.f32 %v4479_v1, %v1367_v35  ;;  %v1491_v37 = vsel %vm1462_vm0, %v1439_v34, 0.0  ;;  %v1474_v43 = vsel %vm1462_vm0, %v1438_v52, 0.0 }
 0x174   : > { %6511 = vst [vmem:[#allocation64_spill] sm:$0xff] %v4943_v36  ;;  %v1441_v29 = vmul.f32 %v1369_v31, %v1369_v31  ;;  %v1371_v0 = vsub.f32 %v1155_v25, %v667_v21  ;;  %v1575_v23 = vadd.f32 %v1574_v61, %v4779_v24  ;;  %v1766_v40 = vmul.f32 %v4479_v1, %v1366_v57  ;;  %v4964_v57 = vld [vmem:[#allocation7 + $0x7] sm:$0x1] }
 0x175   : > { %6512 = vst [vmem:[#allocation65_spill] sm:$0xff] %v4946_v32  ;;  %v1440_v22 = vmul.f32 %v1368_v6, %v1368_v6  ;;  %v1370_v55 = vsub.f32 %v1146_v42, %v667_v21  ;;  %v1373_v36 = vsub.f32 %v1173_v50, %v667_v21  ;;  %v1372_v8 = vsub.f32 %v1164_v9, %v667_v21 }
 0x176   : > { %v1204_v60 = vpop.permute.xlu1 %1203  ;;  %v1195_v28 = vpop.permute.xlu0 %1194  ;;  %v1191_v16 = vrot.slane %v1186_v45, %v4305_v58  ;;  %v1182_v35 = vrot.slane %v1177_v17, %v4305_v58  ;;  %v4956_v34 = vadd.f32 %v1491_v37, %v4890_v30  ;;  %v4959_v52 = vrot.slane %v1767_v12, %v4305_v58 }
 0x177   : > { %v4961_v25 = vadd.f32 %v1474_v43, %v1473_v54  ;;  %v1769_v24 = vmul.f32 %v4479_v1, %v1369_v31  ;;  %v1525_v42 = vsel %vm1462_vm0, %v1441_v29, 0.0  ;;  %v1768_v21 = vmul.f32 %v4479_v1, %v1368_v6 }
 0x178   : > { %v1443_v61 = vmul.f32 %v1371_v0, %v1371_v0  ;;  %v1209_v45 = vrot.slane %v1204_v60, %v4305_v58  ;;  %v4970_v17 = vrot.slane %v1766_v40, %v4305_v58  ;;  %v1508_v30 = vsel %vm1462_vm0, %v1440_v22, 0.0 }
 0x179   : > { %v1442_v50 = vmul.f32 %v1370_v55, %v1370_v55  ;;  %v1200_v54 = vrot.slane %v1195_v28, %v4305_v58  ;;  %v1445_v31 = vmul.f32 %v1373_v36, %v1373_v36  ;;  %v1444_v37 = vmul.f32 %v1372_v8, %v1372_v8 }
 0x17a   : > { %v1222_v9 = vpop.permute.xlu1 %1221  ;;  %v1213_v12 = vpop.permute.xlu0 %1212  ;;  %v1375_v43 = vsub.f32 %v1191_v16, %v4964_v57  ;;  %v1374_v29 = vsub.f32 %v1182_v35, %v4964_v57  ;;  %v1526_v6 = vadd.f32 %v1525_v42, %v4907_v59  ;;  %v4978_v60 = vrot.slane %v1769_v24, %v4305_v58 }
 0x17b   : > { %v1771_v40 = vmul.f32 %v4479_v1, %v1371_v0  ;;  %v1770_v22 = vmul.f32 %v4479_v1, %v1370_v55  ;;  %v1509_v32 = vadd.f32 %v1508_v30, %v4910_v5  ;;  %v4984_v28 = vrot.slane %v1768_v21, %v4305_v58 }
 0x17c   : > { %6513 = vst [vmem:[#allocation66_spill] sm:$0xff] %v4978_v60  ;;  %v1559_v11 = vsel %vm1462_vm0, %v1443_v61, 0.0  ;;  %v1377_v16 = vsub.f32 %v1209_v45, %v4964_v57  ;;  %v1542_v35 = vsel %vm1462_vm0, %v1442_v50, 0.0  ;;  %v1773_v59 = vmul.f32 %v4479_v1, %v1373_v36 }
 0x17d   : > { %6514 = vst [vmem:[#allocation67_spill] sm:$0xff] %v4984_v28  ;;  %v1772_v24 = vmul.f32 %v4479_v1, %v1372_v8  ;;  %v1376_v42 = vsub.f32 %v1200_v54, %v4964_v57  ;;  %v1593_v5 = vsel %vm1462_vm0, %v1445_v31, 0.0  ;;  %v1576_v55 = vsel %vm1462_vm0, %v1444_v37, 0.0 }
 0x17e   : > { %v1240_v0 = vpop.permute.xlu1 %1239  ;;  %v4992_v60 = vpop.permute.xlu0 %1230  ;;  %v1447_v21 = vmul.f32 %v1375_v43, %v1375_v43  ;;  %v1446_v30 = vmul.f32 %v1374_v29, %v1374_v29  ;;  %v4997_v61 = vadd.f32 %v1559_v11, %v4927_v63  ;;  %v5000_v45 = vrot.slane %v1771_v40, %v4305_v58 }
 0x17f   : > { %v5003_v36 = vrot.slane %v1770_v22, %v4305_v58  ;;  %v1227_v8 = vrot.slane %v1222_v9, %v4305_v58  ;;  %v5007_v50 = vadd.f32 %v1542_v35, %v4934_v62  ;;  %v1775_v54 = vmul.f32 %v4479_v1, %v1375_v43  ;;  %v5025_v35 = vld [vmem:[#allocation7 + $0x8] sm:$0x1] }
 0x180   : > { %6515 = vst [vmem:[#allocation68_spill] sm:$0xff] %v5000_v45  ;;  %v1449_v31 = vmul.f32 %v1377_v16, %v1377_v16  ;;  %v1218_v37 = vrot.slane %v1213_v12, %v4305_v58  ;;  %v5012_v28 = vadd.f32 %v1593_v5, %v4940_v20  ;;  %v5015_v11 = vrot.slane %v1773_v59, %v4305_v58 }
 0x181   : > { %6516 = vst [vmem:[#allocation69_spill] sm:$0xff] %v5003_v36  ;;  %v5017_v63 = vadd.f32 %v1576_v55, %v1575_v23  ;;  %v1448_v40 = vmul.f32 %v1376_v42, %v1376_v42  ;;  %v5020_v9 = vrot.slane %v1772_v24, %v4305_v58  ;;  %v1493_v62 = vsel %vm1462_vm0, %v1447_v21, 0.0 }
 0x182   : > { %6517 = vst [vmem:[#allocation70_spill] sm:$0xff] %v5015_v11  ;;  %v1258_v22 = vpop.permute.xlu1 %1257  ;;  %v1249_v36 = vpop.permute.xlu0 %1248  ;;  %v1476_v43 = vsel %vm1462_vm0, %v1446_v30, 0.0  ;;  %v1774_v12 = vmul.f32 %v4479_v1, %v1374_v29  ;;  %v1777_v20 = vmul.f32 %v4479_v1, %v1377_v16  ;;  %v1379_v59 = vsub.f32 %v1227_v8, %v4964_v57 }
 0x183   : > { %6518 = vst [vmem:[#allocation71_spill] sm:$0xff] %v5020_v9  ;;  %v1263_v23 = vrot.slane %v1258_v22, %v4305_v58  ;;  %v1254_v5 = vrot.slane %v1249_v36, %v4305_v58  ;;  %v5032_v55 = vrot.slane %v1775_v54, %v4305_v58  ;;  %v1527_v24 = vsel %vm1462_vm0, %v1449_v31, 0.0 }
 0x184   : > { %v1776_v21 = vmul.f32 %v4479_v1, %v1376_v42  ;;  %v1378_v30 = vsub.f32 %v1218_v37, %v4964_v57  ;;  %v1494_v29 = vadd.f32 %v1493_v62, %v4956_v34  ;;  %v1510_v9 = vsel %vm1462_vm0, %v1448_v40, 0.0 }
 0x185   : > { %v5040_v16 = vsub.f32 %v1263_v23, %v5025_v35  ;;  %v5043_v8 = vsub.f32 %v1254_v5, %v5025_v35  ;;  %v1477_v54 = vadd.f32 %v1476_v43, %v4961_v25  ;;  %v5047_v22 = vrot.slane %v1774_v12, %v4305_v58 }
 0x186   : > { %v1276_v36 = vpop.permute.xlu1 %1275  ;;  %v1245_v42 = vrot.slane %v1240_v0, %v4305_v58  ;;  %v1267_v37 = vpop.permute.xlu0 %1266  ;;  %v1528_v34 = vadd.f32 %v1527_v24, %v1526_v6  ;;  %v5052_v40 = vrot.slane %v1777_v20, %v4305_v58  ;;  %v1451_v62 = vmul.f32 %v1379_v59, %v1379_v59 }
 0x187   : > { %v1281_v31 = vrot.slane %v1276_v36, %v4305_v58  ;;  %v1455_v23 = vmul.f32 %v5040_v16, %v5040_v16  ;;  %v1511_v5 = vadd.f32 %v1510_v9, %v1509_v32  ;;  %v5057_v11 = vrot.slane %v1776_v21, %v4305_v58 }
 0x188   : > { %6519 = vst [vmem:[#allocation72_spill] sm:$0xff] %v5052_v40  ;;  %v1450_v25 = vmul.f32 %v1378_v30, %v1378_v30  ;;  %v1454_v43 = vmul.f32 %v5043_v8, %v5043_v8  ;;  %v1236_v0 = vrot.slane %v4992_v60, %v4305_v58  ;;  %v1272_v20 = vrot.slane %v1267_v37, %v4305_v58 }
 0x189   : > { %6520 = vst [vmem:[#allocation73_spill] sm:$0xff] %v5057_v11  ;;  %v1495_v6 = vsel %vm1462_vm0, %v1455_v23, 0.0  ;;  %v5065_v12 = vsub.f32 %v1281_v31, %v5025_v35  ;;  %v1779_v32 = vmul.f32 %v4479_v1, %v1379_v59  ;;  %v1381_v9 = vsub.f32 %v1245_v42, %v4964_v57  ;;  %v6521_v23 = vld [vmem:[#allocation32_spill] sm:$0xff] }
 0x18a   : > { %v1294_v24 = vpop.permute.xlu1 %1293  ;;  %v1496_v21 = vadd.f32 %v1495_v6, %v1494_v29  ;;  %v1478_v36 = vsel %vm1462_vm0, %v1454_v43, 0.0  ;;  %v1285_v45 = vpop.permute.xlu0 %1284  ;;  %v1561_v11 = vsel %vm1462_vm0, %v1451_v62, 0.0  ;;  %v5075_v31 = vsub.f32 %v1272_v20, %v5025_v35 }
 0x18b   : > { %v1479_v40 = vadd.f32 %v1478_v36, %v1477_v54  ;;  %v1457_v60 = vmul.f32 %v5065_v12, %v5065_v12  ;;  %v1544_v37 = vsel %vm1462_vm0, %v1450_v25, 0.0  ;;  %v1299_v59 = vrot.slane %v1294_v24, %v4305_v58 }
 0x18c   : > { %v1602_v46 = vmul.f32 %v6521_v23, %v1496_v21  ;;  %v1290_v29 = vrot.slane %v1285_v45, %v4305_v58  ;;  %v1380_v42 = vsub.f32 %v1236_v0, %v4964_v57  ;;  %v1456_v62 = vmul.f32 %v5075_v31, %v5075_v31 }
 0x18d   : > { %v1601_v43 = vmul.f32 %v6521_v23, %v1479_v40  ;;  %v1529_v54 = vsel %vm1462_vm0, %v1457_v60, 0.0  ;;  %v1453_v20 = vmul.f32 %v1381_v9, %v1381_v9  ;;  %v5087_v25 = vsub.f32 %v1299_v59, %v5025_v35 }
 0x18e   : > { %v1312_v6 = vpop.permute.xlu1 %1311  ;;  %v1611_v36 = vmul.f32 1.442695, %v1602_v46  ;;  %v1530_v26 = vadd.f32 %v1529_v54, %v1528_v34  ;;  %v1512_v24 = vsel %vm1462_vm0, %v1456_v62, 0.0  ;;  %v5091_v45 = vsub.f32 %v1290_v29, %v5025_v35  ;;  %v1303_v27 = vpop.permute.xlu0 %1302 }
 0x18f   : > { %v1609_v21 = vmul.f32 1.442695, %v1601_v43  ;;  %v1317_v57 = vrot.slane %v1312_v6, %v4305_v58  ;;  %v1778_v40 = vmul.f32 %v4479_v1, %v1378_v30  ;;  %v1513_v60 = vadd.f32 %v1512_v24, %v1511_v5 }
 0x190   : > { %3819 = vpow2.f32 %v1611_v36  ;;  %v1604_v0 = vmul.f32 %v6521_v23, %v1530_v26  ;;  %v1452_v46 = vmul.f32 %v1380_v42, %v1380_v42  ;;  %v1459_v34 = vmul.f32 %v5087_v25, %v5087_v25 }
 0x191   : > { %3821 = vpow2.f32 %v1609_v21  ;;  %v1458_v59 = vmul.f32 %v5091_v45, %v5091_v45  ;;  %v1562_v29 = vadd.f32 %v1561_v11, %v4997_v61  ;;  %v1545_v43 = vadd.f32 %v1544_v37, %v5007_v50 }
 0x192   : > { %v1615_v54 = vmul.f32 1.442695, %v1604_v0  ;;  %v5103_v30 = vsub.f32 %v1317_v57, %v5025_v35  ;;  %v1595_v26 = vsel %vm1462_vm0, %v1453_v20, 0.0  ;;  %v1563_v5 = vsel %vm1462_vm0, %v1459_v34, 0.0 }
 0x193   : > { %v1546_v62 = vsel %vm1462_vm0, %v1458_v59, 0.0  ;;  %v1308_v6 = vrot.slane %v1303_v27, %v4305_v58  ;;  %v1603_v36 = vmul.f32 %v6521_v23, %v1513_v60  ;;  %v1564_v21 = vadd.f32 %v1563_v5, %v1562_v29 }
 0x194   : > { %3823 = vpow2.f32 %v1615_v54  ;;  %v1547_v24 = vadd.f32 %v1546_v62, %v1545_v43  ;;  %v5111_v61 = vrot.slane %v1779_v32, %v4305_v58  ;;  %v1578_v50 = vsel %vm1462_vm0, %v1452_v46, 0.0 }
 0x195   : > { %v1461_v11 = vmul.f32 %v5103_v30, %v5103_v30  ;;  %v5117_v37 = vsub.f32 %v1308_v6, %v5025_v35  ;;  %v1596_v20 = vadd.f32 %v1595_v26, %v5012_v28  ;;  %v1781_v27 = vmul.f32 %v4479_v1, %v1381_v9 }
 0x196   : > { %v1606_v57 = vmul.f32 %v6521_v23, %v1564_v21  ;;  %v1605_v32 = vmul.f32 %v6521_v23, %v1547_v24  ;;  %v1780_v0 = vmul.f32 %v4479_v1, %v1380_v42  ;;  %v1783_v28 = vmul.f32 %v4479_v1, %v5040_v16 }
 0x197   : > { %v1597_v35 = vsel %vm1462_vm0, %v1461_v11, 0.0  ;;  %v1460_v9 = vmul.f32 %v5117_v37, %v5117_v37  ;;  %v5137_v60 = vrot.slane %v1778_v40, %v4305_v58  ;;  %v1579_v42 = vadd.f32 %v1578_v50, %v5017_v63  ;;  %v6524_v50 = vld [vmem:[#allocation33_spill] sm:$0xff] }
 0x198   : > { %v1613_v46 = vmul.f32 1.442695, %v1603_v36  ;;  %v1598_v34 = vadd.f32 %v1597_v35, %v1596_v20  ;;  %v1782_v16 = vmul.f32 %v4479_v1, %v5043_v8  ;;  %v1785_v59 = vmul.f32 %v4479_v1, %v5065_v12 }
 0x199   : > { %v1619_v29 = vmul.f32 1.442695, %v1606_v57  ;;  %v1580_v40 = vsel %vm1462_vm0, %v1460_v9, 0.0  ;;  %v1784_v43 = vmul.f32 %v4479_v1, %v5075_v31  ;;  %v1617_v54 = vmul.f32 1.442695, %v1605_v32 }
 0x19a   : > { %v3820_v63 = vpop.eup %3819  ;;  %v1608_v26 = vmul.f32 %v6521_v23, %v1598_v34  ;;  %v1581_v5 = vadd.f32 %v1580_v40, %v1579_v42  ;;  %v5152_v6 = vrot.slane %v1781_v27, %v4305_v58  ;;  %v5155_v8 = vrot.slane %v1780_v0, %v4305_v58 }
 0x19b   : > { %v3822_v62 = vpop.eup %3821  ;;  %v1627_v12 = vmul.f32 %v3820_v63, %v4606_v47  ;;  %v5159_v36 = vrot.slane %v1783_v28, %v4305_v58  ;;  %3825 = vpow2.f32 %v1613_v46  ;;  %v5171_v20 = vrot.slane %v1782_v16, %v4305_v58 }
 0x19c   : > { %6522 = vst [vmem:[#allocation32_spill] sm:$0xff] %v5152_v6  ;;  %6523 = vst [vmem:[#allocation74_spill] sm:$0xff] %v5155_v8  ;;  %v1626_v21 = vmul.f32 %v3822_v62, %v4606_v47  ;;  %v1623_v31 = vmul.f32 1.442695, %v1608_v26  ;;  %v1607_v24 = vmul.f32 %v6521_v23, %v1581_v5  ;;  %v5174_v27 = vrot.slane %v1785_v59, %v4305_v58 }
 0x19d   : > { %v1636_v11 = vmul.f32 %v6524_v50, %v1627_v12  ;;  %1644 = vst.msk [vmem:[%s5166_s21 + $0x1] sm:$0x1] %vm1462_vm0, %v1627_v12  ;;  %3827 = vpow2.f32 %v1619_v29  ;;  %v5180_v32 = vrot.slane %v1784_v43, %v4305_v58  ;;  %v5189_v9 = vmul.f32 %v4479_v1, %v5087_v25 }
 0x19e   : > { %v3824_v57 = vpop.eup %3823  ;;  %v1635_v23 = vmul.f32 %v6524_v50, %v1626_v21  ;;  %1643 = vst.msk [vmem:[%s5166_s21] sm:$0x1] %vm1462_vm0, %v1626_v21  ;;  %3829 = vpow2.f32 %v1617_v54  ;;  %v1621_v0 = vmul.f32 1.442695, %v1607_v24  ;;  %v5203_v46 = vmul.f32 %v4479_v1, %v5091_v45 }
 0x19f   : > { %v1658_v28 = vrot.slane %v1636_v11, %v4305_v58  ;;  %v5185_v35 = vmul.f32 %v3824_v57, %v4606_v47  ;;  %3831 = vpow2.f32 %v1623_v31  ;;  %v5207_v25 = vmul.f32 %v4479_v1, %v5103_v30 }
 0x1a0   : > { %v5199_v42 = vrot.slane %v1635_v23, %v4305_v58  ;;  %3833 = vpow2.f32 %v1621_v0  ;;  %v6525_v34 = vsub.f32 %v4238_v14, %v4277_v38  ;;  %v6526_v59 = vsub.f32 %v4244_v18, %v4282_v39 }
 0x1a1   : > { %v1849_v40 = vsel %vm1793_vm1, %v1658_v28, 0.0  ;;  %v1865_v45 = vsel %vm1795_vm2, %v1658_v28, 0.0  ;;  %1646 = vst.msk [vmem:[%s5166_s21 + $0x3] sm:$0x1] %vm1462_vm0, %v5185_v35  ;;  %v1881_v30 = vsel %vm1797_vm3, %v1658_v28, 0.0  ;;  %v1897_v14 = vsel %vm1799_vm4, %v1658_v28, 0.0 }
 0x1a2   : > { %v1685_v16 = vmul.f32 %v1658_v28, %v6525_v34  ;;  %v1686_v29 = vmul.f32 %v1658_v28, %v6526_v59  ;;  %v1913_v63 = vsel %vm1801_vm5, %v1658_v28, 0.0  ;;  %v1929_v18 = vsel %vm1803_vm6, %v1658_v28, 0.0 }
 0x1a3   : > { %v1945_v43 = vsel %vm1805_vm8, %v1658_v28, 0.0  ;;  %v1961_v54 = vsel %vm1807_vm9, %v1658_v28, 0.0  ;;  %v1978_v26 = vsel %vm1810_vm10, %v1658_v28, 0.0 }
 0x1a4   : > { %1702 = vst.msk [vmem:[%s5196_s8 + $0x10] sm:$0xff] %vm1699_vm7, %v1685_v16  ;;  %v2425_v5 = vmul.f32 %v4643_v44, %v1685_v16  ;;  %v2426_v62 = vmul.f32 %v4643_v44, %v1686_v29  ;;  %v2441_v12 = vmul.f32 %v4661_v7, %v1685_v16  ;;  %v2442_v21 = vmul.f32 %v4661_v7, %v1686_v29 }
 0x1a5   : > { %1703 = vst.msk [vmem:[%s5196_s8 + $0x18] sm:$0x1] %vm1462_vm0, %v1686_v29  ;;  %v2457_v31 = vmul.f32 %v4713_v2, %v1685_v16  ;;  %v2458_v24 = vmul.f32 %v4713_v2, %v1686_v29  ;;  %v2473_v11 = vmul.f32 %v4794_v51, %v1685_v16  ;;  %v2474_v57 = vmul.f32 %v4794_v51, %v1686_v29  ;;  %v5249_v0 = vpop.eup %3825 }
 0x1a6   : > { %v2489_v23 = vmul.f32 %v4834_v48, %v1685_v16  ;;  %v2490_v28 = vmul.f32 %v4834_v48, %v1686_v29  ;;  %v2505_v44 = vmul.f32 %v4893_v41, %v1685_v16  ;;  %v2506_v34 = vmul.f32 %v4893_v41, %v1686_v29  ;;  %2714 = vst.msk [vmem:[%s5257_s16 + $0x18] sm:$0x1] %vm1462_vm0, %v2426_v62 }
 0x1a7   : > { %v2521_v7 = vmul.f32 %v4959_v52, %v1685_v16  ;;  %2730 = vst.msk [vmem:[%s5257_s16 + $0x98] sm:$0x1] %vm1462_vm0, %v2442_v21  ;;  %v5263_v2 = vpop.eup %3827  ;;  %v2522_v51 = vmul.f32 %v4959_v52, %v1686_v29  ;;  %v2537_v48 = vmul.f32 %v5032_v55, %v1685_v16  ;;  %v2538_v41 = vmul.f32 %v5032_v55, %v1686_v29 }
 0x1a8   : > { %v2553_v59 = vmul.f32 %v5159_v36, %v1685_v16  ;;  %2746 = vst.msk [vmem:[%s5257_s16 + $0x118] sm:$0x1] %vm1462_vm0, %v2458_v24  ;;  %2762 = vst.msk [vmem:[%s5257_s16 + $0x198] sm:$0x1] %vm1462_vm0, %v2474_v57  ;;  %v5273_v62 = vpop.eup %3829  ;;  %v2554_v21 = vmul.f32 %v5159_v36, %v1686_v29  ;;  %v2569_v8 = vadd.f32 %v2425_v5, %v1849_v40  ;;  %v1959_v5 = vsel %vm1807_vm9, %v5199_v42, 0.0 }
 0x1a9   : > { %v2585_v52 = vadd.f32 %v2441_v12, %v1865_v45  ;;  %v2601_v6 = vadd.f32 %v2457_v31, %v1881_v30  ;;  %2778 = vst.msk [vmem:[%s5257_s16 + $0x218] sm:$0x1] %vm1462_vm0, %v2490_v28  ;;  %2794 = vst.msk [vmem:[%s5257_s16 + $0x298] sm:$0x1] %vm1462_vm0, %v2506_v34  ;;  %v5280_v55 = vpop.eup %3831  ;;  %v2617_v16 = vadd.f32 %v2473_v11, %v1897_v14  ;;  %v1976_v12 = vsel %vm1810_vm10, %v5199_v42, 0.0 }
 0x1aa   : > { %v2633_v24 = vadd.f32 %v2489_v23, %v1913_v63  ;;  %v2649_v57 = vadd.f32 %v2505_v44, %v1929_v18  ;;  %v2665_v36 = vadd.f32 %v2521_v7, %v1945_v43  ;;  %2810 = vst.msk [vmem:[%s5257_s16 + $0x318] sm:$0x1] %vm1462_vm0, %v2522_v51  ;;  %2826 = vst.msk [vmem:[%s5257_s16 + $0x398] sm:$0x1] %vm1462_vm0, %v2538_v41  ;;  %v5288_v29 = vpop.eup %3833  ;;  %v1911_v43 = vsel %vm1801_vm5, %v5199_v42, 0.0 }
 0x1ab   : > { %2841 = vst.msk [vmem:[%s5257_s16 + $0x410] sm:$0xff] %vm1699_vm7, %v2553_v59  ;;  %v2681_v40 = vadd.f32 %v2537_v48, %v1961_v54  ;;  %v2698_v45 = vadd.f32 %v2554_v21, %v1978_v26  ;;  %2713 = vst.msk [vmem:[%s5257_s16 + $0x10] sm:$0xff] %vm1699_vm7, %v2569_v8  ;;  %v6527_v30 = vsub.f32 %v4240_v15, %v4277_v38  ;;  %v1863_v15 = vsel %vm1795_vm2, %v5199_v42, 0.0 }
 0x1ac   : > { %2729 = vst.msk [vmem:[%s5257_s16 + $0x90] sm:$0xff] %vm1699_vm7, %v2585_v52  ;;  %2745 = vst.msk [vmem:[%s5257_s16 + $0x110] sm:$0xff] %vm1699_vm7, %v2601_v6  ;;  %v6528_v63 = vsub.f32 %v4246_v19, %v4282_v39  ;;  %v1847_v6 = vsel %vm1793_vm1, %v5199_v42, 0.0  ;;  %v1879_v19 = vsel %vm1797_vm3, %v5199_v42, 0.0  ;;  %v1895_v8 = vsel %vm1799_vm4, %v5199_v42, 0.0 }
 0x1ad   : > { %v1683_v14 = vmul.f32 %v5199_v42, %v6527_v30  ;;  %2761 = vst.msk [vmem:[%s5257_s16 + $0x190] sm:$0xff] %vm1699_vm7, %v2617_v16  ;;  %2777 = vst.msk [vmem:[%s5257_s16 + $0x210] sm:$0xff] %vm1699_vm7, %v2633_v24  ;;  %v1927_v54 = vsel %vm1803_vm6, %v5199_v42, 0.0  ;;  %v1943_v26 = vsel %vm1805_vm8, %v5199_v42, 0.0  ;;  %v1631_v30 = vmul.f32 %v5263_v2, %v4606_v47 }
 0x1ae   : > { %v1684_v18 = vmul.f32 %v5199_v42, %v6528_v63  ;;  %2793 = vst.msk [vmem:[%s5257_s16 + $0x290] sm:$0xff] %vm1699_vm7, %v2649_v57  ;;  %2809 = vst.msk [vmem:[%s5257_s16 + $0x310] sm:$0xff] %vm1699_vm7, %v2665_v36  ;;  %v1633_v2 = vmul.f32 %v5280_v55, %v4606_v47 }
 0x1af   : > { %2825 = vst.msk [vmem:[%s5257_s16 + $0x390] sm:$0xff] %vm1699_vm7, %v2681_v40  ;;  %1700 = vst.msk [vmem:[%s5196_s8] sm:$0xff] %vm1699_vm7, %v1683_v14  ;;  %v2423_v31 = vmul.f32 %v4646_v56, %v1683_v14  ;;  %v2439_v23 = vmul.f32 %v4664_v33, %v1683_v14  ;;  %v2455_v44 = vmul.f32 %v4733_v3, %v1683_v14 }
 0x1b0   : > { %2842 = vst.msk [vmem:[%s5257_s16 + $0x418] sm:$0x1] %vm1462_vm0, %v2698_v45  ;;  %1701 = vst.msk [vmem:[%s5196_s8 + $0x8] sm:$0x1] %vm1462_vm0, %v1684_v18  ;;  %v2424_v11 = vmul.f32 %v4646_v56, %v1684_v18  ;;  %v2440_v28 = vmul.f32 %v4664_v33, %v1684_v18  ;;  %v2456_v34 = vmul.f32 %v4733_v3, %v1684_v18 }
 0x1b1   : > { %v2471_v7 = vmul.f32 %v4802_v13, %v1683_v14  ;;  %v2472_v51 = vmul.f32 %v4802_v13, %v1684_v18  ;;  %v2487_v42 = vmul.f32 %v4845_v4, %v1683_v14  ;;  %v2488_v56 = vmul.f32 %v4845_v4, %v1684_v18  ;;  %1648 = vst.msk [vmem:[%s5166_s21 + $0x5] sm:$0x1] %vm1462_vm0, %v1631_v30 }
 0x1b2   : > { %v2503_v48 = vmul.f32 %v4901_v49, %v1683_v14  ;;  %2712 = vst.msk [vmem:[%s5257_s16 + $0x8] sm:$0x1] %vm1462_vm0, %v2424_v11  ;;  %v2504_v33 = vmul.f32 %v4901_v49, %v1684_v18  ;;  %v2519_v3 = vmul.f32 %v4970_v17, %v1683_v14  ;;  %v2520_v41 = vmul.f32 %v4970_v17, %v1684_v18 }
 0x1b3   : > { %v2535_v13 = vmul.f32 %v5047_v22, %v1683_v14  ;;  %2728 = vst.msk [vmem:[%s5257_s16 + $0x88] sm:$0x1] %vm1462_vm0, %v2440_v28  ;;  %2744 = vst.msk [vmem:[%s5257_s16 + $0x108] sm:$0x1] %vm1462_vm0, %v2456_v34  ;;  %v2536_v4 = vmul.f32 %v5047_v22, %v1684_v18  ;;  %v2551_v59 = vmul.f32 %v5171_v20, %v1683_v14 }
 0x1b4   : > { %v2552_v21 = vmul.f32 %v5171_v20, %v1684_v18  ;;  %v2567_v49 = vadd.f32 %v2423_v31, %v1847_v6  ;;  %2760 = vst.msk [vmem:[%s5257_s16 + $0x188] sm:$0x1] %vm1462_vm0, %v2472_v51  ;;  %2776 = vst.msk [vmem:[%s5257_s16 + $0x208] sm:$0x1] %vm1462_vm0, %v2488_v56  ;;  %v2583_v17 = vadd.f32 %v2439_v23, %v1863_v15  ;;  %v6531_v15 = vld [vmem:[#allocation18_spill] sm:$0xff] }
 0x1b5   : > { %v2599_v22 = vadd.f32 %v2455_v44, %v1879_v19  ;;  %v2615_v52 = vadd.f32 %v2471_v7, %v1895_v8  ;;  %v2631_v16 = vadd.f32 %v2487_v42, %v1911_v43  ;;  %2792 = vst.msk [vmem:[%s5257_s16 + $0x288] sm:$0x1] %vm1462_vm0, %v2504_v33  ;;  %2808 = vst.msk [vmem:[%s5257_s16 + $0x308] sm:$0x1] %vm1462_vm0, %v2520_v41 }
 0x1b6   : > { %v2647_v20 = vadd.f32 %v2503_v48, %v1927_v54  ;;  %v2663_v24 = vadd.f32 %v2519_v3, %v1943_v26  ;;  %v2679_v57 = vadd.f32 %v2535_v13, %v1959_v5  ;;  %v2696_v36 = vadd.f32 %v2552_v21, %v1976_v12  ;;  %2711 = vst.msk [vmem:[%s5257_s16] sm:$0xff] %vm1699_vm7, %v2567_v49 }
 0x1b7   : > { %2824 = vst.msk [vmem:[%s5257_s16 + $0x388] sm:$0x1] %vm1462_vm0, %v2536_v4  ;;  %v1638_v40 = vmul.f32 %v6524_v50, %v5185_v35  ;;  %v1628_v45 = vmul.f32 %v5249_v0, %v4606_v47  ;;  %v1630_v14 = vmul.f32 %v5273_v62, %v4606_v47  ;;  %v5422_v35 = vrot.slane %v5189_v9, %v4305_v58 }
 0x1b8   : > { %2839 = vst.msk [vmem:[%s5257_s16 + $0x400] sm:$0xff] %vm1699_vm7, %v2551_v59  ;;  %2727 = vst.msk [vmem:[%s5257_s16 + $0x80] sm:$0xff] %vm1699_vm7, %v2583_v17  ;;  %v5426_v0 = vrot.slane %v5203_v46, %v4305_v58  ;;  %v1632_v62 = vmul.f32 %v5288_v29, %v4606_v47  ;;  %v5444_v9 = vrot.slane %v5207_v25, %v4305_v58  ;;  %v6529_v25 = vld [vmem:[#allocation19_spill] sm:$0xff] }
 0x1b9   : > { %2743 = vst.msk [vmem:[%s5257_s16 + $0x100] sm:$0xff] %vm1699_vm7, %v2599_v22  ;;  %2759 = vst.msk [vmem:[%s5257_s16 + $0x180] sm:$0xff] %vm1699_vm7, %v2615_v52  ;;  %v1666_v63 = vrot.slane %v1638_v40, %v4305_v58  ;;  %v5434_v18 = vmul.f32 %v6524_v50, %v1628_v45  ;;  %v5448_v47 = vmul.f32 %v4479_v1, %v5117_v37 }
 0x1ba   : > { %2775 = vst.msk [vmem:[%s5257_s16 + $0x200] sm:$0xff] %vm1699_vm7, %v2631_v16  ;;  %2791 = vst.msk [vmem:[%s5257_s16 + $0x280] sm:$0xff] %vm1699_vm7, %v2647_v20  ;;  %v5451_v46 = vmul.f32 %v6524_v50, %v1631_v30  ;;  %v5454_v55 = vmul.f32 %v6524_v50, %v1630_v14  ;;  %v5457_v29 = vmul.f32 %v6524_v50, %v1633_v2 }
 0x1bb   : > { %2807 = vst.msk [vmem:[%s5257_s16 + $0x300] sm:$0xff] %vm1699_vm7, %v2663_v24  ;;  %2823 = vst.msk [vmem:[%s5257_s16 + $0x380] sm:$0xff] %vm1699_vm7, %v2679_v57  ;;  %v5462_v6 = vmul.f32 %v6524_v50, %v1632_v62  ;;  %v6530_v1 = vsub.f32 %v6529_v25, %v4277_v38  ;;  %v6532_v19 = vsub.f32 %v6531_v15, %v4282_v39  ;;  %v1853_v43 = vsel %vm1793_vm1, %v1666_v63, 0.0 }
 0x1bc   : > { %2840 = vst.msk [vmem:[%s5257_s16 + $0x408] sm:$0x1] %vm1462_vm0, %v2696_v36  ;;  %1645 = vst.msk [vmem:[%s5166_s21 + $0x2] sm:$0x1] %vm1462_vm0, %v1628_v45  ;;  %v1869_v54 = vsel %vm1795_vm2, %v1666_v63, 0.0 }
 0x1bd   : > { %1647 = vst.msk [vmem:[%s5166_s21 + $0x4] sm:$0x1] %vm1462_vm0, %v1630_v14  ;;  %1650 = vst.msk [vmem:[%s5166_s21 + $0x7] sm:$0x1] %vm1462_vm0, %v1633_v2  ;;  %v1689_v37 = vmul.f32 %v1666_v63, %v6530_v1  ;;  %v1690_v8 = vmul.f32 %v1666_v63, %v6532_v19 }
 0x1be   : > { %1649 = vst.msk [vmem:[%s5166_s21 + $0x6] sm:$0x1] %vm1462_vm0, %v1632_v62  ;;  %s3882_s21 = scalar_lea.vmem %s3881_s19, 256 }
 0x1bf   : > { %p3884_p6 = scmp.lt.s32.totalorder %s3882_s21, %s3876_s14 }
 0x1c1   : > { %p3885_p7 = por %p3884_p6, %p3883_p2 }
 0x1c3   : > { %p3886_p8 = pnand %p3885_p7, %p3879_p1 }
 0x1c5   : > { %3889 = shalt.err (!%p3886_p8)
}
 0x1c6   : > { %s3890_s17 = scalar_lea.hbm %s5408_s20, 128  ;;  %s3894_s10 = scalar_lea.hbm %s6373_s5, 256 }
 0x1c7   : > { %p3891_p9 = scmp.ne.s32.totalorder %s5408_s20, %s3890_s17  ;;  %p3895_p4 = scmp.lt.u32.totalorder %s5408_s20, %s6373_s5 }
 0x1c8   : > { %p3896_p5 = scmp.lt.u32.totalorder %s3894_s10, %s3890_s17  ;;  %p3898_p13 = scmp.lt.u32.totalorder %s3890_s17, %s5408_s20 }
 0x1c9   : > { %p3892_p10 = pnand %p3891_p9, %p6533_p12 }
 0x1ca   : > { %p3897_p11 = por %p3896_p5, %p3895_p4 }
 0x1cb   : > { %p3893_p0 = pneg %p3892_p10 }
 0x1cc   : > { %p3899_p1 = por %p3898_p13, %p3897_p11 }
 0x1ce   : > { %p3900_p2 = pnand %p3899_p1, %p3893_p0 }
 0x1d0   : > { %3903 = shalt.err (!%p3900_p2)
}
 0x1d1   : > { %s3970_s14 = smov 16   ;;  %s3971_s19 = smov 1   ;;  %v1885_v50 = vsel %vm1797_vm3, %v1666_v63, 0.0  ;;  %v1901_v26 = vsel %vm1799_vm4, %v1666_v63, 0.0  ;;  %v1917_v5 = vsel %vm1801_vm5, %v1666_v63, 0.0  ;;  %v1933_v12 = vsel %vm1803_vm6, %v1666_v63, 0.0 }
 0x1d2   : > { %3742 = dma.vmem_to_hbm [thread:$0]  (%p6533_p12), %s5410_s23, 128, %s5408_s20, %s2856_s13, %s3970_s14, %s3970_s14, %s3971_s19   ;;  %v1949_v31 = vsel %vm1805_vm8, %v1666_v63, 0.0  ;;  %v1965_v11 = vsel %vm1807_vm9, %v1666_v63, 0.0  ;;  %v1982_v23 = vsel %vm1810_vm10, %v1666_v63, 0.0  ;;  %v6534_v28 = vld [vmem:[#allocation34_spill] sm:$0xff]  ;;  %v6535_v7 = vld [vmem:[#allocation40_spill] sm:$0xff]  ;;  %v2557_v40 = vmul.f32 %v5174_v27, %v1689_v37 }
 0x1d3   : > { %1706 = vst.msk [vmem:[%s5196_s8 + $0x30] sm:$0xff] %vm1699_vm7, %v1689_v37  ;;  %v2429_v44 = vmul.f32 %v6534_v28, %v1689_v37  ;;  %v2430_v34 = vmul.f32 %v6534_v28, %v1690_v8  ;;  %v2445_v51 = vmul.f32 %v6535_v7, %v1689_v37  ;;  %v2446_v42 = vmul.f32 %v6535_v7, %v1690_v8  ;;  %v6536_v56 = vld [vmem:[#allocation46_spill] sm:$0xff]  ;;  %v6537_v3 = vld [vmem:[#allocation31_spill] sm:$0xff]  ;;  %v6539_v49 = vld [vmem:[#allocation60_spill] sm:$0xff]  ;;  %s6055_s23 = scalar_lea.vmem (%p6533_p12), %s6375_s7, %s3726_s9 }
 0x1d4   : > { %1707 = vst.msk [vmem:[%s5196_s8 + $0x38] sm:$0x1] %vm1462_vm0, %v1690_v8  ;;  %v2461_v48 = vmul.f32 %v6536_v56, %v1689_v37  ;;  %v2462_v33 = vmul.f32 %v6536_v56, %v1690_v8  ;;  %v2477_v41 = vmul.f32 %v6537_v3, %v1689_v37  ;;  %v2478_v13 = vmul.f32 %v6537_v3, %v1690_v8  ;;  %v6538_v4 = vld [vmem:[#allocation54_spill] sm:$0xff]  ;;  %v6541_v24 = vld [vmem:[#allocation72_spill] sm:$0xff] }
 0x1d5   : > { %v2493_v59 = vmul.f32 %v6538_v4, %v1689_v37  ;;  %v2494_v21 = vmul.f32 %v6538_v4, %v1690_v8  ;;  %v2509_v17 = vmul.f32 %v6539_v49, %v1689_v37  ;;  %v2510_v22 = vmul.f32 %v6539_v49, %v1690_v8  ;;  %v6540_v52 = vld [vmem:[#allocation66_spill] sm:$0xff]  ;;  %2718 = vst.msk [vmem:[%s5257_s16 + $0x38] sm:$0x1] %vm1462_vm0, %v2430_v34  ;;  %v6546_v34 = vld [vmem:[#allocation35_spill] sm:$0xff] }
 0x1d6   : > { %v2525_v16 = vmul.f32 %v6540_v52, %v1689_v37  ;;  %2734 = vst.msk [vmem:[%s5257_s16 + $0xb8] sm:$0x1] %vm1462_vm0, %v2446_v42  ;;  %v2526_v20 = vmul.f32 %v6540_v52, %v1690_v8  ;;  %v2541_v57 = vmul.f32 %v6541_v24, %v1689_v37  ;;  %v2542_v36 = vmul.f32 %v6541_v24, %v1690_v8  ;;  %v6547_v42 = vld [vmem:[#allocation41_spill] sm:$0xff] }
 0x1d7   : > { %2750 = vst.msk [vmem:[%s5257_s16 + $0x138] sm:$0x1] %vm1462_vm0, %v2462_v33  ;;  %2766 = vst.msk [vmem:[%s5257_s16 + $0x1b8] sm:$0x1] %vm1462_vm0, %v2478_v13  ;;  %v2558_v45 = vmul.f32 %v5174_v27, %v1690_v8  ;;  %v2573_v30 = vadd.f32 %v2429_v44, %v1853_v43  ;;  %v2589_v14 = vadd.f32 %v2445_v51, %v1869_v54  ;;  %v6542_v54 = vld [vmem:[#allocation17_spill] sm:$0xff]  ;;  %v6548_v33 = vld [vmem:[#allocation47_spill] sm:$0xff] }
 0x1d8   : > { %v2605_v2 = vadd.f32 %v2461_v48, %v1885_v50  ;;  %2782 = vst.msk [vmem:[%s5257_s16 + $0x238] sm:$0x1] %vm1462_vm0, %v2494_v21  ;;  %2798 = vst.msk [vmem:[%s5257_s16 + $0x2b8] sm:$0x1] %vm1462_vm0, %v2510_v22  ;;  %v2621_v62 = vadd.f32 %v2477_v41, %v1901_v26  ;;  %v2637_v63 = vadd.f32 %v2493_v59, %v1917_v5  ;;  %v6544_v26 = vld [vmem:[#allocation16_spill] sm:$0xff]  ;;  %v6549_v13 = vld [vmem:[#allocation49_spill] sm:$0xff] }
 0x1d9   : > { %v2653_v25 = vadd.f32 %v2509_v17, %v1933_v12  ;;  %v2669_v1 = vadd.f32 %v2525_v16, %v1949_v31  ;;  %2814 = vst.msk [vmem:[%s5257_s16 + $0x338] sm:$0x1] %vm1462_vm0, %v2526_v20  ;;  %2830 = vst.msk [vmem:[%s5257_s16 + $0x3b8] sm:$0x1] %vm1462_vm0, %v2542_v36  ;;  %v2685_v27 = vadd.f32 %v2541_v57, %v1965_v11  ;;  %v6550_v21 = vld [vmem:[#allocation55_spill] sm:$0xff]  ;;  %v6551_v22 = vld [vmem:[#allocation61_spill] sm:$0xff] }
 0x1da   : > { %2845 = vst.msk [vmem:[%s5257_s16 + $0x430] sm:$0xff] %vm1699_vm7, %v2557_v40  ;;  %v2702_v37 = vadd.f32 %v2558_v45, %v1982_v23  ;;  %2717 = vst.msk [vmem:[%s5257_s16 + $0x30] sm:$0xff] %vm1699_vm7, %v2573_v30  ;;  %v1662_v15 = vrot.slane %v5434_v18, %v4305_v58  ;;  %v5564_v19 = vrot.slane %v5448_v47, %v4305_v58  ;;  %v6552_v20 = vld [vmem:[#allocation67_spill] sm:$0xff]  ;;  %v6553_v36 = vld [vmem:[#allocation73_spill] sm:$0xff] }
 0x1db   : > { %2733 = vst.msk [vmem:[%s5257_s16 + $0xb0] sm:$0xff] %vm1699_vm7, %v2589_v14  ;;  %2749 = vst.msk [vmem:[%s5257_s16 + $0x130] sm:$0xff] %vm1699_vm7, %v2605_v2  ;;  %v5576_v8 = vrot.slane %v5451_v46, %v4305_v58  ;;  %v5580_v18 = vrot.slane %v5454_v55, %v4305_v58  ;;  %v5584_v47 = vrot.slane %v5457_v29, %v4305_v58 }
 0x1dc   : > { %2765 = vst.msk [vmem:[%s5257_s16 + $0x1b0] sm:$0xff] %vm1699_vm7, %v2621_v62  ;;  %2781 = vst.msk [vmem:[%s5257_s16 + $0x230] sm:$0xff] %vm1699_vm7, %v2637_v63  ;;  %v5588_v43 = vrot.slane %v5462_v6, %v4305_v58  ;;  %v6543_v46 = vsub.f32 %v6542_v54, %v4277_v38  ;;  %v6545_v55 = vsub.f32 %v6544_v26, %v4282_v39  ;;  %v1851_v29 = vsel %vm1793_vm1, %v1662_v15, 0.0  ;;  %v6554_v54 = vld [vmem:[#allocation23_spill] sm:$0xff]  ;;  %v6556_v26 = vld [vmem:[#allocation22_spill] sm:$0xff] }
 0x1dd   : > { %2797 = vst.msk [vmem:[%s5257_s16 + $0x2b0] sm:$0xff] %vm1699_vm7, %v2653_v25  ;;  %2813 = vst.msk [vmem:[%s5257_s16 + $0x330] sm:$0xff] %vm1699_vm7, %v2669_v1  ;;  %v1867_v12 = vsel %vm1795_vm2, %v1662_v15, 0.0  ;;  %v1883_v58 = vsel %vm1797_vm3, %v1662_v15, 0.0  ;;  %v1899_v6 = vsel %vm1799_vm4, %v1662_v15, 0.0  ;;  %v1915_v31 = vsel %vm1801_vm5, %v1662_v15, 0.0 }
 0x1de   : > { %2829 = vst.msk [vmem:[%s5257_s16 + $0x3b0] sm:$0xff] %vm1699_vm7, %v2685_v27  ;;  %v1687_v50 = vmul.f32 %v1662_v15, %v6543_v46  ;;  %v1688_v5 = vmul.f32 %v1662_v15, %v6545_v55  ;;  %v1931_v11 = vsel %vm1803_vm6, %v1662_v15, 0.0  ;;  %v1947_v23 = vsel %vm1805_vm8, %v1662_v15, 0.0 }
 0x1df   : > { %2846 = vst.msk [vmem:[%s5257_s16 + $0x438] sm:$0x1] %vm1462_vm0, %v2702_v37  ;;  %v1963_v28 = vsel %vm1807_vm9, %v1662_v15, 0.0  ;;  %v1980_v44 = vsel %vm1810_vm10, %v1662_v15, 0.0  ;;  %v6555_v46 = vsub.f32 %v6554_v54, %v4277_v38  ;;  %v6557_v55 = vsub.f32 %v6556_v26, %v4282_v39 }
 0x1e0   : > { %1704 = vst.msk [vmem:[%s5196_s8 + $0x20] sm:$0xff] %vm1699_vm7, %v1687_v50  ;;  %v2427_v7 = vmul.f32 %v6546_v34, %v1687_v50  ;;  %v2428_v51 = vmul.f32 %v6546_v34, %v1688_v5  ;;  %v2443_v56 = vmul.f32 %v6547_v42, %v1687_v50  ;;  %v2444_v48 = vmul.f32 %v6547_v42, %v1688_v5  ;;  %v6558_v34 = vld [vmem:[#allocation36_spill] sm:$0xff]  ;;  %v6559_v42 = vld [vmem:[#allocation42_spill] sm:$0xff] }
 0x1e1   : > { %1705 = vst.msk [vmem:[%s5196_s8 + $0x28] sm:$0x1] %vm1462_vm0, %v1688_v5  ;;  %v2459_v3 = vmul.f32 %v6548_v33, %v1687_v50  ;;  %v2460_v41 = vmul.f32 %v6548_v33, %v1688_v5  ;;  %v2475_v4 = vmul.f32 %v6549_v13, %v1687_v50  ;;  %v2476_v59 = vmul.f32 %v6549_v13, %v1688_v5  ;;  %v6560_v33 = vld [vmem:[#allocation48_spill] sm:$0xff]  ;;  %v6561_v13 = vld [vmem:[#allocation50_spill] sm:$0xff] }
 0x1e2   : > { %v2491_v49 = vmul.f32 %v6550_v21, %v1687_v50  ;;  %v2492_v17 = vmul.f32 %v6550_v21, %v1688_v5  ;;  %v2507_v52 = vmul.f32 %v6551_v22, %v1687_v50  ;;  %v2508_v16 = vmul.f32 %v6551_v22, %v1688_v5  ;;  %2716 = vst.msk [vmem:[%s5257_s16 + $0x28] sm:$0x1] %vm1462_vm0, %v2428_v51 }
 0x1e3   : > { %v2523_v24 = vmul.f32 %v6552_v20, %v1687_v50  ;;  %2732 = vst.msk [vmem:[%s5257_s16 + $0xa8] sm:$0x1] %vm1462_vm0, %v2444_v48  ;;  %v2524_v57 = vmul.f32 %v6552_v20, %v1688_v5  ;;  %v2539_v40 = vmul.f32 %v6553_v36, %v1687_v50  ;;  %v2540_v45 = vmul.f32 %v6553_v36, %v1688_v5 }
 0x1e4   : > { %v2555_v30 = vmul.f32 %v5180_v32, %v1687_v50  ;;  %2748 = vst.msk [vmem:[%s5257_s16 + $0x128] sm:$0x1] %vm1462_vm0, %v2460_v41  ;;  %2764 = vst.msk [vmem:[%s5257_s16 + $0x1a8] sm:$0x1] %vm1462_vm0, %v2476_v59  ;;  %v2556_v14 = vmul.f32 %v5180_v32, %v1688_v5  ;;  %v2571_v2 = vadd.f32 %v2427_v7, %v1851_v29  ;;  %v1857_v29 = vsel %vm1793_vm1, %v5576_v8, 0.0 }
 0x1e5   : > { %v2587_v62 = vadd.f32 %v2443_v56, %v1867_v12  ;;  %v2603_v63 = vadd.f32 %v2459_v3, %v1883_v58  ;;  %2780 = vst.msk [vmem:[%s5257_s16 + $0x228] sm:$0x1] %vm1462_vm0, %v2492_v17  ;;  %2796 = vst.msk [vmem:[%s5257_s16 + $0x2a8] sm:$0x1] %vm1462_vm0, %v2508_v16  ;;  %v2619_v25 = vadd.f32 %v2475_v4, %v1899_v6  ;;  %v1873_v12 = vsel %vm1795_vm2, %v5576_v8, 0.0  ;;  %v6563_v17 = vld [vmem:[#allocation62_spill] sm:$0xff] }
 0x1e6   : > { %v2635_v1 = vadd.f32 %v2491_v49, %v1915_v31  ;;  %v2651_v27 = vadd.f32 %v2507_v52, %v1931_v11  ;;  %v2667_v37 = vadd.f32 %v2523_v24, %v1947_v23  ;;  %2812 = vst.msk [vmem:[%s5257_s16 + $0x328] sm:$0x1] %vm1462_vm0, %v2524_v57  ;;  %2828 = vst.msk [vmem:[%s5257_s16 + $0x3a8] sm:$0x1] %vm1462_vm0, %v2540_v45  ;;  %v1889_v58 = vsel %vm1797_vm3, %v5576_v8, 0.0  ;;  %v6564_v16 = vld [vmem:[#allocation68_spill] sm:$0xff] }
 0x1e7   : > { %2843 = vst.msk [vmem:[%s5257_s16 + $0x420] sm:$0xff] %vm1699_vm7, %v2555_v30  ;;  %v2683_v32 = vadd.f32 %v2539_v40, %v1963_v28  ;;  %v2700_v15 = vadd.f32 %v2556_v14, %v1980_v44  ;;  %2715 = vst.msk [vmem:[%s5257_s16 + $0x20] sm:$0xff] %vm1699_vm7, %v2571_v2  ;;  %v1693_v50 = vmul.f32 %v5576_v8, %v6555_v46  ;;  %v1905_v6 = vsel %vm1799_vm4, %v5576_v8, 0.0 }
 0x1e8   : > { %2731 = vst.msk [vmem:[%s5257_s16 + $0xa0] sm:$0xff] %vm1699_vm7, %v2587_v62  ;;  %2747 = vst.msk [vmem:[%s5257_s16 + $0x120] sm:$0xff] %vm1699_vm7, %v2603_v63  ;;  %v1694_v5 = vmul.f32 %v5576_v8, %v6557_v55  ;;  %v1921_v31 = vsel %vm1801_vm5, %v5576_v8, 0.0  ;;  %v1937_v11 = vsel %vm1803_vm6, %v5576_v8, 0.0  ;;  %v1953_v23 = vsel %vm1805_vm8, %v5576_v8, 0.0 }
 0x1e9   : > { %2763 = vst.msk [vmem:[%s5257_s16 + $0x1a0] sm:$0xff] %vm1699_vm7, %v2619_v25  ;;  %2779 = vst.msk [vmem:[%s5257_s16 + $0x220] sm:$0xff] %vm1699_vm7, %v2635_v1  ;;  %v1969_v28 = vsel %vm1807_vm9, %v5576_v8, 0.0  ;;  %v1986_v44 = vsel %vm1810_vm10, %v5576_v8, 0.0  ;;  %v2433_v7 = vmul.f32 %v6558_v34, %v1693_v50  ;;  %v2449_v56 = vmul.f32 %v6559_v42, %v1693_v50  ;;  %v6562_v8 = vld [vmem:[#allocation56_spill] sm:$0xff] }
 0x1ea   : > { %2795 = vst.msk [vmem:[%s5257_s16 + $0x2a0] sm:$0xff] %vm1699_vm7, %v2651_v27  ;;  %2811 = vst.msk [vmem:[%s5257_s16 + $0x320] sm:$0xff] %vm1699_vm7, %v2667_v37  ;;  %v2434_v51 = vmul.f32 %v6558_v34, %v1694_v5  ;;  %v2450_v48 = vmul.f32 %v6559_v42, %v1694_v5  ;;  %v2465_v3 = vmul.f32 %v6560_v33, %v1693_v50  ;;  %v6565_v27 = vld [vmem:[#allocation21_spill] sm:$0xff]  ;;  %v1871_v26 = vsel %vm1795_vm2, %v5580_v18, 0.0 }
 0x1eb   : > { %2827 = vst.msk [vmem:[%s5257_s16 + $0x3a0] sm:$0xff] %vm1699_vm7, %v2683_v32  ;;  %1710 = vst.msk [vmem:[%s5196_s8 + $0x50] sm:$0xff] %vm1699_vm7, %v1693_v50  ;;  %v2466_v41 = vmul.f32 %v6560_v33, %v1694_v5  ;;  %v2481_v4 = vmul.f32 %v6561_v13, %v1693_v50  ;;  %v2482_v59 = vmul.f32 %v6561_v13, %v1694_v5  ;;  %v1887_v55 = vsel %vm1797_vm3, %v5580_v18, 0.0 }
 0x1ec   : > { %2844 = vst.msk [vmem:[%s5257_s16 + $0x428] sm:$0x1] %vm1462_vm0, %v2700_v15  ;;  %1711 = vst.msk [vmem:[%s5196_s8 + $0x58] sm:$0x1] %vm1462_vm0, %v1694_v5  ;;  %v2497_v21 = vmul.f32 %v6562_v8, %v1693_v50  ;;  %v2498_v49 = vmul.f32 %v6562_v8, %v1694_v5  ;;  %v2513_v22 = vmul.f32 %v6563_v17, %v1693_v50  ;;  %v6567_v15 = vld [vmem:[#allocation20_spill] sm:$0xff] }
 0x1ed   : > { %2722 = vst.msk [vmem:[%s5257_s16 + $0x58] sm:$0x1] %vm1462_vm0, %v2434_v51  ;;  %v2514_v52 = vmul.f32 %v6563_v17, %v1694_v5  ;;  %v2529_v20 = vmul.f32 %v6564_v16, %v1693_v50  ;;  %v2530_v24 = vmul.f32 %v6564_v16, %v1694_v5  ;;  %v2545_v57 = vmul.f32 %v5111_v61, %v1693_v50  ;;  %v6571_v51 = vld [vmem:[#allocation28_spill] sm:$0xff] }
 0x1ee   : > { %2738 = vst.msk [vmem:[%s5257_s16 + $0xd8] sm:$0x1] %vm1462_vm0, %v2450_v48  ;;  %2754 = vst.msk [vmem:[%s5257_s16 + $0x158] sm:$0x1] %vm1462_vm0, %v2466_v41  ;;  %v2546_v36 = vmul.f32 %v5111_v61, %v1694_v5  ;;  %v2561_v40 = vmul.f32 %v5422_v35, %v1693_v50  ;;  %v2562_v45 = vmul.f32 %v5422_v35, %v1694_v5  ;;  %v1855_v50 = vsel %vm1793_vm1, %v5580_v18, 0.0  ;;  %v6572_v48 = vld [vmem:[#allocation51_spill] sm:$0xff] }
 0x1ef   : > { %v2577_v30 = vadd.f32 %v2433_v7, %v1857_v29  ;;  %2770 = vst.msk [vmem:[%s5257_s16 + $0x1d8] sm:$0x1] %vm1462_vm0, %v2482_v59  ;;  %2786 = vst.msk [vmem:[%s5257_s16 + $0x258] sm:$0x1] %vm1462_vm0, %v2498_v49  ;;  %v2593_v14 = vadd.f32 %v2449_v56, %v1873_v12  ;;  %v2609_v2 = vadd.f32 %v2465_v3, %v1889_v58  ;;  %v1903_v5 = vsel %vm1799_vm4, %v5580_v18, 0.0  ;;  %v6573_v41 = vld [vmem:[#allocation57_spill] sm:$0xff] }
 0x1f0   : > { %v2625_v62 = vadd.f32 %v2481_v4, %v1905_v6  ;;  %v2641_v61 = vadd.f32 %v2497_v21, %v1921_v31  ;;  %2802 = vst.msk [vmem:[%s5257_s16 + $0x2d8] sm:$0x1] %vm1462_vm0, %v2514_v52  ;;  %2818 = vst.msk [vmem:[%s5257_s16 + $0x358] sm:$0x1] %vm1462_vm0, %v2530_v24  ;;  %v2657_v35 = vadd.f32 %v2513_v22, %v1937_v11  ;;  %v1919_v29 = vsel %vm1801_vm5, %v5580_v18, 0.0  ;;  %v6569_v11 = vld [vmem:[#allocation37_spill] sm:$0xff] }
 0x1f1   : > { %v2673_v63 = vadd.f32 %v2529_v20, %v1953_v23  ;;  %v2689_v25 = vadd.f32 %v2545_v57, %v1969_v28  ;;  %v2706_v1 = vadd.f32 %v2562_v45, %v1986_v44  ;;  %2721 = vst.msk [vmem:[%s5257_s16 + $0x50] sm:$0xff] %vm1699_vm7, %v2577_v30  ;;  %2849 = vst.msk [vmem:[%s5257_s16 + $0x450] sm:$0xff] %vm1699_vm7, %v2561_v40  ;;  %v1935_v12 = vsel %vm1803_vm6, %v5580_v18, 0.0  ;;  %v6570_v44 = vld [vmem:[#allocation43_spill] sm:$0xff]  ;;  %v6575_v21 = vld [vmem:[#allocation69_spill] sm:$0xff] }
 0x1f2   : > { %2834 = vst.msk [vmem:[%s5257_s16 + $0x3d8] sm:$0x1] %vm1462_vm0, %v2546_v36  ;;  %v6566_v37 = vsub.f32 %v6565_v27, %v4277_v38  ;;  %v6568_v54 = vsub.f32 %v6567_v15, %v4282_v39  ;;  %v1951_v58 = vsel %vm1805_vm8, %v5580_v18, 0.0  ;;  %v1967_v6 = vsel %vm1807_vm9, %v5580_v18, 0.0  ;;  %v6574_v4 = vld [vmem:[#allocation63_spill] sm:$0xff] }
 0x1f3   : > { %2737 = vst.msk [vmem:[%s5257_s16 + $0xd0] sm:$0xff] %vm1699_vm7, %v2593_v14  ;;  %2753 = vst.msk [vmem:[%s5257_s16 + $0x150] sm:$0xff] %vm1699_vm7, %v2609_v2  ;;  %v1984_v31 = vsel %vm1810_vm10, %v5580_v18, 0.0  ;;  %v6576_v2 = vld [vmem:[#allocation27_spill] sm:$0xff]  ;;  %v1877_v27 = vsel %vm1795_vm2, %v5584_v47, 0.0  ;;  %v1925_v15 = vsel %vm1801_vm5, %v5584_v47, 0.0 }
 0x1f4   : > { %2769 = vst.msk [vmem:[%s5257_s16 + $0x1d0] sm:$0xff] %vm1699_vm7, %v2625_v62  ;;  %2785 = vst.msk [vmem:[%s5257_s16 + $0x250] sm:$0xff] %vm1699_vm7, %v2641_v61  ;;  %v1691_v32 = vmul.f32 %v5580_v18, %v6566_v37  ;;  %v1692_v46 = vmul.f32 %v5580_v18, %v6568_v54  ;;  %v6577_v62 = vsub.f32 %v6576_v2, %v4277_v38  ;;  %v1893_v37 = vsel %vm1797_vm3, %v5584_v47, 0.0 }
 0x1f5   : > { %2801 = vst.msk [vmem:[%s5257_s16 + $0x2d0] sm:$0xff] %vm1699_vm7, %v2657_v35  ;;  %2817 = vst.msk [vmem:[%s5257_s16 + $0x350] sm:$0xff] %vm1699_vm7, %v2673_v63  ;;  %v6578_v35 = vld [vmem:[#allocation26_spill] sm:$0xff]  ;;  %v1941_v54 = vsel %vm1803_vm6, %v5584_v47, 0.0  ;;  %v1923_v2 = vsel %vm1801_vm5, %v5588_v43, 0.0 }
 0x1f6   : > { %2833 = vst.msk [vmem:[%s5257_s16 + $0x3d0] sm:$0xff] %vm1699_vm7, %v2689_v25  ;;  %1708 = vst.msk [vmem:[%s5196_s8 + $0x40] sm:$0xff] %vm1699_vm7, %v1691_v32  ;;  %v2431_v23 = vmul.f32 %v6569_v11, %v1691_v32  ;;  %v2432_v28 = vmul.f32 %v6569_v11, %v1692_v46  ;;  %v2447_v34 = vmul.f32 %v6570_v44, %v1691_v32 }
 0x1f7   : > { %2850 = vst.msk [vmem:[%s5257_s16 + $0x458] sm:$0x1] %vm1462_vm0, %v2706_v1  ;;  %1709 = vst.msk [vmem:[%s5196_s8 + $0x48] sm:$0x1] %vm1462_vm0, %v1692_v46  ;;  %v2448_v7 = vmul.f32 %v6570_v44, %v1692_v46  ;;  %v2463_v42 = vmul.f32 %v6571_v51, %v1691_v32  ;;  %v2464_v56 = vmul.f32 %v6571_v51, %v1692_v46  ;;  %v1861_v1 = vsel %vm1793_vm1, %v5584_v47, 0.0 }
 0x1f8   : > { %v2479_v33 = vmul.f32 %v6572_v48, %v1691_v32  ;;  %v2480_v3 = vmul.f32 %v6572_v48, %v1692_v46  ;;  %v2495_v18 = vmul.f32 %v6573_v41, %v1691_v32  ;;  %v2496_v13 = vmul.f32 %v6573_v41, %v1692_v46  ;;  %2720 = vst.msk [vmem:[%s5257_s16 + $0x48] sm:$0x1] %vm1462_vm0, %v2432_v28  ;;  %v6583_v28 = vld [vmem:[#allocation52_spill] sm:$0xff] }
 0x1f9   : > { %v2511_v59 = vmul.f32 %v6574_v4, %v1691_v32  ;;  %v2512_v8 = vmul.f32 %v6574_v4, %v1692_v46  ;;  %v2527_v49 = vmul.f32 %v6575_v21, %v1691_v32  ;;  %2736 = vst.msk [vmem:[%s5257_s16 + $0xc8] sm:$0x1] %vm1462_vm0, %v2448_v7  ;;  %v2528_v17 = vmul.f32 %v6575_v21, %v1692_v46 }
 0x1fa   : > { %v2543_v22 = vmul.f32 %v5137_v60, %v1691_v32  ;;  %v2544_v52 = vmul.f32 %v5137_v60, %v1692_v46  ;;  %v2559_v16 = vmul.f32 %v5426_v0, %v1691_v32  ;;  %2752 = vst.msk [vmem:[%s5257_s16 + $0x148] sm:$0x1] %vm1462_vm0, %v2464_v56  ;;  %2768 = vst.msk [vmem:[%s5257_s16 + $0x1c8] sm:$0x1] %vm1462_vm0, %v2480_v3  ;;  %v1909_v32 = vsel %vm1799_vm4, %v5584_v47, 0.0 }
 0x1fb   : > { %v2560_v20 = vmul.f32 %v5426_v0, %v1692_v46  ;;  %v2575_v24 = vadd.f32 %v2431_v23, %v1855_v50  ;;  %v2591_v57 = vadd.f32 %v2447_v34, %v1871_v26  ;;  %v2607_v36 = vadd.f32 %v2463_v42, %v1887_v55  ;;  %2784 = vst.msk [vmem:[%s5257_s16 + $0x248] sm:$0x1] %vm1462_vm0, %v2496_v13  ;;  %v6580_v55 = vld [vmem:[#allocation38_spill] sm:$0xff]  ;;  %v6585_v42 = vld [vmem:[#allocation64_spill] sm:$0xff] }
 0x1fc   : > { %2800 = vst.msk [vmem:[%s5257_s16 + $0x2c8] sm:$0x1] %vm1462_vm0, %v2512_v8  ;;  %v2623_v60 = vadd.f32 %v2479_v33, %v1903_v5  ;;  %v2639_v40 = vadd.f32 %v2495_v18, %v1919_v29  ;;  %v2655_v45 = vadd.f32 %v2511_v59, %v1935_v12  ;;  %v2671_v30 = vadd.f32 %v2527_v49, %v1951_v58  ;;  %v6581_v12 = vld [vmem:[#allocation44_spill] sm:$0xff]  ;;  %v6586_v33 = vld [vmem:[#allocation70_spill] sm:$0xff] }
 0x1fd   : > { %2816 = vst.msk [vmem:[%s5257_s16 + $0x348] sm:$0x1] %vm1462_vm0, %v2528_v17  ;;  %2832 = vst.msk [vmem:[%s5257_s16 + $0x3c8] sm:$0x1] %vm1462_vm0, %v2544_v52  ;;  %v2687_v0 = vadd.f32 %v2543_v22, %v1967_v6  ;;  %v2704_v14 = vadd.f32 %v2560_v20, %v1984_v31  ;;  %v1697_v61 = vmul.f32 %v5584_v47, %v6577_v62  ;;  %v1957_v46 = vsel %vm1805_vm8, %v5584_v47, 0.0  ;;  %v6582_v31 = vld [vmem:[#allocation29_spill] sm:$0xff] }
 0x1fe   : > { %2847 = vst.msk [vmem:[%s5257_s16 + $0x440] sm:$0xff] %vm1699_vm7, %v2559_v16  ;;  %2719 = vst.msk [vmem:[%s5257_s16 + $0x40] sm:$0xff] %vm1699_vm7, %v2575_v24  ;;  %v6579_v63 = vsub.f32 %v6578_v35, %v4282_v39  ;;  %v1973_v50 = vsel %vm1807_vm9, %v5584_v47, 0.0  ;;  %v1990_v26 = vsel %vm1810_vm10, %v5584_v47, 0.0  ;;  %v6587_v18 = vld [vmem:[#allocation32_spill] sm:$0xff]  ;;  %v1939_v62 = vsel %vm1803_vm6, %v5588_v43, 0.0 }
 0x1ff   : > { %2735 = vst.msk [vmem:[%s5257_s16 + $0xc0] sm:$0xff] %vm1699_vm7, %v2591_v57  ;;  %2751 = vst.msk [vmem:[%s5257_s16 + $0x140] sm:$0xff] %vm1699_vm7, %v2607_v36  ;;  %v2437_v5 = vmul.f32 %v6580_v55, %v1697_v61  ;;  %v2453_v58 = vmul.f32 %v6581_v12, %v1697_v61  ;;  %v2469_v11 = vmul.f32 %v6582_v31, %v1697_v61  ;;  %v6588_v57 = vld [vmem:[#allocation25_spill] sm:$0xff]  ;;  %v1971_v35 = vsel %vm1807_vm9, %v5588_v43, 0.0 }
 0x200   : > { %v1698_v25 = vmul.f32 %v5584_v47, %v6579_v63  ;;  %2767 = vst.msk [vmem:[%s5257_s16 + $0x1c0] sm:$0xff] %vm1699_vm7, %v2623_v60  ;;  %2783 = vst.msk [vmem:[%s5257_s16 + $0x240] sm:$0xff] %vm1699_vm7, %v2639_v40  ;;  %v2485_v44 = vmul.f32 %v6583_v28, %v1697_v61  ;;  %v6584_v47 = vld [vmem:[#allocation58_spill] sm:$0xff]  ;;  %v2517_v56 = vmul.f32 %v6585_v42, %v1697_v61  ;;  %v6590_v40 = vld [vmem:[#allocation24_spill] sm:$0xff]  ;;  %v1988_v63 = vsel %vm1810_vm10, %v5588_v43, 0.0 }
 0x201   : > { %2799 = vst.msk [vmem:[%s5257_s16 + $0x2c0] sm:$0xff] %vm1699_vm7, %v2655_v45  ;;  %2815 = vst.msk [vmem:[%s5257_s16 + $0x340] sm:$0xff] %vm1699_vm7, %v2671_v30  ;;  %v2501_v7 = vmul.f32 %v6584_v47, %v1697_v61  ;;  %v2533_v3 = vmul.f32 %v6586_v33, %v1697_v61  ;;  %v2549_v13 = vmul.f32 %v6587_v18, %v1697_v61 }
 0x202   : > { %2831 = vst.msk [vmem:[%s5257_s16 + $0x3c0] sm:$0xff] %vm1699_vm7, %v2687_v0  ;;  %1714 = vst.msk [vmem:[%s5196_s8 + $0x70] sm:$0xff] %vm1699_vm7, %v1697_v61  ;;  %v2438_v29 = vmul.f32 %v6580_v55, %v1698_v25  ;;  %v2454_v6 = vmul.f32 %v6581_v12, %v1698_v25  ;;  %v2470_v23 = vmul.f32 %v6582_v31, %v1698_v25  ;;  %v1859_v0 = vsel %vm1793_vm1, %v5588_v43, 0.0  ;;  %v6596_v55 = vld [vmem:[#allocation59_spill] sm:$0xff] }
 0x203   : > { %2848 = vst.msk [vmem:[%s5257_s16 + $0x448] sm:$0x1] %vm1462_vm0, %v2704_v14  ;;  %1715 = vst.msk [vmem:[%s5196_s8 + $0x78] sm:$0x1] %vm1462_vm0, %v1698_v25  ;;  %v2486_v34 = vmul.f32 %v6583_v28, %v1698_v25  ;;  %v2502_v51 = vmul.f32 %v6584_v47, %v1698_v25  ;;  %v2518_v48 = vmul.f32 %v6585_v42, %v1698_v25  ;;  %v1875_v14 = vsel %vm1795_vm2, %v5588_v43, 0.0 }
 0x204   : > { %2726 = vst.msk [vmem:[%s5257_s16 + $0x78] sm:$0x1] %vm1462_vm0, %v2438_v29  ;;  %v2534_v41 = vmul.f32 %v6586_v33, %v1698_v25  ;;  %2742 = vst.msk [vmem:[%s5257_s16 + $0xf8] sm:$0x1] %vm1462_vm0, %v2454_v6  ;;  %v2550_v4 = vmul.f32 %v6587_v18, %v1698_v25  ;;  %v2565_v59 = vmul.f32 %v5444_v9, %v1697_v61  ;;  %v1955_v61 = vsel %vm1805_vm8, %v5588_v43, 0.0  ;;  %v6597_v29 = vld [vmem:[#allocation65_spill] sm:$0xff] }
 0x205   : > { %2758 = vst.msk [vmem:[%s5257_s16 + $0x178] sm:$0x1] %vm1462_vm0, %v2470_v23  ;;  %v2566_v8 = vmul.f32 %v5444_v9, %v1698_v25  ;;  %v2581_v21 = vadd.f32 %v2437_v5, %v1861_v1  ;;  %2774 = vst.msk [vmem:[%s5257_s16 + $0x1f8] sm:$0x1] %vm1462_vm0, %v2486_v34  ;;  %v2597_v49 = vadd.f32 %v2453_v58, %v1877_v27  ;;  %v6592_v25 = vld [vmem:[#allocation39_spill] sm:$0xff]  ;;  %v6599_v23 = vld [vmem:[#allocation74_spill] sm:$0xff] }
 0x206   : > { %2790 = vst.msk [vmem:[%s5257_s16 + $0x278] sm:$0x1] %vm1462_vm0, %v2502_v51  ;;  %v2613_v17 = vadd.f32 %v2469_v11, %v1893_v37  ;;  %v2629_v22 = vadd.f32 %v2485_v44, %v1909_v32  ;;  %v2645_v52 = vadd.f32 %v2501_v7, %v1925_v15  ;;  %2806 = vst.msk [vmem:[%s5257_s16 + $0x2f8] sm:$0x1] %vm1462_vm0, %v2518_v48  ;;  %v6593_v37 = vld [vmem:[#allocation45_spill] sm:$0xff]  ;;  %v6598_v6 = vld [vmem:[#allocation71_spill] sm:$0xff] }
 0x207   : > { %2822 = vst.msk [vmem:[%s5257_s16 + $0x378] sm:$0x1] %vm1462_vm0, %v2534_v41  ;;  %v2661_v9 = vadd.f32 %v2517_v56, %v1941_v54  ;;  %v2677_v16 = vadd.f32 %v2533_v3, %v1957_v46  ;;  %v2693_v20 = vadd.f32 %v2549_v13, %v1973_v50  ;;  %v2710_v24 = vadd.f32 %v2566_v8, %v1990_v26  ;;  %v6594_v54 = vld [vmem:[#allocation30_spill] sm:$0xff]  ;;  %v6595_v50 = vld [vmem:[#allocation53_spill] sm:$0xff]  ;;  %v3215_v18 = vld [vmem:[%s5257_s16] sm:$0xff] (%p6533_p12) }
 0x208   : > { %2725 = vst.msk [vmem:[%s5257_s16 + $0x70] sm:$0xff] %vm1699_vm7, %v2581_v21  ;;  %2853 = vst.msk [vmem:[%s5257_s16 + $0x470] sm:$0xff] %vm1699_vm7, %v2565_v59  ;;  %v6589_v36 = vsub.f32 %v6588_v57, %v4277_v38  ;;  %v6591_v45 = vsub.f32 %v6590_v40, %v4282_v39  ;;  %v1891_v38 = vsel %vm1797_vm3, %v5588_v43, 0.0  ;;  %v1907_v39 = vsel %vm1799_vm4, %v5588_v43, 0.0  ;;  %v3217_v13 = vld [vmem:[%s5257_s16 + $0x8] sm:$0xff] (%p6533_p12)  ;;  %v3221_v59 = vld [vmem:[%s5257_s16 + $0x18] sm:$0xff] (%p6533_p12) }
 0x209   : > { %2838 = vst.msk [vmem:[%s5257_s16 + $0x3f8] sm:$0x1] %vm1462_vm0, %v2550_v4  ;;  %2854 = vst.msk [vmem:[%s5257_s16 + $0x478] sm:$0x1] %vm1462_vm0, %v2710_v24  ;;  %v3219_v4 = vld [vmem:[%s5257_s16 + $0x10] sm:$0xff] (%p6533_p12)  ;;  %v3223_v8 = vld [vmem:[%s5257_s16 + $0x20] sm:$0xff] (%p6533_p12) }
 0x20a   : > { %2741 = vst.msk [vmem:[%s5257_s16 + $0xf0] sm:$0xff] %vm1699_vm7, %v2597_v49  ;;  %2757 = vst.msk [vmem:[%s5257_s16 + $0x170] sm:$0xff] %vm1699_vm7, %v2613_v17  ;;  %v1695_v60 = vmul.f32 %v5588_v43, %v6589_v36  ;;  %v1696_v30 = vmul.f32 %v5588_v43, %v6591_v45  ;;  %v3225_v21 = vld [vmem:[%s5257_s16 + $0x28] sm:$0xff] (%p6533_p12)  ;;  %v3227_v49 = vld [vmem:[%s5257_s16 + $0x30] sm:$0xff] (%p6533_p12) }
 0x20b   : > { %2773 = vst.msk [vmem:[%s5257_s16 + $0x1f0] sm:$0xff] %vm1699_vm7, %v2629_v22  ;;  %2789 = vst.msk [vmem:[%s5257_s16 + $0x270] sm:$0xff] %vm1699_vm7, %v2645_v52  ;;  %v3229_v17 = vld [vmem:[%s5257_s16 + $0x38] sm:$0xff] (%p6533_p12)  ;;  %v3231_v22 = vld [vmem:[%s5257_s16 + $0x40] sm:$0xff] (%p6533_p12) }
 0x20c   : > { %2805 = vst.msk [vmem:[%s5257_s16 + $0x2f0] sm:$0xff] %vm1699_vm7, %v2661_v9  ;;  %2821 = vst.msk [vmem:[%s5257_s16 + $0x370] sm:$0xff] %vm1699_vm7, %v2677_v16  ;;  %v2435_v1 = vmul.f32 %v6592_v25, %v1695_v60  ;;  %v2436_v27 = vmul.f32 %v6592_v25, %v1696_v30  ;;  %v2451_v32 = vmul.f32 %v6593_v37, %v1695_v60  ;;  %v3233_v52 = vld [vmem:[%s5257_s16 + $0x48] sm:$0xff] (%p6533_p12)  ;;  %v3235_v9 = vld [vmem:[%s5257_s16 + $0x50] sm:$0xff] (%p6533_p12) }
 0x20d   : > { %2837 = vst.msk [vmem:[%s5257_s16 + $0x3f0] sm:$0xff] %vm1699_vm7, %v2693_v20  ;;  %1712 = vst.msk [vmem:[%s5196_s8 + $0x60] sm:$0xff] %vm1699_vm7, %v1695_v60  ;;  %v2452_v15 = vmul.f32 %v6593_v37, %v1696_v30  ;;  %v2467_v46 = vmul.f32 %v6594_v54, %v1695_v60  ;;  %v2468_v53 = vmul.f32 %v6594_v54, %v1696_v30  ;;  %v3237_v16 = vld [vmem:[%s5257_s16 + $0x58] sm:$0xff] (%p6533_p12)  ;;  %v3249_v40 = vld [vmem:[%s5257_s16 + $0x88] sm:$0xff] (%p6533_p12) }
 0x20e   : > { %1713 = vst.msk [vmem:[%s5196_s8 + $0x68] sm:$0x1] %vm1462_vm0, %v1696_v30  ;;  %v2483_v26 = vmul.f32 %v6595_v50, %v1695_v60  ;;  %v2484_v10 = vmul.f32 %v6595_v50, %v1696_v30  ;;  %v2499_v43 = vmul.f32 %v6596_v55, %v1695_v60  ;;  %v2500_v5 = vmul.f32 %v6596_v55, %v1696_v30  ;;  %v3245_v36 = vld [vmem:[%s5257_s16 + $0x78] sm:$0xff] (%p6533_p12)  ;;  %v3251_v45 = vld [vmem:[%s5257_s16 + $0x90] sm:$0xff] (%p6533_p12)  ;;  %v3279_v37 = vld [vmem:[%s5257_s16 + $0x100] sm:$0xff] (%p6533_p12) }
 0x20f   : > { %v2515_v12 = vmul.f32 %v6597_v29, %v1695_v60  ;;  %v2516_v58 = vmul.f32 %v6597_v29, %v1696_v30  ;;  %v2531_v31 = vmul.f32 %v6598_v6, %v1695_v60  ;;  %2724 = vst.msk [vmem:[%s5257_s16 + $0x68] sm:$0x1] %vm1462_vm0, %v2436_v27  ;;  %2740 = vst.msk [vmem:[%s5257_s16 + $0xe8] sm:$0x1] %vm1462_vm0, %v2452_v15  ;;  %v3243_v57 = vld [vmem:[%s5257_s16 + $0x70] sm:$0xff] (%p6533_p12)  ;;  %v3277_v27 = vld [vmem:[%s5257_s16 + $0xf8] sm:$0xff] (%p6533_p12) }
 0x210   : > { %v2532_v11 = vmul.f32 %v6598_v6, %v1696_v30  ;;  %v2547_v28 = vmul.f32 %v6599_v23, %v1695_v60  ;;  %v2548_v44 = vmul.f32 %v6599_v23, %v1696_v30  ;;  %v2563_v34 = vmul.f32 %v5564_v19, %v1695_v60  ;;  %2756 = vst.msk [vmem:[%s5257_s16 + $0x168] sm:$0x1] %vm1462_vm0, %v2468_v53  ;;  %v3247_v60 = vld [vmem:[%s5257_s16 + $0x80] sm:$0xff] (%p6533_p12)  ;;  %v3283_v15 = vld [vmem:[%s5257_s16 + $0x110] sm:$0xff] (%p6533_p12)  ;;  %v3285_v54 = vld [vmem:[%s5257_s16 + $0x118] sm:$0xff] (%p6533_p12) }
 0x211   : > { %2772 = vst.msk [vmem:[%s5257_s16 + $0x1e8] sm:$0x1] %vm1462_vm0, %v2484_v10  ;;  %v2564_v47 = vmul.f32 %v5564_v19, %v1696_v30  ;;  %v2579_v7 = vadd.f32 %v2435_v1, %v1859_v0  ;;  %v2595_v51 = vadd.f32 %v2451_v32, %v1875_v14  ;;  %v2611_v42 = vadd.f32 %v2467_v46, %v1891_v38  ;;  %v3253_v30 = vld [vmem:[%s5257_s16 + $0x98] sm:$0xff] (%p6533_p12)  ;;  %v3255_v0 = vld [vmem:[%s5257_s16 + $0xa0] sm:$0xff] (%p6533_p12)  ;;  %v3257_v14 = vld [vmem:[%s5257_s16 + $0xa8] sm:$0xff] (%p6533_p12) }
 0x212   : > { %2788 = vst.msk [vmem:[%s5257_s16 + $0x268] sm:$0x1] %vm1462_vm0, %v2500_v5  ;;  %2804 = vst.msk [vmem:[%s5257_s16 + $0x2e8] sm:$0x1] %vm1462_vm0, %v2516_v58  ;;  %v2627_v56 = vadd.f32 %v2483_v26, %v1907_v39  ;;  %v2643_v48 = vadd.f32 %v2499_v43, %v1923_v2  ;;  %v2659_v33 = vadd.f32 %v2515_v12, %v1939_v62  ;;  %v3259_v38 = vld [vmem:[%s5257_s16 + $0xb0] sm:$0xff] (%p6533_p12)  ;;  %v3261_v39 = vld [vmem:[%s5257_s16 + $0xb8] sm:$0xff] (%p6533_p12) }
 0x213   : > { %v2675_v3 = vadd.f32 %v2531_v31, %v1955_v61  ;;  %2820 = vst.msk [vmem:[%s5257_s16 + $0x368] sm:$0x1] %vm1462_vm0, %v2532_v11  ;;  %2836 = vst.msk [vmem:[%s5257_s16 + $0x3e8] sm:$0x1] %vm1462_vm0, %v2548_v44  ;;  %v2691_v19 = vadd.f32 %v2547_v28, %v1971_v35  ;;  %v2708_v41 = vadd.f32 %v2564_v47, %v1988_v63  ;;  %2896 = sbr.rel (!%p6533_p12) target bundleno = 609 (0x261), region = 98  ;;  %v3263_v2 = vld [vmem:[%s5257_s16 + $0xc0] sm:$0xff] (%p6533_p12) }
 0x214   : > { %2851 = vst.msk [vmem:[%s5257_s16 + $0x460] sm:$0xff] %vm1699_vm7, %v2563_v34  ;;  %2723 = vst.msk [vmem:[%s5257_s16 + $0x60] sm:$0xff] %vm1699_vm7, %v2579_v7  ;;  %v3265_v62 = vld [vmem:[%s5257_s16 + $0xc8] sm:$0xff] (%p6533_p12)  ;;  %v3267_v61 = vld [vmem:[%s5257_s16 + $0xd0] sm:$0xff] (%p6533_p12) }
 0x215   : > { %2739 = vst.msk [vmem:[%s5257_s16 + $0xe0] sm:$0xff] %vm1699_vm7, %v2595_v51  ;;  %2755 = vst.msk [vmem:[%s5257_s16 + $0x160] sm:$0xff] %vm1699_vm7, %v2611_v42  ;;  %v3269_v35 = vld [vmem:[%s5257_s16 + $0xd8] sm:$0xff] (%p6533_p12)  ;;  %v3275_v1 = vld [vmem:[%s5257_s16 + $0xf0] sm:$0xff] (%p6533_p12) }
 0x216   : > { %2771 = vst.msk [vmem:[%s5257_s16 + $0x1e0] sm:$0xff] %vm1699_vm7, %v2627_v56  ;;  %2787 = vst.msk [vmem:[%s5257_s16 + $0x260] sm:$0xff] %vm1699_vm7, %v2643_v48  ;;  %v3241_v24 = vld [vmem:[%s5257_s16 + $0x68] sm:$0xff] (%p6533_p12)  ;;  %v3287_v46 = vld [vmem:[%s5257_s16 + $0x120] sm:$0xff] (%p6533_p12) }
 0x217   : > { %2803 = vst.msk [vmem:[%s5257_s16 + $0x2e0] sm:$0xff] %vm1699_vm7, %v2659_v33  ;;  %2819 = vst.msk [vmem:[%s5257_s16 + $0x360] sm:$0xff] %vm1699_vm7, %v2675_v3  ;;  %v3273_v25 = vld [vmem:[%s5257_s16 + $0xe8] sm:$0xff] (%p6533_p12)  ;;  %v3291_v50 = vld [vmem:[%s5257_s16 + $0x130] sm:$0xff] (%p6533_p12) }
 0x218   : > { %2835 = vst.msk [vmem:[%s5257_s16 + $0x3e0] sm:$0xff] %vm1699_vm7, %v2691_v19  ;;  %3216 = vst [vmem:[%s6055_s23] sm:$0xff] (%p6533_p12), %v3215_v18  ;;  %v3281_v32 = vld [vmem:[%s5257_s16 + $0x108] sm:$0xff] (%p6533_p12)  ;;  %v3293_v26 = vld [vmem:[%s5257_s16 + $0x138] sm:$0xff] (%p6533_p12) }
 0x219   : > { %2852 = vst.msk [vmem:[%s5257_s16 + $0x468] sm:$0x1] %vm1462_vm0, %v2708_v41  ;;  %3218 = vst [vmem:[%s6055_s23 + $0x8] sm:$0xff] (%p6533_p12), %v3217_v13  ;;  %v3289_v53 = vld [vmem:[%s5257_s16 + $0x128] sm:$0xff] (%p6533_p12)  ;;  %v3295_v10 = vld [vmem:[%s5257_s16 + $0x140] sm:$0xff] (%p6533_p12) }
 0x21a   : > { %3220 = vst [vmem:[%s6055_s23 + $0x10] sm:$0xff] %v3219_v4  ;;  %3222 = vst [vmem:[%s6055_s23 + $0x18] sm:$0xff] %v3221_v59  ;;  %v3297_v55 = vld [vmem:[%s5257_s16 + $0x148] sm:$0xff]  ;;  %v3299_v43 = vld [vmem:[%s5257_s16 + $0x150] sm:$0xff] }
 0x21b   : > { %3224 = vst [vmem:[%s6055_s23 + $0x20] sm:$0xff] %v3223_v8  ;;  %3226 = vst [vmem:[%s6055_s23 + $0x28] sm:$0xff] %v3225_v21  ;;  %v3239_v20 = vld [vmem:[%s5257_s16 + $0x60] sm:$0xff]  ;;  %v3301_v5 = vld [vmem:[%s5257_s16 + $0x158] sm:$0xff] }
 0x21c   : > { %3228 = vst [vmem:[%s6055_s23 + $0x30] sm:$0xff] %v3227_v49  ;;  %3230 = vst [vmem:[%s6055_s23 + $0x38] sm:$0xff] %v3229_v17  ;;  %v3271_v63 = vld [vmem:[%s5257_s16 + $0xe0] sm:$0xff]  ;;  %v3305_v12 = vld [vmem:[%s5257_s16 + $0x168] sm:$0xff] }
 0x21d   : > { %3232 = vst [vmem:[%s6055_s23 + $0x40] sm:$0xff] %v3231_v22  ;;  %3234 = vst [vmem:[%s6055_s23 + $0x48] sm:$0xff] %v3233_v52  ;;  %v3303_v29 = vld [vmem:[%s5257_s16 + $0x160] sm:$0xff]  ;;  %v3307_v58 = vld [vmem:[%s5257_s16 + $0x170] sm:$0xff] }
 0x21e   : > { %3236 = vst [vmem:[%s6055_s23 + $0x50] sm:$0xff] %v3235_v9  ;;  %3238 = vst [vmem:[%s6055_s23 + $0x58] sm:$0xff] %v3237_v16  ;;  %v3309_v6 = vld [vmem:[%s5257_s16 + $0x178] sm:$0xff]  ;;  %v3311_v31 = vld [vmem:[%s5257_s16 + $0x180] sm:$0xff] }
 0x21f   : > { %3240 = vst [vmem:[%s6055_s23 + $0x60] sm:$0xff] %v3239_v20  ;;  %3242 = vst [vmem:[%s6055_s23 + $0x68] sm:$0xff] %v3241_v24  ;;  %v3313_v11 = vld [vmem:[%s5257_s16 + $0x188] sm:$0xff]  ;;  %v3315_v23 = vld [vmem:[%s5257_s16 + $0x190] sm:$0xff] }
 0x220   : > { %3244 = vst [vmem:[%s6055_s23 + $0x70] sm:$0xff] %v3243_v57  ;;  %3246 = vst [vmem:[%s6055_s23 + $0x78] sm:$0xff] %v3245_v36  ;;  %v3317_v28 = vld [vmem:[%s5257_s16 + $0x198] sm:$0xff]  ;;  %v3319_v44 = vld [vmem:[%s5257_s16 + $0x1a0] sm:$0xff] }
 0x221   : > { %3248 = vst [vmem:[%s6055_s23 + $0x100] sm:$0xff] %v3247_v60  ;;  %3250 = vst [vmem:[%s6055_s23 + $0x108] sm:$0xff] %v3249_v40  ;;  %v3321_v34 = vld [vmem:[%s5257_s16 + $0x1a8] sm:$0xff]  ;;  %v3323_v47 = vld [vmem:[%s5257_s16 + $0x1b0] sm:$0xff] }
 0x222   : > { %3252 = vst [vmem:[%s6055_s23 + $0x110] sm:$0xff] %v3251_v45  ;;  %3254 = vst [vmem:[%s6055_s23 + $0x118] sm:$0xff] %v3253_v30  ;;  %v3325_v7 = vld [vmem:[%s5257_s16 + $0x1b8] sm:$0xff]  ;;  %v3327_v51 = vld [vmem:[%s5257_s16 + $0x1c0] sm:$0xff] }
 0x223   : > { %3256 = vst [vmem:[%s6055_s23 + $0x120] sm:$0xff] %v3255_v0  ;;  %3258 = vst [vmem:[%s6055_s23 + $0x128] sm:$0xff] %v3257_v14  ;;  %v3329_v42 = vld [vmem:[%s5257_s16 + $0x1c8] sm:$0xff]  ;;  %v3331_v56 = vld [vmem:[%s5257_s16 + $0x1d0] sm:$0xff] }
 0x224   : > { %3260 = vst [vmem:[%s6055_s23 + $0x130] sm:$0xff] %v3259_v38  ;;  %3262 = vst [vmem:[%s6055_s23 + $0x138] sm:$0xff] %v3261_v39  ;;  %v3333_v48 = vld [vmem:[%s5257_s16 + $0x1d8] sm:$0xff]  ;;  %v3335_v33 = vld [vmem:[%s5257_s16 + $0x1e0] sm:$0xff] }
 0x225   : > { %3264 = vst [vmem:[%s6055_s23 + $0x140] sm:$0xff] %v3263_v2  ;;  %3266 = vst [vmem:[%s6055_s23 + $0x148] sm:$0xff] %v3265_v62  ;;  %v3337_v3 = vld [vmem:[%s5257_s16 + $0x1e8] sm:$0xff]  ;;  %v3339_v19 = vld [vmem:[%s5257_s16 + $0x1f0] sm:$0xff] }
 0x226   : > { %3268 = vst [vmem:[%s6055_s23 + $0x150] sm:$0xff] %v3267_v61  ;;  %3270 = vst [vmem:[%s6055_s23 + $0x158] sm:$0xff] %v3269_v35  ;;  %v3341_v41 = vld [vmem:[%s5257_s16 + $0x1f8] sm:$0xff]  ;;  %v3343_v18 = vld [vmem:[%s5257_s16 + $0x200] sm:$0xff] }
 0x227   : > { %3272 = vst [vmem:[%s6055_s23 + $0x160] sm:$0xff] %v3271_v63  ;;  %3274 = vst [vmem:[%s6055_s23 + $0x168] sm:$0xff] %v3273_v25  ;;  %v3345_v13 = vld [vmem:[%s5257_s16 + $0x208] sm:$0xff]  ;;  %v3347_v4 = vld [vmem:[%s5257_s16 + $0x210] sm:$0xff] }
 0x228   : > { %3276 = vst [vmem:[%s6055_s23 + $0x170] sm:$0xff] %v3275_v1  ;;  %3278 = vst [vmem:[%s6055_s23 + $0x178] sm:$0xff] %v3277_v27  ;;  %v3349_v59 = vld [vmem:[%s5257_s16 + $0x218] sm:$0xff]  ;;  %v3351_v8 = vld [vmem:[%s5257_s16 + $0x220] sm:$0xff] }
 0x229   : > { %3280 = vst [vmem:[%s6055_s23 + $0x200] sm:$0xff] %v3279_v37  ;;  %3282 = vst [vmem:[%s6055_s23 + $0x208] sm:$0xff] %v3281_v32  ;;  %v3353_v21 = vld [vmem:[%s5257_s16 + $0x228] sm:$0xff]  ;;  %v3355_v49 = vld [vmem:[%s5257_s16 + $0x230] sm:$0xff] }
 0x22a   : > { %3284 = vst [vmem:[%s6055_s23 + $0x210] sm:$0xff] %v3283_v15  ;;  %3286 = vst [vmem:[%s6055_s23 + $0x218] sm:$0xff] %v3285_v54  ;;  %v3357_v17 = vld [vmem:[%s5257_s16 + $0x238] sm:$0xff]  ;;  %v3359_v22 = vld [vmem:[%s5257_s16 + $0x240] sm:$0xff] }
 0x22b   : > { %3288 = vst [vmem:[%s6055_s23 + $0x220] sm:$0xff] %v3287_v46  ;;  %3290 = vst [vmem:[%s6055_s23 + $0x228] sm:$0xff] %v3289_v53  ;;  %v3361_v52 = vld [vmem:[%s5257_s16 + $0x248] sm:$0xff]  ;;  %v3363_v9 = vld [vmem:[%s5257_s16 + $0x250] sm:$0xff] }
 0x22c   : > { %3292 = vst [vmem:[%s6055_s23 + $0x230] sm:$0xff] %v3291_v50  ;;  %3294 = vst [vmem:[%s6055_s23 + $0x238] sm:$0xff] %v3293_v26  ;;  %v3365_v16 = vld [vmem:[%s5257_s16 + $0x258] sm:$0xff]  ;;  %v3367_v20 = vld [vmem:[%s5257_s16 + $0x260] sm:$0xff] }
 0x22d   : > { %3296 = vst [vmem:[%s6055_s23 + $0x240] sm:$0xff] %v3295_v10  ;;  %3298 = vst [vmem:[%s6055_s23 + $0x248] sm:$0xff] %v3297_v55  ;;  %v3369_v24 = vld [vmem:[%s5257_s16 + $0x268] sm:$0xff]  ;;  %v3371_v57 = vld [vmem:[%s5257_s16 + $0x270] sm:$0xff] }
 0x22e   : > { %3300 = vst [vmem:[%s6055_s23 + $0x250] sm:$0xff] %v3299_v43  ;;  %3302 = vst [vmem:[%s6055_s23 + $0x258] sm:$0xff] %v3301_v5  ;;  %v3373_v36 = vld [vmem:[%s5257_s16 + $0x278] sm:$0xff]  ;;  %v3375_v60 = vld [vmem:[%s5257_s16 + $0x280] sm:$0xff] }
 0x22f   : > { %3304 = vst [vmem:[%s6055_s23 + $0x260] sm:$0xff] %v3303_v29  ;;  %3306 = vst [vmem:[%s6055_s23 + $0x268] sm:$0xff] %v3305_v12  ;;  %v3377_v40 = vld [vmem:[%s5257_s16 + $0x288] sm:$0xff]  ;;  %v3379_v45 = vld [vmem:[%s5257_s16 + $0x290] sm:$0xff] }
 0x230   : > { %3308 = vst [vmem:[%s6055_s23 + $0x270] sm:$0xff] %v3307_v58  ;;  %3310 = vst [vmem:[%s6055_s23 + $0x278] sm:$0xff] %v3309_v6  ;;  %v3381_v30 = vld [vmem:[%s5257_s16 + $0x298] sm:$0xff]  ;;  %v3383_v0 = vld [vmem:[%s5257_s16 + $0x2a0] sm:$0xff] }
 0x231   : > { %3312 = vst [vmem:[%s6055_s23 + $0x300] sm:$0xff] %v3311_v31  ;;  %3314 = vst [vmem:[%s6055_s23 + $0x308] sm:$0xff] %v3313_v11  ;;  %v3385_v14 = vld [vmem:[%s5257_s16 + $0x2a8] sm:$0xff]  ;;  %v3387_v38 = vld [vmem:[%s5257_s16 + $0x2b0] sm:$0xff] }
 0x232   : > { %3316 = vst [vmem:[%s6055_s23 + $0x310] sm:$0xff] %v3315_v23  ;;  %3318 = vst [vmem:[%s6055_s23 + $0x318] sm:$0xff] %v3317_v28  ;;  %v3389_v39 = vld [vmem:[%s5257_s16 + $0x2b8] sm:$0xff]  ;;  %v3391_v2 = vld [vmem:[%s5257_s16 + $0x2c0] sm:$0xff] }
 0x233   : > { %3320 = vst [vmem:[%s6055_s23 + $0x320] sm:$0xff] %v3319_v44  ;;  %3322 = vst [vmem:[%s6055_s23 + $0x328] sm:$0xff] %v3321_v34  ;;  %v3393_v62 = vld [vmem:[%s5257_s16 + $0x2c8] sm:$0xff]  ;;  %v3395_v61 = vld [vmem:[%s5257_s16 + $0x2d0] sm:$0xff] }
 0x234   : > { %3324 = vst [vmem:[%s6055_s23 + $0x330] sm:$0xff] %v3323_v47  ;;  %3326 = vst [vmem:[%s6055_s23 + $0x338] sm:$0xff] %v3325_v7  ;;  %v3397_v35 = vld [vmem:[%s5257_s16 + $0x2d8] sm:$0xff]  ;;  %v3399_v63 = vld [vmem:[%s5257_s16 + $0x2e0] sm:$0xff] }
 0x235   : > { %3328 = vst [vmem:[%s6055_s23 + $0x340] sm:$0xff] %v3327_v51  ;;  %3330 = vst [vmem:[%s6055_s23 + $0x348] sm:$0xff] %v3329_v42  ;;  %v3401_v25 = vld [vmem:[%s5257_s16 + $0x2e8] sm:$0xff]  ;;  %v3403_v1 = vld [vmem:[%s5257_s16 + $0x2f0] sm:$0xff] }
 0x236   : > { %3332 = vst [vmem:[%s6055_s23 + $0x350] sm:$0xff] %v3331_v56  ;;  %3334 = vst [vmem:[%s6055_s23 + $0x358] sm:$0xff] %v3333_v48  ;;  %v3405_v27 = vld [vmem:[%s5257_s16 + $0x2f8] sm:$0xff]  ;;  %v3407_v37 = vld [vmem:[%s5257_s16 + $0x300] sm:$0xff] }
 0x237   : > { %3336 = vst [vmem:[%s6055_s23 + $0x360] sm:$0xff] %v3335_v33  ;;  %3338 = vst [vmem:[%s6055_s23 + $0x368] sm:$0xff] %v3337_v3  ;;  %v3409_v32 = vld [vmem:[%s5257_s16 + $0x308] sm:$0xff]  ;;  %v3411_v15 = vld [vmem:[%s5257_s16 + $0x310] sm:$0xff] }
 0x238   : > { %3340 = vst [vmem:[%s6055_s23 + $0x370] sm:$0xff] %v3339_v19  ;;  %3342 = vst [vmem:[%s6055_s23 + $0x378] sm:$0xff] %v3341_v41  ;;  %v3413_v54 = vld [vmem:[%s5257_s16 + $0x318] sm:$0xff]  ;;  %v3415_v46 = vld [vmem:[%s5257_s16 + $0x320] sm:$0xff] }
 0x239   : > { %3344 = vst [vmem:[%s6055_s23 + $0x400] sm:$0xff] %v3343_v18  ;;  %3346 = vst [vmem:[%s6055_s23 + $0x408] sm:$0xff] %v3345_v13  ;;  %v3417_v53 = vld [vmem:[%s5257_s16 + $0x328] sm:$0xff]  ;;  %v3419_v50 = vld [vmem:[%s5257_s16 + $0x330] sm:$0xff] }
 0x23a   : > { %3348 = vst [vmem:[%s6055_s23 + $0x410] sm:$0xff] %v3347_v4  ;;  %3350 = vst [vmem:[%s6055_s23 + $0x418] sm:$0xff] %v3349_v59  ;;  %v3421_v26 = vld [vmem:[%s5257_s16 + $0x338] sm:$0xff]  ;;  %v3423_v10 = vld [vmem:[%s5257_s16 + $0x340] sm:$0xff] }
 0x23b   : > { %3352 = vst [vmem:[%s6055_s23 + $0x420] sm:$0xff] %v3351_v8  ;;  %3354 = vst [vmem:[%s6055_s23 + $0x428] sm:$0xff] %v3353_v21  ;;  %v3425_v55 = vld [vmem:[%s5257_s16 + $0x348] sm:$0xff]  ;;  %v3427_v43 = vld [vmem:[%s5257_s16 + $0x350] sm:$0xff] }
 0x23c   : > { %3356 = vst [vmem:[%s6055_s23 + $0x430] sm:$0xff] %v3355_v49  ;;  %3358 = vst [vmem:[%s6055_s23 + $0x438] sm:$0xff] %v3357_v17  ;;  %v3429_v5 = vld [vmem:[%s5257_s16 + $0x358] sm:$0xff]  ;;  %v3431_v29 = vld [vmem:[%s5257_s16 + $0x360] sm:$0xff] }
 0x23d   : > { %3360 = vst [vmem:[%s6055_s23 + $0x440] sm:$0xff] %v3359_v22  ;;  %3362 = vst [vmem:[%s6055_s23 + $0x448] sm:$0xff] %v3361_v52  ;;  %v3433_v12 = vld [vmem:[%s5257_s16 + $0x368] sm:$0xff]  ;;  %v3435_v58 = vld [vmem:[%s5257_s16 + $0x370] sm:$0xff] }
 0x23e   : > { %3364 = vst [vmem:[%s6055_s23 + $0x450] sm:$0xff] %v3363_v9  ;;  %3366 = vst [vmem:[%s6055_s23 + $0x458] sm:$0xff] %v3365_v16  ;;  %v3437_v6 = vld [vmem:[%s5257_s16 + $0x378] sm:$0xff]  ;;  %v3439_v31 = vld [vmem:[%s5257_s16 + $0x380] sm:$0xff] }
 0x23f   : > { %3368 = vst [vmem:[%s6055_s23 + $0x460] sm:$0xff] %v3367_v20  ;;  %3370 = vst [vmem:[%s6055_s23 + $0x468] sm:$0xff] %v3369_v24  ;;  %v3441_v11 = vld [vmem:[%s5257_s16 + $0x388] sm:$0xff]  ;;  %v3443_v23 = vld [vmem:[%s5257_s16 + $0x390] sm:$0xff] }
 0x240   : > { %3372 = vst [vmem:[%s6055_s23 + $0x470] sm:$0xff] %v3371_v57  ;;  %3374 = vst [vmem:[%s6055_s23 + $0x478] sm:$0xff] %v3373_v36  ;;  %v3445_v28 = vld [vmem:[%s5257_s16 + $0x398] sm:$0xff]  ;;  %v3447_v44 = vld [vmem:[%s5257_s16 + $0x3a0] sm:$0xff] }
 0x241   : > { %3376 = vst [vmem:[%s6055_s23 + $0x500] sm:$0xff] %v3375_v60  ;;  %3378 = vst [vmem:[%s6055_s23 + $0x508] sm:$0xff] %v3377_v40  ;;  %v3449_v34 = vld [vmem:[%s5257_s16 + $0x3a8] sm:$0xff]  ;;  %v3451_v47 = vld [vmem:[%s5257_s16 + $0x3b0] sm:$0xff] }
 0x242   : > { %3380 = vst [vmem:[%s6055_s23 + $0x510] sm:$0xff] %v3379_v45  ;;  %3382 = vst [vmem:[%s6055_s23 + $0x518] sm:$0xff] %v3381_v30  ;;  %v3453_v7 = vld [vmem:[%s5257_s16 + $0x3b8] sm:$0xff]  ;;  %v3455_v51 = vld [vmem:[%s5257_s16 + $0x3c0] sm:$0xff] }
 0x243   : > { %3384 = vst [vmem:[%s6055_s23 + $0x520] sm:$0xff] %v3383_v0  ;;  %3386 = vst [vmem:[%s6055_s23 + $0x528] sm:$0xff] %v3385_v14  ;;  %v3457_v42 = vld [vmem:[%s5257_s16 + $0x3c8] sm:$0xff]  ;;  %v3459_v56 = vld [vmem:[%s5257_s16 + $0x3d0] sm:$0xff] }
 0x244   : > { %3388 = vst [vmem:[%s6055_s23 + $0x530] sm:$0xff] %v3387_v38  ;;  %3390 = vst [vmem:[%s6055_s23 + $0x538] sm:$0xff] %v3389_v39  ;;  %v3461_v48 = vld [vmem:[%s5257_s16 + $0x3d8] sm:$0xff]  ;;  %v3463_v33 = vld [vmem:[%s5257_s16 + $0x3e0] sm:$0xff] }
 0x245   : > { %3392 = vst [vmem:[%s6055_s23 + $0x540] sm:$0xff] %v3391_v2  ;;  %3394 = vst [vmem:[%s6055_s23 + $0x548] sm:$0xff] %v3393_v62  ;;  %v3465_v3 = vld [vmem:[%s5257_s16 + $0x3e8] sm:$0xff]  ;;  %v3467_v19 = vld [vmem:[%s5257_s16 + $0x3f0] sm:$0xff] }
 0x246   : > { %3396 = vst [vmem:[%s6055_s23 + $0x550] sm:$0xff] %v3395_v61  ;;  %3398 = vst [vmem:[%s6055_s23 + $0x558] sm:$0xff] %v3397_v35  ;;  %v3469_v41 = vld [vmem:[%s5257_s16 + $0x3f8] sm:$0xff]  ;;  %v3471_v18 = vld [vmem:[%s5257_s16 + $0x400] sm:$0xff] }
 0x247   : > { %3400 = vst [vmem:[%s6055_s23 + $0x560] sm:$0xff] %v3399_v63  ;;  %3402 = vst [vmem:[%s6055_s23 + $0x568] sm:$0xff] %v3401_v25  ;;  %v3473_v13 = vld [vmem:[%s5257_s16 + $0x408] sm:$0xff]  ;;  %v3475_v4 = vld [vmem:[%s5257_s16 + $0x410] sm:$0xff] }
 0x248   : > { %3404 = vst [vmem:[%s6055_s23 + $0x570] sm:$0xff] %v3403_v1  ;;  %3406 = vst [vmem:[%s6055_s23 + $0x578] sm:$0xff] %v3405_v27  ;;  %v3477_v59 = vld [vmem:[%s5257_s16 + $0x418] sm:$0xff]  ;;  %v3479_v8 = vld [vmem:[%s5257_s16 + $0x420] sm:$0xff] }
 0x249   : > { %3408 = vst [vmem:[%s6055_s23 + $0x600] sm:$0xff] %v3407_v37  ;;  %3410 = vst [vmem:[%s6055_s23 + $0x608] sm:$0xff] %v3409_v32  ;;  %v3481_v21 = vld [vmem:[%s5257_s16 + $0x428] sm:$0xff]  ;;  %v3483_v49 = vld [vmem:[%s5257_s16 + $0x430] sm:$0xff] }
 0x24a   : > { %3412 = vst [vmem:[%s6055_s23 + $0x610] sm:$0xff] %v3411_v15  ;;  %3414 = vst [vmem:[%s6055_s23 + $0x618] sm:$0xff] %v3413_v54  ;;  %v3485_v17 = vld [vmem:[%s5257_s16 + $0x438] sm:$0xff]  ;;  %v3487_v22 = vld [vmem:[%s5257_s16 + $0x440] sm:$0xff] }
 0x24b   : > { %3416 = vst [vmem:[%s6055_s23 + $0x620] sm:$0xff] %v3415_v46  ;;  %3418 = vst [vmem:[%s6055_s23 + $0x628] sm:$0xff] %v3417_v53  ;;  %v3489_v52 = vld [vmem:[%s5257_s16 + $0x448] sm:$0xff]  ;;  %v3491_v9 = vld [vmem:[%s5257_s16 + $0x450] sm:$0xff] }
 0x24c   : > { %3420 = vst [vmem:[%s6055_s23 + $0x630] sm:$0xff] %v3419_v50  ;;  %3422 = vst [vmem:[%s6055_s23 + $0x638] sm:$0xff] %v3421_v26  ;;  %v3493_v16 = vld [vmem:[%s5257_s16 + $0x458] sm:$0xff]  ;;  %v3495_v20 = vld [vmem:[%s5257_s16 + $0x460] sm:$0xff] }
 0x24d   : > { %3424 = vst [vmem:[%s6055_s23 + $0x640] sm:$0xff] %v3423_v10  ;;  %3426 = vst [vmem:[%s6055_s23 + $0x648] sm:$0xff] %v3425_v55  ;;  %v3497_v24 = vld [vmem:[%s5257_s16 + $0x468] sm:$0xff]  ;;  %v3499_v57 = vld [vmem:[%s5257_s16 + $0x470] sm:$0xff] }
 0x24e   : > { %3428 = vst [vmem:[%s6055_s23 + $0x650] sm:$0xff] %v3427_v43  ;;  %3430 = vst [vmem:[%s6055_s23 + $0x658] sm:$0xff] %v3429_v5  ;;  %v3501_v36 = vld [vmem:[%s5257_s16 + $0x478] sm:$0xff] }
 0x24f   : > { %3432 = vst [vmem:[%s6055_s23 + $0x660] sm:$0xff] %v3431_v29  ;;  %3434 = vst [vmem:[%s6055_s23 + $0x668] sm:$0xff] %v3433_v12 }
 0x250   : > { %3436 = vst [vmem:[%s6055_s23 + $0x670] sm:$0xff] %v3435_v58  ;;  %3438 = vst [vmem:[%s6055_s23 + $0x678] sm:$0xff] %v3437_v6 }
 0x251   : > { %3440 = vst [vmem:[%s6055_s23 + $0x700] sm:$0xff] %v3439_v31  ;;  %3442 = vst [vmem:[%s6055_s23 + $0x708] sm:$0xff] %v3441_v11 }
 0x252   : > { %3444 = vst [vmem:[%s6055_s23 + $0x710] sm:$0xff] %v3443_v23  ;;  %3446 = vst [vmem:[%s6055_s23 + $0x718] sm:$0xff] %v3445_v28 }
 0x253   : > { %3448 = vst [vmem:[%s6055_s23 + $0x720] sm:$0xff] %v3447_v44  ;;  %3450 = vst [vmem:[%s6055_s23 + $0x728] sm:$0xff] %v3449_v34 }
 0x254   : > { %3452 = vst [vmem:[%s6055_s23 + $0x730] sm:$0xff] %v3451_v47  ;;  %3454 = vst [vmem:[%s6055_s23 + $0x738] sm:$0xff] %v3453_v7 }
 0x255   : > { %3456 = vst [vmem:[%s6055_s23 + $0x740] sm:$0xff] %v3455_v51  ;;  %3458 = vst [vmem:[%s6055_s23 + $0x748] sm:$0xff] %v3457_v42 }
 0x256   : > { %3460 = vst [vmem:[%s6055_s23 + $0x750] sm:$0xff] %v3459_v56  ;;  %3462 = vst [vmem:[%s6055_s23 + $0x758] sm:$0xff] %v3461_v48 }
 0x257   : > { %3464 = vst [vmem:[%s6055_s23 + $0x760] sm:$0xff] %v3463_v33  ;;  %3466 = vst [vmem:[%s6055_s23 + $0x768] sm:$0xff] %v3465_v3 }
 0x258   : > { %3468 = vst [vmem:[%s6055_s23 + $0x770] sm:$0xff] %v3467_v19  ;;  %3470 = vst [vmem:[%s6055_s23 + $0x778] sm:$0xff] %v3469_v41 }
 0x259   : > { %3472 = vst [vmem:[%s6055_s23 + $0x800] sm:$0xff] %v3471_v18  ;;  %3474 = vst [vmem:[%s6055_s23 + $0x808] sm:$0xff] %v3473_v13 }
 0x25a   : > { %3476 = vst [vmem:[%s6055_s23 + $0x810] sm:$0xff] %v3475_v4  ;;  %3478 = vst [vmem:[%s6055_s23 + $0x818] sm:$0xff] %v3477_v59 }
 0x25b   : > { %3480 = vst [vmem:[%s6055_s23 + $0x820] sm:$0xff] %v3479_v8  ;;  %3482 = vst [vmem:[%s6055_s23 + $0x828] sm:$0xff] %v3481_v21 }
 0x25c   : > { %3484 = vst [vmem:[%s6055_s23 + $0x830] sm:$0xff] %v3483_v49  ;;  %3486 = vst [vmem:[%s6055_s23 + $0x838] sm:$0xff] %v3485_v17 }
 0x25d   : > { %3488 = vst [vmem:[%s6055_s23 + $0x840] sm:$0xff] %v3487_v22  ;;  %3490 = vst [vmem:[%s6055_s23 + $0x848] sm:$0xff] %v3489_v52 }
 0x25e   : > { %3492 = vst [vmem:[%s6055_s23 + $0x850] sm:$0xff] %v3491_v9  ;;  %3494 = vst [vmem:[%s6055_s23 + $0x858] sm:$0xff] %v3493_v16 }
 0x25f   : > { %3496 = vst [vmem:[%s6055_s23 + $0x860] sm:$0xff] %v3495_v20  ;;  %3498 = vst [vmem:[%s6055_s23 + $0x868] sm:$0xff] %v3497_v24 }
 0x260   : > { %3500 = vst [vmem:[%s6055_s23 + $0x870] sm:$0xff] %v3499_v57  ;;  %3502 = vst [vmem:[%s6055_s23 + $0x878] sm:$0xff] %v3501_v36 }
 0x261 PF: > { %s6600_s27 = sld [smem:[#allocation15_spill]]  ;;  %s3514_s12 = sand.u32 1, %s3942_s24  }
 0x262   : > { %s3515_s9 = scalar_lea.sflag [#allocation4], %s3514_s12 }
 0x267   : > { %p6601_p12 = scmp.ne.s32.totalorder %s6600_s27, 0 }
 0x269   : > { %p3752_p6 = pnand %p3703_p3, %p6601_p12 }
 0x26b   : > { %3937 = dma.done.wait (!%p3752_p6), %s3515_s9, 128  }
 0x26c   : > { %3939 = vsyncadd (!%p3752_p6), %s3515_s9, 4294967168  ;;  %s23_s29 = sadd.s32 1, %s3962_s29   ;;  %s6602_s16 = sld [smem:[#allocation14_spill]] }
 0x26d   : > { %p20_p7 = scmp.ge.s32.totalorder %s23_s29, 4   ;;  %s6603_s20 = sld [smem:[#allocation13_spill]] }
 0x26e   : > { %s6604_s24 = smov %s3946_s25  ;;  %s6605_s25 = smov %s3950_s26 }
 0x26f   : > { %s6607_s27 = smov %s3958_s28  ;;  %22 = sbr.rel (!%p20_p7) target bundleno = 6 (0x6), region = 197 }
 0x272   : > { %s6606_s26 = smov %s6602_s16 }
 0x273   : > { %s6608_s28 = smov %s6603_s20 }
 0x276   :  { %3539 = vsyncpa [#allocation3], 1 }
 0x277   :  { %3541 = vsyncpa [#allocation3 + $0x1], 1 }
 0x278   :  { %3542 = vsyncpa [#allocation4], 1 }
 0x279   :  { %3544 = vsyncpa [#allocation4 + $0x1], 1 }
 0x27a   :  { %3545 = vsyncpa [#allocation5], 1 }
 0x27b   :  { %3547 = vsyncpa [#allocation5 + $0x1], 1 }

</bundles_post_ra>
